<compile_context>
chip_gen: v7x
topology: tpu7x:2x2x1
jax: 0.10.0
libtpu: 0.0.40
codegen_flags: <defaults>
</compile_context>

<pallas_src>
import functools

import jax
import jax.numpy as jnp
from jax.experimental import pallas as pl
from jax.experimental.pallas import tpu as pltpu


# ------------------------------ small helpers ------------------------------ #
def _round_up(v, m):
    return -(-v // m) * m


def _vmem_budget_bytes():
    """Per-chip VMEM budget (review: the old hard-coded 48 MiB was sized for
    128 MiB parts and is 75% of v7x's 64 MiB)."""
    cap = 64 * 1024 * 1024  # conservative fallback == v7x physical VMEM
    try:
        cap = int(pltpu.get_tpu_info().vmem_capacity_bytes)
    except Exception:
        pass
    return max(32 * 1024 * 1024, min(int(0.6 * cap), 100 * 1024 * 1024))


def _ds(start, size, stride):
    """pl.ds that only passes a stride when it is actually needed."""
    if stride == 1:
        return pl.ds(start, size)
    return pl.ds(start, size, stride)


def _choose_band_rows(oh, ow, nc, vmem_budget):
    """Output rows per band: multiple of 8 (or == OH), >= 2 bands when possible
    (pipelining + megacore), shrunk if the f32 (rows, 2*nc) accumulator would
    crowd the per-chip VMEM budget."""
    if oh <= 8:
        return oh
    tr = _round_up(-(-oh // 2), 8)          # at least two bands when OH >= 16
    while tr > 8 and tr * ow * 2 * nc * 4 > vmem_budget // 6:
        tr -= 8
    return tr


# ----------------------------- Pallas kernel ------------------------------- #
def _glu_conv_kernel(x_ref, w_ref, b_ref, o_ref, *,
                     kh, kw, sh, sw, dh, dw, tr, ow, cout, nc):
    """One (batch, row-band) grid step of the fused GLU2d convolution.

    x_ref : (H_pad, W_pad, Cin)  bf16  -- whole padded image, resident per batch
    w_ref : (KH*KW, Cin, 2*nc)   bf16  -- fused map||gate weights, one tap per row
    b_ref : (1, 2*nc)            f32   -- fused biases
    o_ref : (tr*ow, cout)        bf16  -- NHWC-flat band of gated output pixels
    """
    r = pl.program_id(1)
    row0 = r * (tr * sh)
    if (tr * sh) % 8 == 0:
        row0 = pl.multiple_of(row0, 8)
    rows = tr * ow
    cin = x_ref.shape[-1]

    # In-kernel im2col: KH*KW tap slices straight out of the resident image,
    # each contracted against its (Cin, 2*nc) weight slab, accumulated in f32.
    acc = jnp.zeros((rows, 2 * nc), jnp.float32)
    for i in range(kh):                       # static, unrolled
        for j in range(kw):
            patch = x_ref[_ds(row0 + i * dh, tr, sh), _ds(j * dw, ow, sw), :]
            patch = patch.reshape(rows, cin)                       # (rows, Cin) bf16
            acc = acc + jnp.dot(patch, w_ref[i * kw + j],
                                preferred_element_type=jnp.float32)

    x_map = acc[:, :cout] + b_ref[:, :cout]                        # (rows, cout) f32
    gate = acc[:, nc:nc + cout] + b_ref[:, nc:nc + cout]
    # sigmoid: exp goes to the EUP; approx reciprocal keeps the divide off the VALU.
    sig = pl.reciprocal(1.0 + jnp.exp(-gate), approx=True)
    o_ref[...] = (x_map * sig).astype(o_ref.dtype)


def _glu_conv(x_nhwc, w_fused, b_fused, *, kh, kw, sh, sw, dh, dw,
              oh, ow, cout, nc, tr, vmem_budget):
    """x_nhwc: (B, H_pad, W_pad, Cin) bf16; returns (B, OH*OW, Cout) bf16."""
    B, H_pad, W_pad, Cin = x_nhwc.shape
    nb = -(-oh // tr)

    kernel = functools.partial(
        _glu_conv_kernel, kh=kh, kw=kw, sh=sh, sw=sw, dh=dh, dw=dw,
        tr=tr, ow=ow, cout=cout, nc=nc)

    return pl.pallas_call(
        kernel,
        out_shape=jax.ShapeDtypeStruct((B, oh * ow, cout), jnp.bfloat16),
        grid_spec=pltpu.PrefetchScalarGridSpec(
            num_scalar_prefetch=0,
            grid=(B, nb),
            in_specs=[
                # Whole padded image: block index constant along the band axis,
                # so it is DMA'd once per batch and reused from VMEM.
                pl.BlockSpec((None, H_pad, W_pad, Cin), lambda b, r: (b, 0, 0, 0)),
                # Fused map||gate weights + bias: resident for the whole grid.
                # TODO(synk): pipeline_mode=pl.Buffered(1) to drop the 2nd buffer.
                pl.BlockSpec((kh * kw, Cin, 2 * nc), lambda b, r: (0, 0, 0)),
                pl.BlockSpec((1, 2 * nc), lambda b, r: (0, 0)),
            ],
            # NHWC-flat band; last band's out-of-range rows are masked on store.
            out_specs=pl.BlockSpec((None, tr * ow, cout), lambda b, r: (b, r, 0)),
        ),
        compiler_params=pltpu.CompilerParams(
            dimension_semantics=("parallel", "arbitrary"),
            vmem_limit_bytes=vmem_budget,
        ),
    )(x_nhwc, w_fused, b_fused)


# ------------------------------ host wrapper ------------------------------- #
@functools.partial(jax.jit, static_argnames=("kernel_size", "stride", "padding",
                                              "dilation", "out_dtype"))
def glu2d_forward(x, w_map, b_map, w_gate, b_gate, *,
                  kernel_size, stride=(1, 1), padding=(0, 0), dilation=(1, 1),
                  out_dtype=jnp.float32):
    """GLU2d forward.  x: (B, Cin, H, W) NCHW;  conv weights: (Cout, Cin, KH, KW).
    Returns (B, Cout, OH, OW).  The kernel writes bf16; the final layout pass
    casts to `out_dtype`."""
    kh, kw = kernel_size
    sh, sw = stride
    ph, pw = padding
    dh, dw = dilation
    B, cin, H, W = x.shape
    cout = w_map.shape[0]

    oh = (H + 2 * ph - dh * (kh - 1) - 1) // sh + 1
    ow = (W + 2 * pw - dw * (kw - 1) - 1) // sw + 1
    nc = _round_up(cout, 128)          # lane-aligned map/gate split (VMEM only)

    vmem_budget = _vmem_budget_bytes()
    tr = _choose_band_rows(oh, ow, nc, vmem_budget)
    nb = -(-oh // tr)

    # Pad so (a) the conv padding is materialized and (b) the last row band's
    # input window stays in bounds (its extra output rows are masked on store).
    need_h = (nb * tr - 1) * sh + (kh - 1) * dh + 1
    extra_h = max(0, need_h - (H + 2 * ph))
    x_nhwc = jnp.pad(x, ((0, 0), (0, 0), (ph, ph + extra_h), (pw, pw)))
    x_nhwc = x_nhwc.transpose(0, 2, 3, 1).astype(jnp.bfloat16)   # single small input pass

    # torch conv weight (Cout, Cin, KH, KW) -> (KH*KW, Cin, Cout), zero-pad the
    # output columns to the lane-aligned width, fuse map||gate into one tensor.
    def prep_w(w):
        wt = w.transpose(2, 3, 1, 0).reshape(kh * kw, cin, cout).astype(jnp.bfloat16)
        return jnp.pad(wt, ((0, 0), (0, 0), (0, nc - cout)))

    def prep_b(b):
        return jnp.pad(b.astype(jnp.float32), (0, nc - cout))

    w_fused = jnp.concatenate([prep_w(w_map), prep_w(w_gate)], axis=-1)  # (KH*KW, Cin, 2*nc)
    b_fused = jnp.concatenate([prep_b(b_map), prep_b(b_gate)]).reshape(1, -1)

    out = _glu_conv(x_nhwc, w_fused, b_fused,
                    kh=kh, kw=kw, sh=sh, sw=sw, dh=dh, dw=dw,
                    oh=oh, ow=ow, cout=cout, nc=nc, tr=tr,
                    vmem_budget=vmem_budget)                     # (B, OH*OW, Cout) bf16

    # Reshape is free metadata; the transpose is the single remaining host pass
    # over the output (bf16 read) and also performs the cast to out_dtype.
    return out.reshape(B, oh, ow, cout).transpose(0, 3, 1, 2).astype(out_dtype)


# -------------------------------- reference -------------------------------- #
def _glu2d_reference(x, w_map, b_map, w_gate, b_gate, *, stride, padding, dilation):
    dn = jax.lax.conv_dimension_numbers(x.shape, w_map.shape, ("NCHW", "OIHW", "NCHW"))
    pad = [(padding[0], padding[0]), (padding[1], padding[1])]
    conv = lambda w, b: jax.lax.conv_general_dilated(
        x, w, window_strides=stride, padding=pad, rhs_dilation=dilation,
        dimension_numbers=dn) + b.reshape(1, -1, 1, 1)
    return conv(w_map, b_map) * jax.nn.sigmoid(conv(w_gate, b_gate))


# ---------------------------------- main ------------------------------------ #
if __name__ == "__main__":
    B, Cin, Cout, H, W = 2, 4, 8, 16, 16
    KH, KW = 3, 3
    stride, padding, dilation = (1, 1), (0, 0), (1, 1)

    key = jax.random.PRNGKey(0)
    kx, k1, k2, k3, k4 = jax.random.split(key, 5)
    x = jax.random.normal(kx, (B, Cin, H, W), dtype=jnp.float32)
    fan_in = Cin * KH * KW
    bound = 1.0 / (fan_in ** 0.5)  # matches torch Conv2d default init range
    w_map = jax.random.uniform(k1, (Cout, Cin, KH, KW), jnp.float32, -bound, bound)
    b_map = jax.random.uniform(k2, (Cout,), jnp.float32, -bound, bound)
    w_gate = jax.random.uniform(k3, (Cout, Cin, KH, KW), jnp.float32, -bound, bound)
    b_gate = jax.random.uniform(k4, (Cout,), jnp.float32, -bound, bound)

    out = glu2d_forward(x, w_map, b_map, w_gate, b_gate,
                        kernel_size=(KH, KW), stride=stride,
                        padding=padding, dilation=dilation)
    out = jax.block_until_ready(out)

    ref = _glu2d_reference(x, w_map, b_map, w_gate, b_gate,
                           stride=stride, padding=padding, dilation=dilation)
    assert out.shape == (B, Cout, H - KH + 1, W - KW + 1), out.shape
    # bf16 MXU inputs / bf16 writeback (f32 accumulation) vs f32 reference.
    assert jnp.allclose(out, ref, atol=5e-2, rtol=5e-2), "mismatch vs reference"
    print("KERNEL_OK")
</pallas_src>

<mosaic_0001>
module attributes {stable_mosaic.version = 11 : i64} {
  func.func @_glu_conv_kernel(%arg0: i32, %arg1: i32, %arg2: memref<1x18x16x4xbf16, #tpu.memory_space<vmem>>, %arg3: memref<9x4x256xbf16, #tpu.memory_space<vmem>>, %arg4: memref<1x256xf32, #tpu.memory_space<vmem>>, %arg5: memref<1x112x8xbf16, #tpu.memory_space<vmem>>) attributes {dimension_semantics = [#tpu.dimension_semantics<parallel>, #tpu.dimension_semantics<arbitrary>], iteration_bounds = array<i64: 2, 2>, scalar_prefetch = 0 : i64, scratch_operands = 0 : i64, tpu.core_type = #tpu.core_type<tc>, window_params = [{transform_indices = @transform_0, window_bounds = array<i64: 1, 18, 16, 4>}, {pipeline_mode = #tpu.pipeline_mode<synchronous>, transform_indices = @transform_1, window_bounds = array<i64: 9, 4, 256>}, {pipeline_mode = #tpu.pipeline_mode<synchronous>, transform_indices = @transform_2, window_bounds = array<i64: 1, 256>}, {transform_indices = @transform_3, window_bounds = array<i64: 1, 112, 8>}]} {
    %c8_i32 = arith.constant 8 : i32
    %0 = arith.muli %arg1, %c8_i32 : i32
    %1 = tpu.assume_multiple %0, 8 : i32
    %cst = arith.constant 0.000000e+00 : f32
    %2 = vector.broadcast %cst : f32 to vector<112x256xf32>
    %c0_i32 = arith.constant 0 : i32
    %3 = arith.addi %1, %c0_i32 : i32
    %c0 = arith.constant 0 : index
    %4 = arith.index_cast %3 : i32 to index
    %c0_0 = arith.constant 0 : index
    %c0_1 = arith.constant 0 : index
    %5 = vector.load %arg2[%c0, %4, %c0_0, %c0_1] : memref<1x18x16x4xbf16, #tpu.memory_space<vmem>>, vector<1x8x14x4xbf16>
    %6 = vector.shape_cast %5 : vector<1x8x14x4xbf16> to vector<8x14x4xbf16>
    %7 = vector.shape_cast %6 : vector<8x14x4xbf16> to vector<112x4xbf16>
    %c0_2 = arith.constant 0 : index
    %c0_3 = arith.constant 0 : index
    %c0_4 = arith.constant 0 : index
    %8 = vector.load %arg3[%c0_2, %c0_3, %c0_4] : memref<9x4x256xbf16, #tpu.memory_space<vmem>>, vector<1x4x256xbf16>
    %9 = vector.shape_cast %8 : vector<1x4x256xbf16> to vector<4x256xbf16>
    %cst_5 = arith.constant dense<0.000000e+00> : vector<112x256xf32>
    %10 = tpu.matmul %7, %9, %cst_5 {dimension_numbers = #tpu.dot_dimension_numbers<[1], [0], [0], [1], [0, 0, 1, 1], [], []>} : vector<112x4xbf16>, vector<4x256xbf16>, vector<112x256xf32> -> vector<112x256xf32>
    %11 = arith.addf %2, %10 : vector<112x256xf32>
    %c0_i32_6 = arith.constant 0 : i32
    %12 = arith.addi %1, %c0_i32_6 : i32
    %c0_7 = arith.constant 0 : index
    %13 = arith.index_cast %12 : i32 to index
    %c1 = arith.constant 1 : index
    %c0_8 = arith.constant 0 : index
    %14 = vector.load %arg2[%c0_7, %13, %c1, %c0_8] : memref<1x18x16x4xbf16, #tpu.memory_space<vmem>>, vector<1x8x14x4xbf16>
    %15 = vector.shape_cast %14 : vector<1x8x14x4xbf16> to vector<8x14x4xbf16>
    %16 = vector.shape_cast %15 : vector<8x14x4xbf16> to vector<112x4xbf16>
    %c1_9 = arith.constant 1 : index
    %c0_10 = arith.constant 0 : index
    %c0_11 = arith.constant 0 : index
    %17 = vector.load %arg3[%c1_9, %c0_10, %c0_11] : memref<9x4x256xbf16, #tpu.memory_space<vmem>>, vector<1x4x256xbf16>
    %18 = vector.shape_cast %17 : vector<1x4x256xbf16> to vector<4x256xbf16>
    %cst_12 = arith.constant dense<0.000000e+00> : vector<112x256xf32>
    %19 = tpu.matmul %16, %18, %cst_12 {dimension_numbers = #tpu.dot_dimension_numbers<[1], [0], [0], [1], [0, 0, 1, 1], [], []>} : vector<112x4xbf16>, vector<4x256xbf16>, vector<112x256xf32> -> vector<112x256xf32>
    %20 = arith.addf %11, %19 : vector<112x256xf32>
    %c0_i32_13 = arith.constant 0 : i32
    %21 = arith.addi %1, %c0_i32_13 : i32
    %c0_14 = arith.constant 0 : index
    %22 = arith.index_cast %21 : i32 to index
    %c2 = arith.constant 2 : index
    %c0_15 = arith.constant 0 : index
    %23 = vector.load %arg2[%c0_14, %22, %c2, %c0_15] : memref<1x18x16x4xbf16, #tpu.memory_space<vmem>>, vector<1x8x14x4xbf16>
    %24 = vector.shape_cast %23 : vector<1x8x14x4xbf16> to vector<8x14x4xbf16>
    %25 = vector.shape_cast %24 : vector<8x14x4xbf16> to vector<112x4xbf16>
    %c2_16 = arith.constant 2 : index
    %c0_17 = arith.constant 0 : index
    %c0_18 = arith.constant 0 : index
    %26 = vector.load %arg3[%c2_16, %c0_17, %c0_18] : memref<9x4x256xbf16, #tpu.memory_space<vmem>>, vector<1x4x256xbf16>
    %27 = vector.shape_cast %26 : vector<1x4x256xbf16> to vector<4x256xbf16>
    %cst_19 = arith.constant dense<0.000000e+00> : vector<112x256xf32>
    %28 = tpu.matmul %25, %27, %cst_19 {dimension_numbers = #tpu.dot_dimension_numbers<[1], [0], [0], [1], [0, 0, 1, 1], [], []>} : vector<112x4xbf16>, vector<4x256xbf16>, vector<112x256xf32> -> vector<112x256xf32>
    %29 = arith.addf %20, %28 : vector<112x256xf32>
    %c1_i32 = arith.constant 1 : i32
    %30 = arith.addi %1, %c1_i32 : i32
    %c0_20 = arith.constant 0 : index
    %31 = arith.index_cast %30 : i32 to index
    %c0_21 = arith.constant 0 : index
    %c0_22 = arith.constant 0 : index
    %32 = vector.load %arg2[%c0_20, %31, %c0_21, %c0_22] : memref<1x18x16x4xbf16, #tpu.memory_space<vmem>>, vector<1x8x14x4xbf16>
    %33 = vector.shape_cast %32 : vector<1x8x14x4xbf16> to vector<8x14x4xbf16>
    %34 = vector.shape_cast %33 : vector<8x14x4xbf16> to vector<112x4xbf16>
    %c3 = arith.constant 3 : index
    %c0_23 = arith.constant 0 : index
    %c0_24 = arith.constant 0 : index
    %35 = vector.load %arg3[%c3, %c0_23, %c0_24] : memref<9x4x256xbf16, #tpu.memory_space<vmem>>, vector<1x4x256xbf16>
    %36 = vector.shape_cast %35 : vector<1x4x256xbf16> to vector<4x256xbf16>
    %cst_25 = arith.constant dense<0.000000e+00> : vector<112x256xf32>
    %37 = tpu.matmul %34, %36, %cst_25 {dimension_numbers = #tpu.dot_dimension_numbers<[1], [0], [0], [1], [0, 0, 1, 1], [], []>} : vector<112x4xbf16>, vector<4x256xbf16>, vector<112x256xf32> -> vector<112x256xf32>
    %38 = arith.addf %29, %37 : vector<112x256xf32>
    %c1_i32_26 = arith.constant 1 : i32
    %39 = arith.addi %1, %c1_i32_26 : i32
    %c0_27 = arith.constant 0 : index
    %40 = arith.index_cast %39 : i32 to index
    %c1_28 = arith.constant 1 : index
    %c0_29 = arith.constant 0 : index
    %41 = vector.load %arg2[%c0_27, %40, %c1_28, %c0_29] : memref<1x18x16x4xbf16, #tpu.memory_space<vmem>>, vector<1x8x14x4xbf16>
    %42 = vector.shape_cast %41 : vector<1x8x14x4xbf16> to vector<8x14x4xbf16>
    %43 = vector.shape_cast %42 : vector<8x14x4xbf16> to vector<112x4xbf16>
    %c4 = arith.constant 4 : index
    %c0_30 = arith.constant 0 : index
    %c0_31 = arith.constant 0 : index
    %44 = vector.load %arg3[%c4, %c0_30, %c0_31] : memref<9x4x256xbf16, #tpu.memory_space<vmem>>, vector<1x4x256xbf16>
    %45 = vector.shape_cast %44 : vector<1x4x256xbf16> to vector<4x256xbf16>
    %cst_32 = arith.constant dense<0.000000e+00> : vector<112x256xf32>
    %46 = tpu.matmul %43, %45, %cst_32 {dimension_numbers = #tpu.dot_dimension_numbers<[1], [0], [0], [1], [0, 0, 1, 1], [], []>} : vector<112x4xbf16>, vector<4x256xbf16>, vector<112x256xf32> -> vector<112x256xf32>
    %47 = arith.addf %38, %46 : vector<112x256xf32>
    %c1_i32_33 = arith.constant 1 : i32
    %48 = arith.addi %1, %c1_i32_33 : i32
    %c0_34 = arith.constant 0 : index
    %49 = arith.index_cast %48 : i32 to index
    %c2_35 = arith.constant 2 : index
    %c0_36 = arith.constant 0 : index
    %50 = vector.load %arg2[%c0_34, %49, %c2_35, %c0_36] : memref<1x18x16x4xbf16, #tpu.memory_space<vmem>>, vector<1x8x14x4xbf16>
    %51 = vector.shape_cast %50 : vector<1x8x14x4xbf16> to vector<8x14x4xbf16>
    %52 = vector.shape_cast %51 : vector<8x14x4xbf16> to vector<112x4xbf16>
    %c5 = arith.constant 5 : index
    %c0_37 = arith.constant 0 : index
    %c0_38 = arith.constant 0 : index
    %53 = vector.load %arg3[%c5, %c0_37, %c0_38] : memref<9x4x256xbf16, #tpu.memory_space<vmem>>, vector<1x4x256xbf16>
    %54 = vector.shape_cast %53 : vector<1x4x256xbf16> to vector<4x256xbf16>
    %cst_39 = arith.constant dense<0.000000e+00> : vector<112x256xf32>
    %55 = tpu.matmul %52, %54, %cst_39 {dimension_numbers = #tpu.dot_dimension_numbers<[1], [0], [0], [1], [0, 0, 1, 1], [], []>} : vector<112x4xbf16>, vector<4x256xbf16>, vector<112x256xf32> -> vector<112x256xf32>
    %56 = arith.addf %47, %55 : vector<112x256xf32>
    %c2_i32 = arith.constant 2 : i32
    %57 = arith.addi %1, %c2_i32 : i32
    %c0_40 = arith.constant 0 : index
    %58 = arith.index_cast %57 : i32 to index
    %c0_41 = arith.constant 0 : index
    %c0_42 = arith.constant 0 : index
    %59 = vector.load %arg2[%c0_40, %58, %c0_41, %c0_42] : memref<1x18x16x4xbf16, #tpu.memory_space<vmem>>, vector<1x8x14x4xbf16>
    %60 = vector.shape_cast %59 : vector<1x8x14x4xbf16> to vector<8x14x4xbf16>
    %61 = vector.shape_cast %60 : vector<8x14x4xbf16> to vector<112x4xbf16>
    %c6 = arith.constant 6 : index
    %c0_43 = arith.constant 0 : index
    %c0_44 = arith.constant 0 : index
    %62 = vector.load %arg3[%c6, %c0_43, %c0_44] : memref<9x4x256xbf16, #tpu.memory_space<vmem>>, vector<1x4x256xbf16>
    %63 = vector.shape_cast %62 : vector<1x4x256xbf16> to vector<4x256xbf16>
    %cst_45 = arith.constant dense<0.000000e+00> : vector<112x256xf32>
    %64 = tpu.matmul %61, %63, %cst_45 {dimension_numbers = #tpu.dot_dimension_numbers<[1], [0], [0], [1], [0, 0, 1, 1], [], []>} : vector<112x4xbf16>, vector<4x256xbf16>, vector<112x256xf32> -> vector<112x256xf32>
    %65 = arith.addf %56, %64 : vector<112x256xf32>
    %c2_i32_46 = arith.constant 2 : i32
    %66 = arith.addi %1, %c2_i32_46 : i32
    %c0_47 = arith.constant 0 : index
    %67 = arith.index_cast %66 : i32 to index
    %c1_48 = arith.constant 1 : index
    %c0_49 = arith.constant 0 : index
    %68 = vector.load %arg2[%c0_47, %67, %c1_48, %c0_49] : memref<1x18x16x4xbf16, #tpu.memory_space<vmem>>, vector<1x8x14x4xbf16>
    %69 = vector.shape_cast %68 : vector<1x8x14x4xbf16> to vector<8x14x4xbf16>
    %70 = vector.shape_cast %69 : vector<8x14x4xbf16> to vector<112x4xbf16>
    %c7 = arith.constant 7 : index
    %c0_50 = arith.constant 0 : index
    %c0_51 = arith.constant 0 : index
    %71 = vector.load %arg3[%c7, %c0_50, %c0_51] : memref<9x4x256xbf16, #tpu.memory_space<vmem>>, vector<1x4x256xbf16>
    %72 = vector.shape_cast %71 : vector<1x4x256xbf16> to vector<4x256xbf16>
    %cst_52 = arith.constant dense<0.000000e+00> : vector<112x256xf32>
    %73 = tpu.matmul %70, %72, %cst_52 {dimension_numbers = #tpu.dot_dimension_numbers<[1], [0], [0], [1], [0, 0, 1, 1], [], []>} : vector<112x4xbf16>, vector<4x256xbf16>, vector<112x256xf32> -> vector<112x256xf32>
    %74 = arith.addf %65, %73 : vector<112x256xf32>
    %c2_i32_53 = arith.constant 2 : i32
    %75 = arith.addi %1, %c2_i32_53 : i32
    %c0_54 = arith.constant 0 : index
    %76 = arith.index_cast %75 : i32 to index
    %c2_55 = arith.constant 2 : index
    %c0_56 = arith.constant 0 : index
    %77 = vector.load %arg2[%c0_54, %76, %c2_55, %c0_56] : memref<1x18x16x4xbf16, #tpu.memory_space<vmem>>, vector<1x8x14x4xbf16>
    %78 = vector.shape_cast %77 : vector<1x8x14x4xbf16> to vector<8x14x4xbf16>
    %79 = vector.shape_cast %78 : vector<8x14x4xbf16> to vector<112x4xbf16>
    %c8 = arith.constant 8 : index
    %c0_57 = arith.constant 0 : index
    %c0_58 = arith.constant 0 : index
    %80 = vector.load %arg3[%c8, %c0_57, %c0_58] : memref<9x4x256xbf16, #tpu.memory_space<vmem>>, vector<1x4x256xbf16>
    %81 = vector.shape_cast %80 : vector<1x4x256xbf16> to vector<4x256xbf16>
    %cst_59 = arith.constant dense<0.000000e+00> : vector<112x256xf32>
    %82 = tpu.matmul %79, %81, %cst_59 {dimension_numbers = #tpu.dot_dimension_numbers<[1], [0], [0], [1], [0, 0, 1, 1], [], []>} : vector<112x4xbf16>, vector<4x256xbf16>, vector<112x256xf32> -> vector<112x256xf32>
    %83 = arith.addf %74, %82 : vector<112x256xf32>
    %84 = vector.extract_strided_slice %83 {offsets = [0, 0], sizes = [112, 8], strides = [1, 1]} : vector<112x256xf32> to vector<112x8xf32>
    %c0_60 = arith.constant 0 : index
    %c0_61 = arith.constant 0 : index
    %85 = vector.load %arg4[%c0_60, %c0_61] : memref<1x256xf32, #tpu.memory_space<vmem>>, vector<1x8xf32>
    %86 = vector.broadcast %85 : vector<1x8xf32> to vector<112x8xf32>
    %87 = arith.addf %84, %86 : vector<112x8xf32>
    %88 = vector.extract_strided_slice %83 {offsets = [0, 128], sizes = [112, 8], strides = [1, 1]} : vector<112x256xf32> to vector<112x8xf32>
    %c0_62 = arith.constant 0 : index
    %c128 = arith.constant 128 : index
    %89 = vector.load %arg4[%c0_62, %c128] : memref<1x256xf32, #tpu.memory_space<vmem>>, vector<1x8xf32>
    %90 = vector.broadcast %89 : vector<1x8xf32> to vector<112x8xf32>
    %91 = arith.addf %88, %90 : vector<112x8xf32>
    %cst_63 = arith.constant 0.000000e+00 : f32
    %92 = vector.broadcast %cst_63 : f32 to vector<112x8xf32>
    %93 = arith.subf %92, %91 : vector<112x8xf32>
    %94 = math.exp %93 : vector<112x8xf32>
    %cst_64 = arith.constant 1.000000e+00 : f32
    %95 = vector.broadcast %cst_64 : f32 to vector<112x8xf32>
    %96 = arith.addf %95, %94 : vector<112x8xf32>
    %97 = tpu.reciprocal %96 {approx = true} : vector<112x8xf32> -> vector<112x8xf32>
    %98 = arith.mulf %87, %97 : vector<112x8xf32>
    %99 = arith.truncf %98 : vector<112x8xf32> to vector<112x8xbf16>
    %c0_65 = arith.constant 0 : index
    %c0_66 = arith.constant 0 : index
    %c0_67 = arith.constant 0 : index
    %100 = vector.load %arg5[%c0_65, %c0_66, %c0_67] : memref<1x112x8xbf16, #tpu.memory_space<vmem>>, vector<1x112x8xbf16>
    %101 = vector.shape_cast %100 : vector<1x112x8xbf16> to vector<112x8xbf16>
    %102 = vector.shape_cast %99 : vector<112x8xbf16> to vector<1x112x8xbf16>
    tpu.vector_store %arg5[%c0_65, %c0_66, %c0_67], %102 {strides = array<i32>} : memref<1x112x8xbf16, #tpu.memory_space<vmem>>, vector<1x112x8xbf16>,
    return
  }
  func.func @transform_0(%arg0: i32, %arg1: i32) -> (i32, i32, i32, i32) {
    %c0_i32 = arith.constant 0 : i32
    %c0_i32_0 = arith.constant 0 : i32
    %c0_i32_1 = arith.constant 0 : i32
    %c0_i32_2 = arith.constant 0 : i32
    return %arg0, %c0_i32, %c0_i32_0, %c0_i32_1 : i32, i32, i32, i32
  }
  func.func @transform_1(%arg0: i32, %arg1: i32) -> (i32, i32, i32) {
    %c0_i32 = arith.constant 0 : i32
    %c0_i32_0 = arith.constant 0 : i32
    %c0_i32_1 = arith.constant 0 : i32
    %c0_i32_2 = arith.constant 0 : i32
    return %c0_i32, %c0_i32_0, %c0_i32_1 : i32, i32, i32
  }
  func.func @transform_2(%arg0: i32, %arg1: i32) -> (i32, i32) {
    %c0_i32 = arith.constant 0 : i32
    %c0_i32_0 = arith.constant 0 : i32
    %c0_i32_1 = arith.constant 0 : i32
    return %c0_i32, %c0_i32_0 : i32, i32
  }
  func.func @transform_3(%arg0: i32, %arg1: i32) -> (i32, i32, i32) {
    %c0_i32 = arith.constant 0 : i32
    %c0_i32_0 = arith.constant 0 : i32
    return %arg0, %arg1, %c0_i32 : i32, i32, i32
  }
}

</mosaic_0001>

<bundles_post_ra>
// kernel: glu2d_forward.1
= control target key start
LH: loop header
LB: loop body
LE: loop exit
PB: predicated region body
PF: predicated region fallthrough
CT: control target
= control target key end

     0   :  { %s11274_s12 = smov 0   ;;  %s11276_s13 = smov 0   ;;  %s13487_s0 = inlined_call_operand.vmem [shape: bf16[2,18,16,4], index: 0, kind: input, shape index: {}]   ;;  %s13488_s1 = inlined_call_operand.vmem [shape: bf16[9,4,256], index: 1, kind: input, shape index: {}]   ;;  %s13489_s2 = inlined_call_operand.vmem [shape: f32[1,256], index: 2, kind: input, shape index: {}]   ;;  %s13490_s3 = inlined_call_operand.vmem [shape: bf16[2,196,8], index: 3, kind: output, shape index: {}]  }
   0x1   :  { %s11278_s14 = smov 0   ;;  %s11280_s15 = smov 0  }
   0x2   :  { %s11282_s16 = smov 0   ;;  %s11284_s17 = smov 0  }
   0x3   :  { %s11286_s18 = smov 0  }
   0x4 LB: > { %s22_s19 = sadd.s32 1, %s11210_s16  ;;  %s25_s20 = sadd.s32 1, %s11214_s17  ;;  %s11218_s18 = sphi %s11286_s18, %s13_s18   ;;  %s11214_s17 = sphi %s11284_s17, %s13529_s17   ;;  %s11210_s16 = sphi %s11282_s16, %s13528_s16   ;;  %s11206_s15 = sphi %s11280_s15, %s13527_s15   ;;  %s11202_s14 = sphi %s11278_s14, %s13526_s14   ;;  %s11198_s13 = sphi %s11276_s13, %s13525_s13   ;;  %s11194_s12 = sphi %s11274_s12, %s13524_s12  }
   0x5   : > { %p23_p0 = scmp.ge.s32.totalorder %s22_s19, 2  ;;  %s10136_s21 = sadd.s32 4294967295, %s11218_s18  }
   0x6   : > { %p112_p1 = scmp.ne.s32.totalorder %s11198_s13, %s11194_s12  ;;  %p113_p2 = scmp.eq.s32.totalorder %s10136_s21, 3 }
   0x7   : > { %s13531_s19 = smov (%p23_p0, %s22_s19), 0  ;;  %s13533_s20 = smov (!%p23_p0, %s25_s20), %s11214_s17 }
   0x8   : > { %s98_s22 = ssub.s32 %s11210_s16, %s13531_s19  ;;  %p27_p3 = scmp.ge.s32.totalorder %s13533_s20, 2 }
   0x9   : > { %p10140_p4 = scmp.ge.s32.totalorder %s11218_s18, 1  ;;  %p11320_p5 = por %p113_p2, %p112_p1 }
   0xa   : > { %p151_p6 = scmp.lt.s32.totalorder %s11218_s18, 5  ;;  %s13535_s20 = smov (%p27_p3, %s13533_s20), 0 }
   0xb   : > { %s97_s24 = ssub.s32 %s11214_s17, %s13535_s20  ;;  %s102_s26 = sadd.s32 1, %s11198_s13 }
   0xc   : > { %p152_p7 = pnand %p10140_p4, %p151_p6  ;;  %s99_s25 = sor.u32 %s98_s22, %s97_s24 }
   0xd   : > { %p100_p8 = scmp.eq.s32.totalorder %s99_s25, 0 }
   0xe   : > { %155 = sbr.rel (%p152_p7) target bundleno = 765 (0x2fd), region = 32 }
   0xf   : > { %s11331_s27 = scalar_select %p100_p8, %s11198_s13, %s102_s26  }
  0x15   : > { %vm1653_vm0 = vcmask 1041408   ;;  %v10419_v0 = vld.sshfl [vmem:[%s13488_s1 + $0x10] sm:$0x33 pattern:$0x76325410]  ;;  %v232_v1 = vlaneseq  ;;  %v13491_v5 = vmov 0  }
  0x16   : > { %v11336_v2 = vcombine.high %v10419_v0, %v10419_v0  ;;  %v10226_v3 = vld.sshfl [vmem:[%s13488_s1 + $0x4] sm:$0x33 pattern:$0x76325410]  ;;  %v11342_v4 = vsel %vm1653_vm0, %v10419_v0, 0  ;;  %1692 = vmatprep.mubr.bf16.mxu1 %v13491_v5  ;;  %5382 = vmatprep.mubr.bf16.mxu0 %v13491_v5  ;;  %p174_p9 = scmp.lt.s32.totalorder %s11206_s15, 1 }
  0x17   : > { %13503 = vst [vmem:[#allocation4_spill] sm:$0xff] %v11342_v4  ;;  %v1630_v6 = vcombine.high %v10226_v3, %v10226_v3  ;;  %v1655_v7 = vsel %vm1653_vm0, %v10226_v3, 0  ;;  %v10469_v8 = vld.sshfl [vmem:[%s13488_s1 + $0x14] sm:$0x33 pattern:$0x76325410] }
  0x18   : > { %13502 = vst [vmem:[#allocation3_spill] sm:$0xff] %v11336_v2  ;;  %10420 = vmatprep.subr.msk.bf16.mxu0 %vm1653_vm0, %v11336_v2  ;;  %v6250_v9 = vcombine.high %v10469_v8, %v10469_v8  ;;  %s175_s7 = scalar_select %p174_p9, %s11206_s15, 1  ;;  %v233_v10 = vshrl.u32 %v232_v1, 7  ;;  %vm806_vm1 = vsmask.f32 256  ;;  %v11379_v22 = vsel %vm1653_vm0, %v10469_v8, 0 }
  0x19   : > { %10227 = vmatprep.subr.msk.bf16.mxu1 %vm1653_vm0, %v1630_v6  ;;  %5351 = vmatpush1.bf16.msra.mxu0 %v11342_v4  ;;  %v11253_v11 = vmov 1966171168   ;;  %vm807_vm2 = vsmask.f32 1284  ;;  %vm809_vm3 = vsmask.f32 2312 }
  0x1a   : > { %v230_v12 = vunpack.c.l.s4 %v11253_v11  ;;  %vm811_vm4 = vsmask.f32 3340  ;;  %1661 = vmatpush1.bf16.msra.mxu1 %v1655_v7  ;;  %10470 = vmatprep.subr.msk.bf16.mxu0 %vm1653_vm0, %v6250_v9  ;;  %s10947_s8 = smul.u32 144, %s175_s7  ;;  %s10703_s9 = sshll.u32 %s11202_s14, 6  ;;  %vm808_vm5 = vmor %vm806_vm1, %vm807_vm2  ;;  %vm813_vm6 = vsmask.f32 4368 }
  0x1b   : > { %vm810_vm7 = vmor %vm808_vm5, %vm809_vm3  ;;  %vm815_vm8 = vsmask.f32 5396  ;;  %vm817_vm10 = vsmask.f32 6424  ;;  %vm819_vm13 = vsmask.f32 7452 }
  0x1c   : > { %v231_v13 = vunpack.c.0.s8 %v230_v12  ;;  %s178_s21 = scalar_lea.vmem %s13487_s0, %s10947_s8  ;;  %vm812_vm9 = vmor %vm810_vm7, %vm811_vm4  ;;  %v10239_v14 = vld.sshfl [vmem:[%s13488_s1] sm:$0x33 pattern:$0x76325410]  ;;  %vm1631_vm1 = vcmask 31744   ;;  %s9849_s26 = smul.u32 (%p11320_p5), 14, %s11202_s14 }
  0x1d   : > { %s11364_s25 = scalar_lea.vmem %s178_s21, %s10703_s9  ;;  %vm814_vm11 = vmor %vm812_vm9, %vm813_vm6  ;;  %v2114_v16 = vcombine.high %v10239_v14, %v10239_v14  ;;  %v11371_v17 = vld.sshfl [vmem:[%s13488_s1 + $0x18] sm:$0x33 pattern:$0x76325410]  ;;  %v11383_v23 = vsel %vm1653_vm0, %v10239_v14, 0  ;;  %s171_s21 = sand.u32 1, %s11194_s12  }
  0x1e   : > { %v11366_v15 = vsub.s32 %v231_v13, %v233_v10  ;;  %v10145_v18 = vld.sshfl [vmem:[%s11364_s25] sm:$0x33 pattern:$0x75316420]  ;;  %vm816_vm12 = vmor %vm814_vm11, %vm815_vm8  ;;  %v7174_v27 = vcombine.high %v11371_v17, %v11371_v17  ;;  %v11393_v28 = vsel %vm1653_vm0, %v11371_v17, 0  ;;  %s10948_s28 = smul.u32 (%p11320_p5), 25, %s11206_s15 }
  0x1f   : > { %v10147_v19 = vld.sshfl [vmem:[%s11364_s25 + $0x8] sm:$0x33 pattern:$0x75316420]  ;;  %v228_v20 = vcombine.high %v10145_v18, %v10145_v18  ;;  %vm818_vm14 = vmor %vm816_vm12, %vm817_vm10  ;;  %10240 = vmatprep.subr.msk.bf16.mxu1 %vm1653_vm0, %v2114_v16  ;;  %s9850_s29 = ssub.s32 (%p11320_p5), 25, %s9849_s26 }
  0x20   : > { %v11376_v21 = vrot.slane %v10145_v18, %v11366_v15  ;;  %v275_v24 = vcombine.high %v10147_v19, %v10147_v19  ;;  %v11386_v25 = vrot.slane %v10147_v19, %v11366_v15  ;;  %v10161_v26 = vld.sshfl [vmem:[%s11364_s25 + $0x4] sm:$0x33 pattern:$0x75316420]  ;;  %vm11405_vm15 = vmor %vm818_vm14, %vm819_vm13  ;;  %p9851_p10 = scmp.lt.s32.totalorder (%p11320_p5), %s9850_s29, 14  ;;  %s9856_s30 = sadd.s32 (%p11320_p5), %s10948_s28, %s9849_s26 }
  0x21   : > { %v11396_v29 = vrot.slane %v228_v20, %v11366_v15  ;;  %v621_v31 = vcombine.high %v10161_v26, %v10161_v26  ;;  %v628_v32 = vrot.slane %v10161_v26, %v11366_v15  ;;  %v10347_v50 = vld.sshfl [vmem:[%s11364_s25 + $0xc] sm:$0x33 pattern:$0x75316420]  ;;  %s10692_s4 = sshll.u32 (%p11320_p5), %s9856_s30, 2 }
  0x22   : > { %v243_v30 = vcombine.high %v11376_v21, %v11376_v21  ;;  %v11402_v33 = vrot.slane %v275_v24, %v11366_v15  ;;  %v822_v35 = vshrl.u32 %v11376_v21, 16  ;;  %v879_v36 = vshrl.u32 %v11386_v25, 16  ;;  %v10348_v1 = vld.sshfl [vmem:[%s11364_s25 + $0x10] sm:$0x33 pattern:$0x75316420]  ;;  %s13407_s7 = scalar_lea.vmem (%p11320_p5), %s13490_s3, %s10692_s4  }
  0x23   : > { %v11413_v37 = vcombine.high %v11386_v25, %v11386_v25  ;;  %v244_v38 = vcombine.high %v11396_v29, %v11396_v29  ;;  %v635_v39 = vrot.slane %v621_v31, %v11366_v15  ;;  %v636_v40 = vcombine.high %v628_v32, %v628_v32 }
  0x24   : > { %v827_v41 = vshll.u32 %v11396_v29, 16  ;;  %v830_v42 = vshrl.u32 %v11396_v29, 16  ;;  %v835_v43 = vshll.u32 %v243_v30, 16  ;;  %v838_v44 = vshrl.u32 %v243_v30, 16 }
  0x25   : > { %v851_v45 = vshll.u32 %v628_v32, 16  ;;  %v637_v46 = vcombine.high %v635_v39, %v635_v39  ;;  %v843_v48 = vshll.u32 %v244_v38, 16  ;;  %v846_v49 = vshrl.u32 %v244_v38, 16 }
  0x26   : > { %v829_v47 = vsel %vm11405_vm15, %v822_v35, %v827_v41  ;;  %v837_v51 = vsel %vm11405_vm15, %v830_v42, %v835_v43  ;;  %v854_v52 = vshrl.u32 %v628_v32, 16  ;;  %v859_v53 = vshll.u32 %v635_v39, 16 }
  0x27   : > { %v862_v54 = vshrl.u32 %v635_v39, 16  ;;  %v845_v55 = vsel %vm11405_vm15, %v838_v44, %v843_v48  ;;  %v853_v56 = vsel %vm11405_vm15, %v846_v49, %v851_v45  ;;  %v867_v57 = vshll.u32 %v636_v40, 16 }
  0x28   : > { %v870_v58 = vshrl.u32 %v636_v40, 16  ;;  %v861_v59 = vsel %vm11405_vm15, %v854_v52, %v859_v53  ;;  %v875_v60 = vshll.u32 %v637_v46, 16  ;;  %v884_v61 = vshll.u32 %v11402_v33, 16 }
  0x29   : > { %v1279_v62 = vcombine.low %v829_v47, %v837_v51  ;;  %v869_v63 = vsel %vm11405_vm15, %v862_v54, %v867_v57  ;;  %v1280_v0 = vcombine.low %v845_v55, %v853_v56  ;;  %v11437_v3 = vcombine.high %v11402_v33, %v11402_v33 }
  0x2a   : > { %v4160_v6 = vcombine.high %v10347_v50, %v10347_v50  ;;  %v877_v7 = vsel %vm11405_vm15, %v870_v58, %v875_v60  ;;  %v886_v8 = vsel %vm11405_vm15, %v879_v36, %v884_v61  ;;  %v1281_v9 = vcombine.low %v861_v59, %v869_v63 }
  0x2b   : > { %v1289_v10 = vrot.slane %v1279_v62, %v11366_v15  ;;  %v1282_v11 = vcombine.low %v877_v7, %v886_v8  ;;  %v1296_v12 = vrot.slane %v1280_v0, %v11366_v15  ;;  %v11446_v13 = vrot.slane %v10347_v50, %v11366_v15 }
  0x2c   : > { %v11449_v14 = vrot.slane %v4160_v6, %v11366_v15  ;;  %v1303_v16 = vrot.slane %v1281_v9, %v11366_v15  ;;  %v4184_v18 = vcombine.high %v10348_v1, %v10348_v1  ;;  %v11453_v19 = vrot.slane %v10348_v1, %v11366_v15 }
  0x2d   : > { %v4522_v20 = vshrl.u32 %v11402_v33, 16  ;;  %v1310_v24 = vrot.slane %v1282_v11, %v11366_v15  ;;  %v1311_v26 = vcombine.low %v1289_v10, %v1296_v12  ;;  %v11459_v30 = vcombine.high %v11446_v13, %v11446_v13 }
  0x2e   : > { %v11463_v31 = vcombine.high %v11449_v14, %v11449_v14  ;;  %v11466_v32 = vrot.slane %v4184_v18, %v11366_v15  ;;  %v4527_v35 = vshll.u32 %v11413_v37, 16  ;;  %v4530_v36 = vshrl.u32 %v11413_v37, 16 }
  0x2f   : > { %v4535_v38 = vshll.u32 %v11437_v3, 16  ;;  %v1312_v39 = vcombine.low %v1303_v16, %v1310_v24  ;;  %v1319_v40 = vrot.slane %v1311_v26, %v11366_v15  ;;  %v4538_v41 = vshrl.u32 %v11437_v3, 16  ;;  %v10349_v16 = vld.sshfl [vmem:[%s11364_s25 + $0x14] sm:$0x33 pattern:$0x75316420] }
  0x30   : > { %v4543_v42 = vshll.u32 %v11446_v13, 16  ;;  %v4529_v43 = vsel %vm11405_vm15, %v4522_v20, %v4527_v35  ;;  %v4546_v45 = vshrl.u32 %v11446_v13, 16  ;;  %v4551_v46 = vshll.u32 %v11449_v14, 16 }
  0x31   : > { %v4537_v44 = vsel %vm11405_vm15, %v4530_v36, %v4535_v38  ;;  %v1326_v47 = vrot.slane %v1312_v39, %v11366_v15  ;;  %v4554_v49 = vshrl.u32 %v11449_v14, 16  ;;  %v4559_v50 = vshll.u32 %v11459_v30, 16  ;;  %v10350_v35 = vld.sshfl [vmem:[%s11364_s25 + $0x18] sm:$0x33 pattern:$0x75316420] }
  0x32   : > { %v4545_v48 = vsel %vm11405_vm15, %v4538_v41, %v4543_v42  ;;  %v4553_v51 = vsel %vm11405_vm15, %v4546_v45, %v4551_v46  ;;  %v4562_v52 = vshrl.u32 %v11459_v30, 16  ;;  %v4567_v53 = vshll.u32 %v11463_v31, 16 }
  0x33   : > { %v4571_v54 = vshrl.u32 %v11453_v19, 16  ;;  %v1327_v55 = vcombine.low %v1319_v40, %v1326_v47  ;;  %v4561_v56 = vsel %vm11405_vm15, %v4554_v49, %v4559_v50  ;;  %v4576_v57 = vshll.u32 %v11466_v32, 16 }
  0x34   : > { %v4971_v58 = vcombine.low %v886_v8, %v4529_v43  ;;  %v4569_v59 = vsel %vm11405_vm15, %v4562_v52, %v4567_v53  ;;  %v4972_v60 = vcombine.low %v4537_v44, %v4545_v48  ;;  %v4973_v61 = vcombine.low %v4553_v51, %v4561_v56 }
  0x35   : > { %10228 = vmatmul.mubr.msk.bf16.vlgmr.msra.gmra.mrb[0].mxu1 %vm1631_vm1, %v1327_v55  ;;  %v4578_v62 = vsel %vm11405_vm15, %v4571_v54, %v4576_v57  ;;  %v337_v0 = vcombine.high %v11453_v19, %v11453_v19  ;;  %v944_v10 = vshrl.u32 %v11466_v32, 16  ;;  %v1330_v12 = vcombine.low %v4561_v56, %v4569_v59 }
  0x36   : > { %v4981_v63 = vrot.slane %v4971_v58, %v11366_v15  ;;  %v4974_v1 = vcombine.low %v4569_v59, %v4578_v62  ;;  %v4988_v6 = vrot.slane %v4972_v60, %v11366_v15  ;;  %v4995_v7 = vrot.slane %v4973_v61, %v11366_v15  ;;  %1702 = vmatprep.mubr.bf16.mxu1 %v13491_v5 }
  0x37   : > { %2143 = vmatpush1.bf16.msra.mxu1 %v11383_v23  ;;  %v949_v11 = vshll.u32 %v337_v0, 16  ;;  %v1328_v26 = vcombine.low %v4529_v43, %v4537_v44  ;;  %v1329_v36 = vcombine.low %v4545_v48, %v4553_v51  ;;  %v1352_v23 = vrot.slane %v1330_v12, %v11366_v15 }
  0x38   : > { %v5002_v8 = vrot.slane %v4974_v1, %v11366_v15  ;;  %v5003_v9 = vcombine.low %v4981_v63, %v4988_v6  ;;  %v4200_v41 = vcombine.high %v11466_v32, %v11466_v32  ;;  %v4208_v42 = vcombine.high %v10349_v16, %v10349_v16 }
  0x39   : > { %v951_v24 = vsel %vm11405_vm15, %v944_v10, %v949_v11  ;;  %v1338_v40 = vrot.slane %v1328_v26, %v11366_v15  ;;  %v1345_v45 = vrot.slane %v1329_v36, %v11366_v15  ;;  %v11520_v47 = vrot.slane %v10349_v16, %v11366_v15 }
  0x3a   : > { %v5004_v18 = vcombine.low %v4995_v7, %v5002_v8  ;;  %v5011_v20 = vrot.slane %v5003_v9, %v11366_v15  ;;  %v1331_v38 = vcombine.low %v4578_v62, %v951_v24  ;;  %v4232_v43 = vcombine.high %v10350_v35, %v10350_v35 }
  0x3b   : > { %v11523_v48 = vrot.slane %v4208_v42, %v11366_v15  ;;  %v11526_v49 = vrot.slane %v10350_v35, %v11366_v15  ;;  %v1360_v50 = vcombine.low %v1338_v40, %v1345_v45  ;;  %v4223_v52 = vcombine.high %v11520_v47, %v11520_v47 }
  0x3c   : > { %v5018_v39 = vrot.slane %v5004_v18, %v11366_v15  ;;  %v1359_v46 = vrot.slane %v1331_v38, %v11366_v15  ;;  %v11531_v53 = vrot.slane %v4232_v43, %v11366_v15  ;;  %v4587_v56 = vshrl.u32 %v337_v0, 16 }
  0x3d   : > { %v4224_v54 = vcombine.high %v11523_v48, %v11523_v48  ;;  %v11538_v55 = vcombine.high %v11526_v49, %v11526_v49  ;;  %v1368_v57 = vrot.slane %v1360_v50, %v11366_v15  ;;  %v4592_v59 = vshll.u32 %v4200_v41, 16 }
  0x3e   : > { %v5019_v44 = vcombine.low %v5011_v20, %v5018_v39  ;;  %v1361_v51 = vcombine.low %v1352_v23, %v1359_v46  ;;  %v4595_v60 = vshrl.u32 %v4200_v41, 16  ;;  %v4600_v61 = vshll.u32 %v11520_v47, 16  ;;  %v10351_v41 = vld.sshfl [vmem:[%s11364_s25 + $0x1c] sm:$0x33 pattern:$0x75316420] }
  0x3f   : > { %v4603_v62 = vshrl.u32 %v11520_v47, 16  ;;  %v4608_v63 = vshll.u32 %v11523_v48, 16  ;;  %v4594_v0 = vsel %vm11405_vm15, %v4587_v56, %v4592_v59  ;;  %v4611_v1 = vshrl.u32 %v11523_v48, 16 }
  0x40   : > { %10421 = vmatmul.mubr.msk.bf16.vlgmr.msra.gmra.mrb[0].mxu0 %vm1631_vm1, %v5019_v44  ;;  %v1375_v58 = vrot.slane %v1361_v51, %v11366_v15  ;;  %v4616_v6 = vshll.u32 %v4223_v52, 16  ;;  %v4602_v7 = vsel %vm11405_vm15, %v4595_v60, %v4600_v61  ;;  %v4619_v9 = vshrl.u32 %v4223_v52, 16  ;;  %v10352_v56 = vld.sshfl [vmem:[%s11364_s25 + $0x20] sm:$0x33 pattern:$0x75316420] }
  0x41   : > { %6279 = vmatpush1.bf16.msra.mxu0 %v11379_v22  ;;  %5392 = vmatprep.mubr.bf16.mxu0 %v13491_v5  ;;  %v4610_v8 = vsel %vm11405_vm15, %v4603_v62, %v4608_v63  ;;  %v4624_v10 = vshll.u32 %v4224_v54, 16  ;;  %v4633_v11 = vshll.u32 %v11531_v53, 16  ;;  %v4636_v12 = vshrl.u32 %v11531_v53, 16 }
  0x42   : > { %10518 = vmatprep.subr.msk.bf16.mxu0 %vm1653_vm0, %v7174_v27  ;;  %v1376_v22 = vcombine.low %v1368_v57, %v1375_v58  ;;  %v4618_v17 = vsel %vm11405_vm15, %v4611_v1, %v4616_v6  ;;  %v4628_v27 = vshrl.u32 %v11526_v49, 16  ;;  %v4641_v18 = vshll.u32 %v11538_v55, 16 }
  0x43   : > { %v4626_v16 = vsel %vm11405_vm15, %v4619_v9, %v4624_v10  ;;  %v5020_v20 = vcombine.low %v951_v24, %v4594_v0  ;;  %v5021_v26 = vcombine.low %v4602_v7, %v4610_v8  ;;  %v11572_v38 = vcombine.high %v11531_v53, %v11531_v53 }
  0x44   : > { %10229 = vmatmul.mubr.msk.bf16.gmra.mrb[4].mxu1 %vm1631_vm1, %v1376_v22  ;;  %v4635_v35 = vsel %vm11405_vm15, %v4628_v27, %v4633_v11  ;;  %v5022_v36 = vcombine.low %v4618_v17, %v4626_v16  ;;  %v4643_v23 = vsel %vm11405_vm15, %v4636_v12, %v4641_v18  ;;  %v1009_v24 = vshrl.u32 %v11538_v55, 16 }
  0x45   : > { %1712 = vmatprep.mubr.bf16.mxu1 %v13491_v5  ;;  %v5030_v39 = vrot.slane %v5020_v20, %v11366_v15  ;;  %v5037_v40 = vrot.slane %v5021_v26, %v11366_v15  ;;  %v5023_v42 = vcombine.low %v4635_v35, %v4643_v23  ;;  %v1014_v46 = vshll.u32 %v11572_v38, 16 }
  0x46   : > { %v5044_v45 = vrot.slane %v5022_v36, %v11366_v15  ;;  %v1377_v44 = vcombine.low %v4594_v0, %v4602_v7  ;;  %v1378_v50 = vcombine.low %v4610_v8, %v4618_v17  ;;  %v1379_v51 = vcombine.low %v4626_v16, %v4635_v35 }
  0x47   : > { %v5052_v43 = vcombine.low %v5030_v39, %v5037_v40  ;;  %v5051_v52 = vrot.slane %v5023_v42, %v11366_v15  ;;  %v1016_v54 = vsel %vm11405_vm15, %v1009_v24, %v1014_v46  ;;  %v4256_v57 = vcombine.high %v10351_v41, %v10351_v41 }
  0x48   : > { %v1380_v59 = vcombine.low %v4643_v23, %v1016_v54  ;;  %v1387_v60 = vrot.slane %v1377_v44, %v11366_v15  ;;  %v1394_v61 = vrot.slane %v1378_v50, %v11366_v15  ;;  %v1401_v63 = vrot.slane %v1379_v51, %v11366_v15  ;;  %v10165_v44 = vld.sshfl [vmem:[%s11364_s25 + $0x24] sm:$0x33 pattern:$0x75316420] }
  0x49   : > { %v5060_v58 = vrot.slane %v5052_v43, %v11366_v15  ;;  %v5053_v62 = vcombine.low %v5044_v45, %v5051_v52  ;;  %v11591_v22 = vrot.slane %v10351_v41, %v11366_v15  ;;  %v11594_v0 = vrot.slane %v4256_v57, %v11366_v15 }
  0x4a   : > { %v1408_v1 = vrot.slane %v1380_v59, %v11366_v15  ;;  %v1409_v6 = vcombine.low %v1387_v60, %v1394_v61  ;;  %v4280_v7 = vcombine.high %v10352_v56, %v10352_v56  ;;  %v11598_v8 = vrot.slane %v10352_v56, %v11366_v15 }
  0x4b   : > { %v5067_v9 = vrot.slane %v5053_v62, %v11366_v15  ;;  %v11603_v10 = vcombine.high %v11591_v22, %v11591_v22  ;;  %v11607_v17 = vcombine.high %v11594_v0, %v11594_v0  ;;  %v4652_v20 = vshrl.u32 %v11572_v38, 16 }
  0x4c   : > { %v1410_v27 = vcombine.low %v1401_v63, %v1408_v1  ;;  %v1417_v11 = vrot.slane %v1409_v6, %v11366_v15  ;;  %v11611_v12 = vrot.slane %v4280_v7, %v11366_v15  ;;  %v4295_v16 = vcombine.high %v11598_v8, %v11598_v8 }
  0x4d   : > { %v5068_v18 = vcombine.low %v5060_v58, %v5067_v9  ;;  %v4657_v26 = vshll.u32 %v11591_v22, 16  ;;  %v4660_v23 = vshrl.u32 %v11591_v22, 16  ;;  %v4665_v39 = vshll.u32 %v11594_v0, 16 }
  0x4e   : > { %v1424_v35 = vrot.slane %v1410_v27, %v11366_v15  ;;  %v4296_v36 = vcombine.high %v11611_v12, %v11611_v12  ;;  %v4668_v24 = vshrl.u32 %v11594_v0, 16  ;;  %v4673_v41 = vshll.u32 %v11603_v10, 16 }
  0x4f   : > { %10422 = vmatmul.mubr.msk.bf16.gmra.mrb[4].mxu0 %vm1631_vm1, %v5068_v18  ;;  %v4659_v40 = vsel %vm11405_vm15, %v4652_v20, %v4657_v26  ;;  %v4667_v45 = vsel %vm11405_vm15, %v4660_v23, %v4665_v39  ;;  %v4676_v46 = vshrl.u32 %v11603_v10, 16  ;;  %v4681_v43 = vshll.u32 %v11607_v17, 16 }
  0x50   : > { %5402 = vmatprep.mubr.bf16.mxu0 %v13491_v5  ;;  %v1425_v42 = vcombine.low %v1417_v11, %v1424_v35  ;;  %v4675_v50 = vsel %vm11405_vm15, %v4668_v24, %v4673_v41  ;;  %v4685_v51 = vshrl.u32 %v11598_v8, 16  ;;  %v4690_v52 = vshll.u32 %v11611_v12, 16  ;;  %v10354_v41 = vld.sshfl [vmem:[%s11364_s25 + $0x28] sm:$0x33 pattern:$0x75316420] }
  0x51   : > { %v4693_v56 = vshrl.u32 %v11611_v12, 16  ;;  %v4683_v57 = vsel %vm11405_vm15, %v4676_v46, %v4681_v43  ;;  %v4698_v58 = vshll.u32 %v4295_v16, 16  ;;  %v4701_v59 = vshrl.u32 %v4295_v16, 16 }
  0x52   : > { %10230 = vmatmul.mubr.msk.bf16.gmra.mrb[8].mxu1 %vm1631_vm1, %v1425_v42  ;;  %v4706_v60 = vshll.u32 %v4296_v36, 16  ;;  %v4692_v61 = vsel %vm11405_vm15, %v4685_v51, %v4690_v52  ;;  %v5069_v62 = vcombine.low %v1016_v54, %v4659_v40  ;;  %v5070_v63 = vcombine.low %v4667_v45, %v4675_v50 }
  0x53   : > { %1722 = vmatprep.mubr.bf16.mxu1 %v13491_v5  ;;  %v11645_v1 = vrot.slane %v10165_v44, %v11366_v15  ;;  %v4700_v6 = vsel %vm11405_vm15, %v4693_v56, %v4698_v58  ;;  %v5071_v9 = vcombine.low %v4683_v57, %v4692_v61  ;;  %v1074_v54 = vshrl.u32 %v4296_v36, 16 }
  0x54   : > { %v4708_v7 = vsel %vm11405_vm15, %v4701_v59, %v4706_v60  ;;  %v5079_v11 = vrot.slane %v5069_v62, %v11366_v15  ;;  %v5086_v16 = vrot.slane %v5070_v63, %v11366_v15  ;;  %v1427_v26 = vcombine.low %v4675_v50, %v4683_v57  ;;  %v10355_v57 = vld.sshfl [vmem:[%s11364_s25 + $0x2c] sm:$0x33 pattern:$0x75316420] }
  0x55   : > { %v5072_v27 = vcombine.low %v4700_v6, %v4708_v7  ;;  %v5093_v18 = vrot.slane %v5071_v9, %v11366_v15  ;;  %v1079_v20 = vshll.u32 %v11645_v1, 16  ;;  %v1426_v39 = vcombine.low %v4659_v40, %v4667_v45 }
  0x56   : > { %v5101_v23 = vcombine.low %v5079_v11, %v5086_v16  ;;  %v1428_v24 = vcombine.low %v4692_v61, %v4700_v6  ;;  %v1443_v46 = vrot.slane %v1427_v26, %v11366_v15  ;;  %v4304_v43 = vcombine.high %v10165_v44, %v10165_v44 }
  0x57   : > { %v5100_v35 = vrot.slane %v5072_v27, %v11366_v15  ;;  %v1081_v42 = vsel %vm11405_vm15, %v1074_v54, %v1079_v20  ;;  %v4319_v36 = vcombine.high %v11645_v1, %v11645_v1  ;;  %v1436_v50 = vrot.slane %v1426_v39, %v11366_v15 }
  0x58   : > { %v5109_v52 = vrot.slane %v5101_v23, %v11366_v15  ;;  %v1429_v56 = vcombine.low %v4708_v7, %v1081_v42  ;;  %v1450_v40 = vrot.slane %v1428_v24, %v11366_v15  ;;  %v11667_v45 = vrot.slane %v4304_v43, %v11366_v15 }
  0x59   : > { %v5102_v51 = vcombine.low %v5093_v18, %v5100_v35  ;;  %v4328_v58 = vcombine.high %v10354_v41, %v10354_v41  ;;  %v11670_v59 = vrot.slane %v10354_v41, %v11366_v15  ;;  %v1458_v61 = vcombine.low %v1436_v50, %v1443_v46 }
  0x5a   : > { %v1457_v60 = vrot.slane %v1429_v56, %v11366_v15  ;;  %v4352_v62 = vcombine.high %v10355_v57, %v10355_v57  ;;  %v4320_v63 = vcombine.high %v11667_v45, %v11667_v45  ;;  %v11684_v9 = vrot.slane %v10355_v57, %v11366_v15 }
  0x5b   : > { %v5116_v44 = vrot.slane %v5102_v51, %v11366_v15  ;;  %v11677_v6 = vrot.slane %v4328_v58, %v11366_v15  ;;  %v11681_v7 = vcombine.high %v11670_v59, %v11670_v59  ;;  %v1466_v16 = vrot.slane %v1458_v61, %v11366_v15 }
  0x5c   : > { %v1459_v11 = vcombine.low %v1450_v40, %v1457_v60  ;;  %v11688_v54 = vrot.slane %v4352_v62, %v11366_v15  ;;  %v11696_v20 = vcombine.high %v11684_v9, %v11684_v9  ;;  %v4717_v26 = vshrl.u32 %v11645_v1, 16 }
  0x5d   : > { %v5117_v27 = vcombine.low %v5109_v52, %v5116_v44  ;;  %v11692_v18 = vcombine.high %v11677_v6, %v11677_v6  ;;  %v4722_v23 = vshll.u32 %v11667_v45, 16  ;;  %v4725_v39 = vshrl.u32 %v11667_v45, 16 }
  0x5e   : > { %v1473_v35 = vrot.slane %v1459_v11, %v11366_v15  ;;  %v4730_v24 = vshll.u32 %v4319_v36, 16  ;;  %v4733_v41 = vshrl.u32 %v4319_v36, 16  ;;  %v4738_v46 = vshll.u32 %v4320_v63, 16 }
  0x5f   : > { %10423 = vmatmul.mubr.msk.bf16.gmra.mrb[8].mxu0 %vm1631_vm1, %v5117_v27  ;;  %v4742_v43 = vshrl.u32 %v11670_v59, 16  ;;  %v4724_v52 = vsel %vm11405_vm15, %v4717_v26, %v4722_v23  ;;  %v4747_v50 = vshll.u32 %v11677_v6, 16  ;;  %v4750_v40 = vshrl.u32 %v11677_v6, 16 }
  0x60   : > { %5412 = vmatprep.mubr.bf16.mxu0 %v13491_v5  ;;  %v1474_v51 = vcombine.low %v1466_v16, %v1473_v35  ;;  %v4732_v56 = vsel %vm11405_vm15, %v4725_v39, %v4730_v24  ;;  %v4740_v57 = vsel %vm11405_vm15, %v4733_v41, %v4738_v46  ;;  %v4755_v58 = vshll.u32 %v11681_v7, 16  ;;  %v10444_v46 = vld.sshfl [vmem:[%s11364_s25 + $0x8] sm:$0x32 pattern:$0x75316420] }
  0x61   : > { %v4758_v36 = vshrl.u32 %v11681_v7, 16  ;;  %v4749_v44 = vsel %vm11405_vm15, %v4742_v43, %v4747_v50  ;;  %v4763_v60 = vshll.u32 %v11692_v18, 16  ;;  %v4766_v61 = vshrl.u32 %v11692_v18, 16 }
  0x62   : > { %10231 = vmatmul.mubr.msk.bf16.gmra.mrb[12].mxu1 %vm1631_vm1, %v1474_v51  ;;  %v4771_v62 = vshll.u32 %v11684_v9, 16  ;;  %v4757_v63 = vsel %vm11405_vm15, %v4750_v40, %v4755_v58  ;;  %v4774_v27 = vshrl.u32 %v11684_v9, 16  ;;  %v5118_v11 = vcombine.low %v1081_v42, %v4724_v52 }
  0x63   : > { %v5119_v16 = vcombine.low %v4732_v56, %v4740_v57  ;;  %1732 = vmatprep.mubr.bf16.mxu1 %v13491_v5  ;;  %v4765_v26 = vsel %vm11405_vm15, %v4758_v36, %v4763_v60  ;;  %v5120_v23 = vcombine.low %v4749_v44, %v4757_v63  ;;  %v1144_v42 = vshll.u32 %v11688_v54, 16  ;;  %v11740_v36 = vld.sshfl [vmem:[%s11364_s25 + $0x10] sm:$0x32 pattern:$0x75316420] }
  0x64   : > { %v4773_v35 = vsel %vm11405_vm15, %v4766_v61, %v4771_v62  ;;  %v5128_v24 = vrot.slane %v5118_v11, %v11366_v15  ;;  %v1477_v40 = vcombine.low %v4757_v63, %v4765_v26  ;;  %v5520_v60 = vcombine.high %v10444_v46, %v10444_v46 }
  0x65   : > { %v5121_v39 = vcombine.low %v4765_v26, %v4773_v35  ;;  %v5135_v41 = vrot.slane %v5119_v16, %v11366_v15  ;;  %v5142_v43 = vrot.slane %v5120_v23, %v11366_v15  ;;  %v11737_v58 = vsel %vm11405_vm15, %v4774_v27, %v1144_v42  ;;  %v10157_v26 = vld.sshfl [vmem:[%s11364_s25 + $0x30] sm:$0x33 pattern:$0x75316420] }
  0x66   : > { %13506 = vst [vmem:[#allocation5_spill] sm:$0xff] %v11737_v58  ;;  %v1475_v11 = vcombine.low %v4724_v52, %v4732_v56  ;;  %v1476_v16 = vcombine.low %v4740_v57, %v4749_v44  ;;  %v1478_v23 = vcombine.low %v4773_v35, %v11737_v58  ;;  %v1499_v5 = vrot.slane %v1477_v40, %v11366_v15 }
  0x67   : > { %v5149_v51 = vrot.slane %v5121_v39, %v11366_v15  ;;  %v5150_v50 = vcombine.low %v5128_v24, %v5135_v41  ;;  %v5527_v39 = vrot.slane %v10444_v46, %v11366_v15  ;;  %v5534_v63 = vrot.slane %v5520_v60, %v11366_v15 }
  0x68   : > { %v1485_v24 = vrot.slane %v1475_v11, %v11366_v15  ;;  %v1492_v41 = vrot.slane %v1476_v16, %v11366_v15  ;;  %v5568_v52 = vcombine.high %v11740_v36, %v11740_v36  ;;  %v1506_v56 = vrot.slane %v1478_v23, %v11366_v15  ;;  %v10167_v11 = vld.sshfl [vmem:[%s11364_s25 + $0x34] sm:$0x33 pattern:$0x75316420] }
  0x69   : > { %v5151_v61 = vcombine.low %v5142_v43, %v5149_v51  ;;  %v5158_v62 = vrot.slane %v5150_v50, %v11366_v15  ;;  %v5535_v57 = vcombine.high %v5527_v39, %v5527_v39  ;;  %v5536_v44 = vcombine.high %v5534_v63, %v5534_v63 }
  0x6a   : > { %v5901_v35 = vcombine.low %v11449_v14, %v11459_v30  ;;  %v1507_v43 = vcombine.low %v1485_v24, %v1492_v41  ;;  %v11757_v42 = vrot.slane %v5568_v52, %v11366_v15  ;;  %v510_v51 = vcombine.high %v10157_v26, %v10157_v26 }
  0x6b   : > { %v5165_v27 = vrot.slane %v5151_v61, %v11366_v15  ;;  %v1508_v50 = vcombine.low %v1499_v5, %v1506_v56  ;;  %v5899_v40 = vcombine.low %v5534_v63, %v5535_v57  ;;  %v5900_v60 = vcombine.low %v5536_v44, %v11446_v13 }
  0x6c   : > { %v5923_v61 = vrot.slane %v5901_v35, %v11366_v15  ;;  %v1515_v16 = vrot.slane %v1507_v43, %v11366_v15  ;;  %v5902_v14 = vcombine.low %v11463_v31, %v11757_v42  ;;  %v11767_v30 = vrot.slane %v10157_v26, %v11366_v15 }
  0x6d   : > { %v5166_v46 = vcombine.low %v5158_v62, %v5165_v27  ;;  %v11770_v62 = vrot.slane %v510_v51, %v11366_v15  ;;  %v13507_v5 = vmov 0   ;;  %v1522_v13 = vrot.slane %v1508_v50, %v11366_v15 }
  0x6e   : > { %v5909_v23 = vrot.slane %v5899_v40, %v11366_v15  ;;  %v5916_v39 = vrot.slane %v5900_v60, %v11366_v15  ;;  %v11778_v63 = vcombine.high %v11688_v54, %v11688_v54  ;;  %v5930_v31 = vrot.slane %v5902_v14, %v11366_v15 }
  0x6f   : > { %10424 = vmatmul.mubr.msk.bf16.gmra.mrb[12].mxu0 %vm1631_vm1, %v5166_v46  ;;  %v525_v26 = vcombine.high %v11767_v30, %v11767_v30  ;;  %v526_v27 = vcombine.high %v11770_v62, %v11770_v62  ;;  %v765_v24 = vcombine.high %v10167_v11, %v10167_v11  ;;  %v1523_v41 = vcombine.low %v1515_v16, %v1522_v13 }
  0x70   : > { %6310 = vmatprep.mubr.bf16.mxu0 %v13507_v5  ;;  %v5931_v52 = vcombine.low %v5909_v23, %v5916_v39  ;;  %v11786_v56 = vrot.slane %v10167_v11, %v11366_v15  ;;  %v1147_v57 = vshrl.u32 %v11688_v54, 16  ;;  %v5932_v44 = vcombine.low %v5923_v61, %v5930_v31 }
  0x71   : > { %v11790_v35 = vrot.slane %v765_v24, %v11366_v15  ;;  %v1152_v46 = vshll.u32 %v11696_v20, 16  ;;  %v1155_v43 = vshrl.u32 %v11696_v20, 16  ;;  %10232 = vmatmul.mubr.msk.bf16.gmra.mrb[16].mxu1 %vm1631_vm1, %v1523_v41  ;;  %v1160_v40 = vshll.u32 %v11778_v63, 16 }
  0x72   : > { %v5939_v51 = vrot.slane %v5931_v52, %v11366_v15  ;;  %v11798_v50 = vcombine.high %v11786_v56, %v11786_v56  ;;  %v1164_v60 = vshrl.u32 %v11767_v30, 16  ;;  %v5946_v61 = vrot.slane %v5932_v44, %v11366_v15  ;;  %1742 = vmatprep.mubr.bf16.mxu1 %v13507_v5 }
  0x73   : > { %v11806_v11 = vsel %vm11405_vm15, %v1147_v57, %v1152_v46  ;;  %v1169_v16 = vshll.u32 %v11770_v62, 16  ;;  %v1172_v14 = vshrl.u32 %v11770_v62, 16  ;;  %v11812_v13 = vsel %vm11405_vm15, %v1155_v43, %v1160_v40  ;;  %v10448_v40 = vld.sshfl [vmem:[%s11364_s25 + $0x18] sm:$0x32 pattern:$0x75316420] }
  0x74   : > { %13508 = vst [vmem:[#allocation6_spill] sm:$0xff] %v11806_v11  ;;  %13509 = vst [vmem:[#allocation7_spill] sm:$0xff] %v11812_v13  ;;  %v1177_v23 = vshll.u32 %v525_v26, 16  ;;  %v1180_v39 = vshrl.u32 %v525_v26, 16  ;;  %v1185_v31 = vshll.u32 %v526_v27, 16  ;;  %v5947_v24 = vcombine.low %v5939_v51, %v5946_v61 }
  0x75   : > { %v1171_v41 = vsel %vm11405_vm15, %v1164_v60, %v1169_v16  ;;  %v1188_v52 = vshrl.u32 %v526_v27, 16  ;;  %v1193_v44 = vshll.u32 %v11786_v56, 16  ;;  %v1196_v58 = vshrl.u32 %v11786_v56, 16 }
  0x76   : > { %v1179_v57 = vsel %vm11405_vm15, %v1172_v14, %v1177_v23  ;;  %v1187_v46 = vsel %vm11405_vm15, %v1180_v39, %v1185_v31  ;;  %v1201_v43 = vshll.u32 %v11790_v35, 16  ;;  %v1204_v27 = vshrl.u32 %v11790_v35, 16 }
  0x77   : > { %10471 = vmatmul.mubr.msk.bf16.vlgmr.msra.gmra.mrb[0].mxu0 %vm1631_vm1, %v5947_v24  ;;  %v1195_v26 = vsel %vm11405_vm15, %v1188_v52, %v1193_v44  ;;  %v1209_v51 = vshll.u32 %v11798_v50, 16  ;;  %v1524_v60 = vcombine.low %v11806_v11, %v11812_v13  ;;  %v1525_v16 = vcombine.low %v1171_v41, %v1179_v57 }
  0x78   : > { %7203 = vmatpush1.bf16.msra.mxu0 %v11393_v28  ;;  %6320 = vmatprep.mubr.bf16.mxu0 %v13507_v5  ;;  %v1203_v61 = vsel %vm11405_vm15, %v1196_v58, %v1201_v43  ;;  %v1526_v14 = vcombine.low %v1187_v46, %v1195_v26  ;;  %v1212_v23 = vshrl.u32 %v11798_v50, 16  ;;  %v5575_v24 = vrot.slane %v11740_v36, %v11366_v15  ;;  %v10159_v28 = vld.sshfl [vmem:[%s11364_s25 + $0x38] sm:$0x33 pattern:$0x75316420] }
  0x79   : > { %v1211_v39 = vsel %vm11405_vm15, %v1204_v27, %v1209_v51  ;;  %v1534_v31 = vrot.slane %v1524_v60, %v11366_v15  ;;  %v5616_v52 = vcombine.high %v10448_v40, %v10448_v40  ;;  %v1541_v13 = vrot.slane %v1525_v16, %v11366_v15  ;;  %v10168_v60 = vld.sshfl [vmem:[%s11364_s25 + $0x3c] sm:$0x33 pattern:$0x75316420] }
  0x7a   : > { %v1527_v44 = vcombine.low %v1203_v61, %v1211_v39  ;;  %v1548_v58 = vrot.slane %v1526_v14, %v11366_v15  ;;  %v5623_v41 = vrot.slane %v10448_v40, %v11366_v15  ;;  %v10461_v57 = vcombine.high %v5575_v24, %v11757_v42 }
  0x7b   : > { %v11846_v50 = vrot.slane %v5616_v52, %v11366_v15  ;;  %v5949_v46 = vcombine.low %v11520_v47, %v11523_v48  ;;  %v10462_v36 = vcombine.high %v11520_v47, %v11523_v48  ;;  %v1556_v26 = vcombine.low %v1534_v31, %v1541_v13 }
  0x7c   : > { %v1555_v43 = vrot.slane %v1527_v44, %v11366_v15  ;;  %v5631_v27 = vcombine.high %v5623_v41, %v5623_v41  ;;  %v557_v51 = vcombine.high %v10159_v28, %v10159_v28  ;;  %v5958_v61 = vrot.slane %v10461_v57, %v11366_v15 }
  0x7d   : > { %v5965_v40 = vrot.slane %v5949_v46, %v11366_v15  ;;  %v5972_v16 = vrot.slane %v10462_v36, %v11366_v15  ;;  %v11859_v42 = vrot.slane %v10159_v28, %v11366_v15  ;;  %v1564_v39 = vrot.slane %v1556_v26, %v11366_v15 }
  0x7e   : > { %v1557_v14 = vcombine.low %v1548_v58, %v1555_v43  ;;  %v5951_v47 = vcombine.low %v11846_v50, %v5631_v27  ;;  %v11864_v48 = vrot.slane %v557_v51, %v11366_v15  ;;  %v781_v24 = vcombine.high %v11790_v35, %v11790_v35 }
  0x7f   : > { %v5980_v13 = vcombine.low %v5958_v61, %v5965_v40  ;;  %v11868_v31 = vcombine.high %v11859_v42, %v11859_v42  ;;  %v789_v52 = vcombine.high %v10168_v60, %v10168_v60  ;;  %v11879_v41 = vrot.slane %v10168_v60, %v11366_v15 }
  0x80   : > { %13510 = vst [vmem:[#allocation8_spill] sm:$0xff] %v11864_v48  ;;  %v1571_v28 = vrot.slane %v1557_v14, %v11366_v15  ;;  %v5979_v44 = vrot.slane %v5951_v47, %v11366_v15  ;;  %v11876_v58 = vcombine.high %v11864_v48, %v11864_v48  ;;  %v1217_v36 = vshll.u32 %v781_v24, 16 }
  0x81   : > { %13511 = vst [vmem:[#allocation9_spill] sm:$0xff] %v11868_v31  ;;  %v5988_v57 = vrot.slane %v5980_v13, %v11366_v15  ;;  %v11883_v46 = vrot.slane %v789_v52, %v11366_v15  ;;  %v1221_v43 = vshrl.u32 %v11859_v42, 16  ;;  %v11888_v51 = vcombine.high %v11879_v41, %v11879_v41 }
  0x82   : > { %13512 = vst [vmem:[#allocation10_spill] sm:$0xff] %v11876_v58  ;;  %v1572_v26 = vcombine.low %v1564_v39, %v1571_v28  ;;  %v5981_v27 = vcombine.low %v5972_v16, %v5979_v44  ;;  %v1226_v61 = vshll.u32 %v11864_v48, 16  ;;  %v1219_v40 = vsel %vm11405_vm15, %v1212_v23, %v1217_v36 }
  0x83   : > { %v11893_v60 = vcombine.high %v11883_v46, %v11883_v46  ;;  %v1229_v14 = vshrl.u32 %v11864_v48, 16  ;;  %v1234_v47 = vshll.u32 %v11868_v31, 16  ;;  %v1237_v13 = vshrl.u32 %v11868_v31, 16 }
  0x84   : > { %10233 = vmatmul.mubr.msk.bf16.gmra.mrb[20].mxu1 %vm1631_vm1, %v1572_v26  ;;  %v5995_v16 = vrot.slane %v5981_v27, %v11366_v15  ;;  %v1228_v39 = vsel %vm11405_vm15, %v1221_v43, %v1226_v61  ;;  %v1242_v24 = vshll.u32 %v11876_v58, 16  ;;  %v1245_v52 = vshrl.u32 %v11876_v58, 16  ;;  %v10450_v61 = vld.sshfl [vmem:[%s11364_s25 + $0x20] sm:$0x32 pattern:$0x75316420] }
  0x85   : > { %1752 = vmatprep.mubr.bf16.mxu1 %v13507_v5  ;;  %v1236_v23 = vsel %vm11405_vm15, %v1229_v14, %v1234_v47  ;;  %v1250_v28 = vshll.u32 %v11879_v41, 16  ;;  %v1253_v44 = vshrl.u32 %v11879_v41, 16  ;;  %v1258_v43 = vshll.u32 %v11883_v46, 16 }
  0x86   : > { %v5996_v36 = vcombine.low %v5988_v57, %v5995_v16  ;;  %v1244_v26 = vsel %vm11405_vm15, %v1237_v13, %v1242_v24  ;;  %v1261_v27 = vshrl.u32 %v11883_v46, 16  ;;  %v1266_v14 = vshll.u32 %v11888_v51, 16  ;;  %v10146_v48 = vld.sshfl [vmem:[%s11364_s25 + $0x4] sm:$0x13 pattern:$0x75316420] }
  0x87   : > { %v1252_v11 = vsel %vm11405_vm15, %v1245_v52, %v1250_v28  ;;  %v1269_v47 = vshrl.u32 %v11888_v51, 16  ;;  %v1274_v4 = vshll.u32 %v11893_v60, 16  ;;  %v1260_v57 = vsel %vm11405_vm15, %v1253_v44, %v1258_v43 }
  0x88   : > { %10472 = vmatmul.mubr.msk.bf16.gmra.mrb[4].mxu0 %vm1631_vm1, %v5996_v36  ;;  %v1573_v16 = vcombine.low %v1219_v40, %v1228_v39  ;;  %v1574_v13 = vcombine.low %v1236_v23, %v1244_v26  ;;  %v5632_v24 = vcombine.high %v11846_v50, %v11846_v50  ;;  %v1268_v52 = vsel %vm11405_vm15, %v1261_v27, %v1266_v14 }
  0x89   : > { %6330 = vmatprep.mubr.bf16.mxu0 %v13507_v5  ;;  %v1276_v28 = vsel %vm11405_vm15, %v1269_v47, %v1274_v4  ;;  %v1575_v2 = vcombine.low %v1252_v11, %v1260_v57  ;;  %v5664_v58 = vcombine.high %v10450_v61, %v10450_v61  ;;  %v5671_v39 = vrot.slane %v10450_v61, %v11366_v15 }
  0x8a   : > { %v1576_v36 = vcombine.low %v1268_v52, %v1276_v28  ;;  %v1583_v31 = vrot.slane %v1573_v16, %v11366_v15  ;;  %v1590_v40 = vrot.slane %v1574_v13, %v11366_v15  ;;  %v5997_v44 = vcombine.low %v5632_v24, %v11591_v22 }
  0x8b   : > { %v1597_v50 = vrot.slane %v1575_v2, %v11366_v15  ;;  %v5678_v23 = vrot.slane %v5664_v58, %v11366_v15  ;;  %v5998_v4 = vcombine.low %v11594_v0, %v11603_v10  ;;  %v252_v43 = vcombine.high %v10146_v48, %v10146_v48  ;;  %v10452_v0 = vld.sshfl [vmem:[%s11364_s25 + $0x28] sm:$0x32 pattern:$0x75316420] }
  0x8c   : > { %v1604_v11 = vrot.slane %v1576_v36, %v11366_v15  ;;  %v1605_v26 = vcombine.low %v1583_v31, %v1590_v40  ;;  %v259_v27 = vrot.slane %v10146_v48, %v11366_v15  ;;  %v6007_v61 = vrot.slane %v5997_v44, %v11366_v15 }
  0x8d   : > { %v5999_v14 = vcombine.low %v11607_v17, %v5678_v23  ;;  %v10463_v47 = vcombine.high %v5671_v39, %v5678_v23  ;;  %v6014_v2 = vrot.slane %v5998_v4, %v11366_v15  ;;  %v266_v22 = vrot.slane %v252_v43, %v11366_v15  ;;  %v10273_v23 = vld.sshfl [vmem:[%s13488_s1 + $0x8] sm:$0x33 pattern:$0x76325410] }
  0x8e   : > { %v1606_v57 = vcombine.low %v1597_v50, %v1604_v11  ;;  %v1613_v58 = vrot.slane %v1605_v26, %v11366_v15  ;;  %v267_v16 = vcombine.high %v259_v27, %v259_v27  ;;  %v1763_v17 = vcombine.low %v11376_v21, %v11396_v29 }
  0x8f   : > { %v6021_v10 = vrot.slane %v5999_v14, %v11366_v15  ;;  %v6028_v31 = vrot.slane %v10463_v47, %v11366_v15  ;;  %v6029_v13 = vcombine.low %v6007_v61, %v6014_v2  ;;  %v10235_v24 = vcombine.high %v11376_v21, %v11396_v29 }
  0x90   : > { %v1620_v48 = vrot.slane %v1606_v57, %v11366_v15  ;;  %v1765_v52 = vcombine.low %v259_v27, %v266_v22  ;;  %v1766_v28 = vcombine.low %v267_v16, %v11386_v25  ;;  %v1773_v39 = vrot.slane %v1763_v17, %v11366_v15  ;;  %v10148_v27 = vld.sshfl [vmem:[%s11364_s25 + $0xc] sm:$0x13 pattern:$0x75316420] }
  0x91   : > { %v6030_v36 = vcombine.low %v6021_v10, %v6028_v31  ;;  %v6037_v40 = vrot.slane %v6029_v13, %v11366_v15  ;;  %v5712_v50 = vcombine.high %v10452_v0, %v10452_v0  ;;  %v1780_v4 = vrot.slane %v10235_v24, %v11366_v15 }
  0x92   : > { %v1621_v44 = vcombine.low %v1613_v58, %v1620_v48  ;;  %v1787_v11 = vrot.slane %v1765_v52, %v11366_v15  ;;  %v1794_v21 = vrot.slane %v1766_v28, %v11366_v15  ;;  %v5719_v25 = vrot.slane %v10452_v0, %v11366_v15 }
  0x93   : > { %v6044_v29 = vrot.slane %v6030_v36, %v11366_v15  ;;  %v5726_v26 = vrot.slane %v5712_v50, %v11366_v15  ;;  %v6046_v43 = vcombine.low %v11645_v1, %v11667_v45  ;;  %v1795_v14 = vcombine.low %v1773_v39, %v1780_v4 }
  0x94   : > { %10234 = vmatmul.mubr.msk.bf16.gmra.mrb[24].mxu1 %vm1631_vm1, %v1621_v44  ;;  %v1796_v47 = vcombine.low %v1787_v11, %v1794_v21  ;;  %v10464_v61 = vcombine.high %v11645_v1, %v11667_v45  ;;  %v3014_v2 = vcombine.high %v10273_v23, %v10273_v23  ;;  %v5727_v58 = vcombine.high %v5719_v25, %v5719_v25  ;;  %v10454_v44 = vld.sshfl [vmem:[%s11364_s25 + $0x30] sm:$0x32 pattern:$0x75316420] }
  0x95   : > { %v6045_v57 = vcombine.low %v6037_v40, %v6044_v29  ;;  %2174 = vmatprep.mubr.bf16.mxu1 %v13507_v5  ;;  %v5728_v22 = vcombine.high %v5726_v26, %v5726_v26  ;;  %v6056_v16 = vrot.slane %v6046_v43, %v11366_v15  ;;  %v1803_v0 = vrot.slane %v1795_v14, %v11366_v15 }
  0x96   : > { %v1810_v10 = vrot.slane %v1796_v47, %v11366_v15  ;;  %v6063_v31 = vrot.slane %v10464_v61, %v11366_v15  ;;  %10274 = vmatprep.subr.msk.bf16.mxu1 %vm1653_vm0, %v3014_v2  ;;  %v299_v13 = vcombine.high %v10148_v27, %v10148_v27  ;;  %v6048_v1 = vcombine.low %v5726_v26, %v5727_v58  ;;  %v10150_v26 = vld.sshfl [vmem:[%s11364_s25 + $0x14] sm:$0x13 pattern:$0x75316420] }
  0x97   : > { %10473 = vmatmul.mubr.msk.bf16.gmra.mrb[8].mxu0 %vm1631_vm1, %v6045_v57  ;;  %v6049_v45 = vcombine.low %v5728_v22, %v11684_v9  ;;  %v306_v17 = vrot.slane %v10148_v27, %v11366_v15  ;;  %v1812_v48 = vcombine.low %v11402_v33, %v11413_v37  ;;  %v1815_v36 = vcombine.low %v11453_v19, %v11466_v32 }
  0x98   : > { %6340 = vmatprep.mubr.bf16.mxu0 %v13507_v5  ;;  %v1811_v24 = vcombine.low %v1803_v0, %v1810_v10  ;;  %v6078_v52 = vcombine.low %v6056_v16, %v6063_v31  ;;  %v313_v28 = vrot.slane %v299_v13, %v11366_v15  ;;  %v6070_v40 = vrot.slane %v6048_v1, %v11366_v15  ;;  %v10456_v16 = vld.sshfl [vmem:[%s11364_s25 + $0x38] sm:$0x32 pattern:$0x75316420] }
  0x99   : > { %v6077_v39 = vrot.slane %v6049_v45, %v11366_v15  ;;  %v314_v9 = vcombine.high %v306_v17, %v306_v17  ;;  %v1813_v50 = vcombine.low %v11437_v3, %v306_v17  ;;  %v1822_v37 = vrot.slane %v1812_v48, %v11366_v15 }
  0x9a   : > { %v6086_v33 = vrot.slane %v6078_v52, %v11366_v15  ;;  %v1843_v4 = vrot.slane %v1815_v36, %v11366_v15  ;;  %v3037_v11 = vsel %vm1653_vm0, %v10273_v23, 0  ;;  %v5760_v43 = vcombine.high %v10454_v44, %v10454_v44  ;;  %v12007_v23 = vld.sshfl [vmem:[%s13488_s1 + $0x1c] sm:$0x33 pattern:$0x76325410] }
  0x9b   : > { %v6079_v21 = vcombine.low %v6070_v40, %v6077_v39  ;;  %v1814_v29 = vcombine.low %v313_v28, %v314_v9  ;;  %v1829_v25 = vrot.slane %v1813_v50, %v11366_v15  ;;  %v5767_v3 = vrot.slane %v10454_v44, %v11366_v15 }
  0x9c   : > { %10241 = vmatmul.mubr.msk.bf16.vlgmr.msra.gmra.mrb[0].mxu1 %vm1631_vm1, %v1811_v24  ;;  %v6095_v27 = vcombine.low %v11688_v54, %v11696_v20  ;;  %v6098_v14 = vcombine.low %v11786_v56, %v11790_v35  ;;  %v12014_v57 = vsel %vm1653_vm0, %v12007_v23, 0  ;;  %v5774_v54 = vrot.slane %v5760_v43, %v11366_v15 }
  0x9d   : > { %v6093_v47 = vrot.slane %v6079_v21, %v11366_v15  ;;  %2184 = vmatprep.mubr.bf16.mxu1 %v13507_v5  ;;  %v1836_v61 = vrot.slane %v1814_v29, %v11366_v15  ;;  %v1844_v2 = vcombine.low %v1822_v37, %v1829_v25  ;;  %3043 = vmatpush1.bf16.msra.mxu1 %v3037_v11  ;;  %v10152_v29 = vld.sshfl [vmem:[%s11364_s25 + $0x1c] sm:$0x13 pattern:$0x75316420] }
  0x9e   : > { %v6105_v20 = vrot.slane %v6095_v27, %v11366_v15  ;;  %v6126_v58 = vrot.slane %v6098_v14, %v11366_v15  ;;  %v346_v22 = vcombine.high %v10150_v26, %v10150_v26  ;;  %v353_v13 = vrot.slane %v10150_v26, %v11366_v15 }
  0x9f   : > { %v6094_v0 = vcombine.low %v6086_v33, %v6093_v47  ;;  %v1845_v10 = vcombine.low %v1836_v61, %v1843_v4  ;;  %v1852_v31 = vrot.slane %v1844_v2, %v11366_v15  ;;  %v6096_v1 = vcombine.low %v11778_v63, %v5774_v54 }
  0xa0   : > { %v10465_v45 = vcombine.high %v5767_v3, %v5774_v54  ;;  %v360_v17 = vrot.slane %v346_v22, %v11366_v15  ;;  %v10236_v48 = vcombine.high %v11453_v19, %v11466_v32  ;;  %v12028_v52 = vcombine.high %v353_v13, %v353_v13 }
  0xa1   : > { %10474 = vmatmul.mubr.msk.bf16.gmra.mrb[12].mxu0 %vm1631_vm1, %v6094_v0  ;;  %v1859_v24 = vrot.slane %v1845_v10, %v11366_v15  ;;  %v1864_v28 = vcombine.low %v11531_v53, %v11538_v55  ;;  %v5808_v36 = vcombine.high %v10456_v16, %v10456_v16  ;;  %v6112_v63 = vrot.slane %v6096_v1, %v11366_v15 }
  0xa2   : > { %6350 = vmatprep.mubr.bf16.mxu0 %v13507_v5  ;;  %v6119_v40 = vrot.slane %v10465_v45, %v11366_v15  ;;  %v1862_v39 = vcombine.low %v353_v13, %v360_v17  ;;  %v1871_v19 = vrot.slane %v10236_v48, %v11366_v15  ;;  %v1863_v9 = vcombine.low %v12028_v52, %v11526_v49  ;;  %v10459_v17 = vld.sshfl [vmem:[%s11364_s25 + $0x44] sm:$0x33 pattern:$0x75316420] }
  0xa3   : > { %v1860_v32 = vcombine.low %v1852_v31, %v1859_v24  ;;  %v1892_v50 = vrot.slane %v1864_v28, %v11366_v15  ;;  %v5815_v44 = vrot.slane %v10456_v16, %v11366_v15  ;;  %v6127_v53 = vcombine.low %v6105_v20, %v6112_v63 }
  0xa4   : > { %v6128_v55 = vcombine.low %v6119_v40, %v6126_v58  ;;  %v12041_v33 = vrot.slane %v1862_v39, %v11366_v15  ;;  %v5822_v37 = vrot.slane %v5808_v36, %v11366_v15  ;;  %v1885_v4 = vrot.slane %v1863_v9, %v11366_v15  ;;  %v10154_v39 = vld.sshfl [vmem:[%s11364_s25 + $0x24] sm:$0x13 pattern:$0x75316420] }
  0xa5   : > { %10242 = vmatmul.mubr.msk.bf16.gmra.mrb[4].mxu1 %vm1631_vm1, %v1860_v32  ;;  %v5823_v11 = vcombine.high %v5815_v44, %v5815_v44  ;;  %v10466_v49 = vcombine.high %v11786_v56, %v11790_v35  ;;  %v6147_v21 = vcombine.low %v11883_v46, %v11888_v51  ;;  %v6135_v25 = vrot.slane %v6127_v53, %v11366_v15  ;;  %v10458_v56 = vld.sshfl [vmem:[%s11364_s25 + $0x40] sm:$0x32 pattern:$0x75316420] }
  0xa6   : > { %v6142_v26 = vrot.slane %v6128_v55, %v11366_v15  ;;  %2194 = vmatprep.mubr.bf16.mxu1 %v13507_v5  ;;  %v1893_v43 = vcombine.low %v1871_v19, %v12041_v33  ;;  %v5824_v3 = vcombine.high %v5822_v37, %v5822_v37  ;;  %v1894_v27 = vcombine.low %v1885_v4, %v1892_v50 }
  0xa7   : > { %v6145_v14 = vcombine.low %v5822_v37, %v5823_v11  ;;  %v6154_v47 = vrot.slane %v10466_v49, %v11366_v15  ;;  %v6175_v61 = vrot.slane %v6147_v21, %v11366_v15  ;;  %v393_v2 = vcombine.high %v10152_v29, %v10152_v29  ;;  %v10156_v37 = vld.sshfl [vmem:[%s11364_s25 + $0x2c] sm:$0x13 pattern:$0x75316420] }
  0xa8   : > { %v6143_v35 = vcombine.low %v6135_v25, %v6142_v26  ;;  %v1901_v46 = vrot.slane %v1893_v43, %v11366_v15  ;;  %v6146_v51 = vcombine.low %v5824_v3, %v11879_v41  ;;  %v1908_v54 = vrot.slane %v1894_v27, %v11366_v15 }
  0xa9   : > { %v6161_v20 = vrot.slane %v6145_v14, %v11366_v15  ;;  %v12063_v58 = vrot.slane %v10152_v29, %v11366_v15  ;;  %v1912_v22 = vcombine.low %v11598_v8, %v11611_v12  ;;  %v407_v0 = vrot.slane %v393_v2, %v11366_v15 }
  0xaa   : > { %10475 = vmatmul.mubr.msk.bf16.gmra.mrb[16].mxu0 %vm1631_vm1, %v6143_v35  ;;  %v6168_v16 = vrot.slane %v6146_v51, %v11366_v15  ;;  %v10237_v41 = vcombine.high %v11598_v8, %v11611_v12  ;;  %v5856_v10 = vcombine.high %v10458_v56, %v10458_v56  ;;  %v1909_v31 = vcombine.low %v1901_v46, %v1908_v54  ;;  %v10496_v35 = vld.sshfl [vmem:[%s11364_s25 + $0x10] sm:$0x33 pattern:$0x75316420] }
  0xab   : > { %6360 = vmatprep.mubr.bf16.mxu0 %v13507_v5  ;;  %v6176_v13 = vcombine.low %v6154_v47, %v6161_v20  ;;  %v408_v1 = vcombine.high %v12063_v58, %v12063_v58  ;;  %v1910_v45 = vcombine.low %v11572_v38, %v12063_v58  ;;  %v1934_v24 = vrot.slane %v1912_v22, %v11366_v15  ;;  %v10498_v20 = vld.sshfl [vmem:[%s11364_s25 + $0x18] sm:$0x33 pattern:$0x75316420] }
  0xac   : > { %v6177_v48 = vcombine.low %v6168_v16, %v6175_v61  ;;  %v1941_v28 = vrot.slane %v10237_v41, %v11366_v15  ;;  %v5863_v8 = vrot.slane %v10458_v56, %v11366_v15  ;;  %v5870_v40 = vrot.slane %v5856_v10, %v11366_v15 }
  0xad   : > { %10243 = vmatmul.mubr.msk.bf16.gmra.mrb[8].mxu1 %vm1631_vm1, %v1909_v31  ;;  %v6184_v12 = vrot.slane %v6176_v13, %v11366_v15  ;;  %v1911_v36 = vcombine.low %v407_v0, %v408_v1  ;;  %v1920_v63 = vrot.slane %v1910_v45, %v11366_v15  ;;  %v5880_v32 = vcombine.high %v10459_v17, %v10459_v17  ;;  %v10158_v13 = vld.sshfl [vmem:[%s11364_s25 + $0x34] sm:$0x13 pattern:$0x75316420] }
  0xae   : > { %v6191_v38 = vrot.slane %v6177_v48, %v11366_v15  ;;  %2204 = vmatprep.mubr.bf16.mxu1 %v13507_v5  ;;  %v1943_v19 = vcombine.low %v1934_v24, %v1941_v28  ;;  %v5887_v9 = vrot.slane %v10459_v17, %v11366_v15  ;;  %v6193_v44 = vcombine.low %v11893_v60, %v5870_v40 }
  0xaf   : > { %v12090_v50 = vrot.slane %v1911_v36, %v11366_v15  ;;  %v10467_v53 = vcombine.high %v5863_v8, %v5870_v40  ;;  %v8558_v55 = vcombine.high %v12007_v23, %v12007_v23  ;;  %v5894_v49 = vrot.slane %v5880_v32, %v11366_v15 }
  0xb0   : > { %v6192_v4 = vcombine.low %v6184_v12, %v6191_v38  ;;  %v1957_v11 = vrot.slane %v1943_v19, %v11366_v15  ;;  %v440_v21 = vcombine.high %v10154_v39, %v10154_v39  ;;  %v6203_v25 = vrot.slane %v6193_v44, %v11366_v15 }
  0xb1   : > { %v1942_v29 = vcombine.low %v1920_v63, %v12090_v50  ;;  %v6210_v26 = vrot.slane %v10467_v53, %v11366_v15  ;;  %10616 = vmatprep.subr.msk.bf16.mxu0 %vm1653_vm0, %v8558_v55  ;;  %v447_v60 = vrot.slane %v10154_v39, %v11366_v15  ;;  %v6195_v23 = vcombine.low %v5887_v9, %v5894_v49 }
  0xb2   : > { %10476 = vmatmul.mubr.msk.bf16.gmra.mrb[20].mxu0 %vm1631_vm1, %v6192_v4  ;;  %v10468_v43 = vcombine.high %v5887_v9, %v5894_v49  ;;  %v454_v3 = vrot.slane %v440_v21, %v11366_v15  ;;  %v12106_v27 = vrot.slane %v10156_v37, %v11366_v15  ;;  %v1961_v56 = vcombine.low %v11677_v6, %v11681_v7 }
  0xb3   : > { %6370 = vmatprep.mubr.bf16.mxu0 %v13507_v5  ;;  %v1950_v14 = vrot.slane %v1942_v29, %v11366_v15  ;;  %v6225_v47 = vcombine.low %v6203_v25, %v6210_v26  ;;  %v12110_v61 = vcombine.high %v447_v60, %v447_v60  ;;  %v6217_v46 = vrot.slane %v6195_v23, %v11366_v15  ;;  %v10500_v25 = vld.sshfl [vmem:[%s11364_s25 + $0x20] sm:$0x33 pattern:$0x75316420] }
  0xb4   : > { %v6224_v51 = vrot.slane %v10468_v43, %v11366_v15  ;;  %v1959_v2 = vcombine.low %v447_v60, %v454_v3  ;;  %v1962_v54 = vcombine.low %v11692_v18, %v12106_v27  ;;  %v1983_v41 = vrot.slane %v1961_v56, %v11366_v15  ;;  %v10160_v3 = vld.sshfl [vmem:[%s11364_s25 + $0x3c] sm:$0x13 pattern:$0x75316420] }
  0xb5   : > { %v1958_v22 = vcombine.low %v1950_v14, %v1957_v11  ;;  %v6233_v16 = vrot.slane %v6225_v47, %v11366_v15  ;;  %v1960_v0 = vcombine.low %v12110_v61, %v11670_v59  ;;  %v6452_v31 = vcombine.high %v10496_v35, %v10496_v35 }
  0xb6   : > { %v6226_v10 = vcombine.low %v6217_v46, %v6224_v51  ;;  %v12125_v6 = vrot.slane %v1959_v2, %v11366_v15  ;;  %v1990_v7 = vrot.slane %v1962_v54, %v11366_v15  ;;  %v12132_v1 = vrot.slane %v10496_v35, %v11366_v15 }
  0xb7   : > { %10244 = vmatmul.mubr.msk.bf16.gmra.mrb[12].mxu1 %vm1631_vm1, %v1958_v22  ;;  %v1976_v18 = vrot.slane %v1960_v0, %v11366_v15  ;;  %v12135_v45 = vrot.slane %v10498_v20, %v11366_v15  ;;  %v487_v59 = vcombine.high %v10156_v37, %v10156_v37  ;;  %v12140_v24 = vrot.slane %v6452_v31, %v11366_v15 }
  0xb8   : > { %v6240_v17 = vrot.slane %v6226_v10, %v11366_v15  ;;  %2214 = vmatprep.mubr.bf16.mxu1 %v13507_v5  ;;  %v1992_v48 = vcombine.low %v1983_v41, %v1990_v7  ;;  %v502_v28 = vcombine.high %v12106_v27, %v12106_v27  ;;  %v534_v63 = vcombine.high %v10158_v13, %v10158_v13 }
  0xb9   : > { %v1991_v8 = vcombine.low %v12125_v6, %v1976_v18  ;;  %v6826_v12 = vcombine.low %v12028_v52, %v12135_v45  ;;  %v501_v36 = vrot.slane %v487_v59, %v11366_v15  ;;  %v6823_v38 = vcombine.low %v12132_v1, %v12140_v24  ;;  %v10502_v18 = vld.sshfl [vmem:[%s11364_s25 + $0x28] sm:$0x33 pattern:$0x75316420] }
  0xba   : > { %v6241_v40 = vcombine.low %v6233_v16, %v6240_v17  ;;  %v2006_v39 = vrot.slane %v1992_v48, %v11366_v15  ;;  %v10513_v19 = vcombine.high %v12132_v1, %v12140_v24  ;;  %v541_v44 = vrot.slane %v10158_v13, %v11366_v15 }
  0xbb   : > { %v1999_v32 = vrot.slane %v1991_v8, %v11366_v15  ;;  %v6854_v9 = vrot.slane %v6826_v12, %v11366_v15  ;;  %v548_v52 = vrot.slane %v534_v63, %v11366_v15  ;;  %v6833_v53 = vrot.slane %v6823_v38, %v11366_v15  ;;  %v13514_v8 = vld [vmem:[#allocation8_spill] sm:$0xff] }
  0xbc   : > { %10477 = vmatmul.mubr.msk.bf16.gmra.mrb[24].mxu0 %vm1631_vm1, %v6241_v40  ;;  %v6840_v55 = vrot.slane %v10513_v19, %v11366_v15  ;;  %v2008_v37 = vcombine.low %v501_v36, %v502_v28  ;;  %v2009_v4 = vcombine.low %v11767_v30, %v11770_v62  ;;  %v10238_v21 = vcombine.high %v11767_v30, %v11770_v62  ;;  %v13513_v28 = vld [vmem:[#allocation9_spill] sm:$0xff]  ;;  %v12217_v36 = vld.sshfl [vmem:[%s13488_s1 + $0xc] sm:$0x33 pattern:$0x76325410] }
  0xbd   : > { %7234 = vmatprep.mubr.bf16.mxu0 %v13507_v5  ;;  %v2007_v11 = vcombine.low %v1999_v32, %v2006_v39  ;;  %v6856_v49 = vcombine.low %v12041_v33, %v6854_v9  ;;  %v2011_v29 = vcombine.low %v541_v44, %v548_v52  ;;  %v6499_v43 = vcombine.high %v10498_v20, %v10498_v20  ;;  %v13515_v19 = vld [vmem:[#allocation10_spill] sm:$0xff] }
  0xbe   : > { %v6855_v26 = vcombine.low %v6833_v53, %v6840_v55  ;;  %v12168_v60 = vrot.slane %v2008_v37, %v11366_v15  ;;  %v2025_v23 = vrot.slane %v2009_v4, %v11366_v15  ;;  %v2032_v47 = vrot.slane %v10238_v21, %v11366_v15 }
  0xbf   : > { %10245 = vmatmul.mubr.msk.bf16.gmra.mrb[16].mxu1 %vm1631_vm1, %v2007_v11  ;;  %v6870_v14 = vrot.slane %v6856_v49, %v11366_v15  ;;  %v12176_v33 = vrot.slane %v2011_v29, %v11366_v15  ;;  %v12180_v30 = vcombine.high %v12135_v45, %v12135_v45  ;;  %v12186_v35 = vrot.slane %v6499_v43, %v11366_v15  ;;  %v10248_v49 = vld.sshfl [vmem:[%s11364_s25] sm:$0x32 pattern:$0x75316420] }
  0xc0   : > { %v6863_v62 = vrot.slane %v6855_v26, %v11366_v15  ;;  %2224 = vmatprep.mubr.bf16.mxu1 %v13507_v5  ;;  %v2040_v56 = vcombine.low %v12168_v60, %v2025_v23  ;;  %v6546_v46 = vcombine.high %v10500_v25, %v10500_v25  ;;  %v12190_v2 = vrot.slane %v10500_v25, %v11366_v15 }
  0xc1   : > { %v2041_v51 = vcombine.low %v2032_v47, %v12176_v33  ;;  %v549_v54 = vcombine.high %v541_v44, %v541_v44  ;;  %v581_v20 = vcombine.high %v10160_v3, %v10160_v3  ;;  %v12195_v0 = vcombine.high %v12186_v35, %v12186_v35 }
  0xc2   : > { %v6871_v22 = vcombine.low %v6863_v62, %v6870_v14  ;;  %v2048_v16 = vrot.slane %v2040_v56, %v11366_v15  ;;  %v12198_v41 = vrot.slane %v6546_v46, %v11366_v15  ;;  %v6872_v7 = vcombine.low %v12186_v35, %v12180_v30  ;;  %v10249_v14 = vld.sshfl [vmem:[%s11364_s25 + $0x4] sm:$0x33 pattern:$0x75316420] }
  0xc3   : > { %v2055_v10 = vrot.slane %v2041_v51, %v11366_v15  ;;  %v588_v31 = vrot.slane %v10160_v3, %v11366_v15  ;;  %v595_v13 = vrot.slane %v581_v20, %v11366_v15  ;;  %v6873_v59 = vcombine.low %v12195_v0, %v12063_v58  ;;  %v12271_v46 = vld.sshfl [vmem:[%s11364_s25 + $0x8] sm:$0x32 pattern:$0x75316420] }
  0xc4   : > { %10519 = vmatmul.mubr.msk.bf16.vlgmr.msra.gmra.mrb[0].mxu0 %vm1631_vm1, %v6871_v22  ;;  %v6875_v17 = vcombine.low %v12190_v2, %v12198_v41  ;;  %v2057_v48 = vcombine.low %v549_v54, %v11859_v42  ;;  %v2058_v12 = vcombine.low %v13514_v8, %v13513_v28  ;;  %v6882_v58 = vrot.slane %v6872_v7, %v11366_v15 }
  0xc5   : > { %8587 = vmatpush1.bf16.msra.mxu0 %v12014_v57  ;;  %7244 = vmatprep.mubr.bf16.mxu0 %v13507_v5  ;;  %v2056_v63 = vcombine.low %v2048_v16, %v2055_v10  ;;  %v596_v40 = vcombine.high %v588_v31, %v588_v31  ;;  %v12224_v42 = vsel %vm1653_vm0, %v12217_v36, 0  ;;  %v6889_v39 = vrot.slane %v6873_v59, %v11366_v15 }
  0xc6   : > { %v6903_v38 = vrot.slane %v6875_v17, %v11366_v15  ;;  %v2059_v32 = vcombine.low %v13515_v19, %v588_v31  ;;  %v12230_v9 = vrot.slane %v2057_v48, %v11366_v15  ;;  %v12234_v44 = vrot.slane %v2058_v12, %v11366_v15 }
  0xc7   : > { %10246 = vmatmul.mubr.msk.bf16.gmra.mrb[20].mxu1 %vm1631_vm1, %v2056_v63  ;;  %v2060_v57 = vcombine.low %v595_v13, %v596_v40  ;;  %v6593_v52 = vcombine.high %v10502_v18, %v10502_v18  ;;  %v12237_v53 = vrot.slane %v10502_v18, %v11366_v15  ;;  %v6904_v55 = vcombine.low %v6882_v58, %v6889_v39 }
  0xc8   : > { %v6905_v37 = vcombine.low %v12090_v50, %v6903_v38  ;;  %2234 = vmatprep.mubr.bf16.mxu1 %v13507_v5  ;;  %v12242_v4 = vrot.slane %v2059_v32, %v11366_v15  ;;  %v10514_v11 = vcombine.high %v12190_v2, %v12198_v41  ;;  %v2089_v29 = vcombine.low %v12230_v9, %v12234_v44 }
  0xc9   : > { %v12248_v21 = vrot.slane %v2060_v57, %v11366_v15  ;;  %v12253_v25 = vrot.slane %v6593_v52, %v11366_v15  ;;  %v12257_v50 = vcombine.high %v12237_v53, %v12237_v53  ;;  %v6912_v26 = vrot.slane %v6904_v55, %v11366_v15 }
  0xca   : > { %v6919_v23 = vrot.slane %v6905_v37, %v11366_v15  ;;  %v6923_v43 = vcombine.low %v12110_v61, %v12237_v53  ;;  %v6931_v3 = vrot.slane %v10514_v11, %v11366_v15  ;;  %v2097_v62 = vrot.slane %v2089_v29, %v11366_v15 }
  0xcb   : > { %v2090_v47 = vcombine.low %v12242_v4, %v12248_v21  ;;  %v6924_v56 = vcombine.low %v12253_v25, %v12257_v50  ;;  %v2284_v51 = vcombine.high %v10248_v49, %v10248_v49  ;;  %v2291_v22 = vrot.slane %v10248_v49, %v11366_v15 }
  0xcc   : > { %v6920_v54 = vcombine.low %v6912_v26, %v6919_v23  ;;  %v6945_v20 = vrot.slane %v6923_v43, %v11366_v15  ;;  %v6953_v61 = vcombine.low %v6931_v3, %v12125_v6  ;;  %v2308_v31 = vcombine.high %v10249_v14, %v10249_v14  ;;  %v10504_v6 = vld.sshfl [vmem:[%s11364_s25 + $0x30] sm:$0x33 pattern:$0x75316420] }
  0xcd   : > { %v2104_v16 = vrot.slane %v2090_v47, %v11366_v15  ;;  %v6952_v10 = vrot.slane %v6924_v56, %v11366_v15  ;;  %v2298_v7 = vrot.slane %v2284_v51, %v11366_v15  ;;  %v2299_v18 = vcombine.high %v2291_v22, %v2291_v22  ;;  %v10251_v43 = vld.sshfl [vmem:[%s11364_s25 + $0xc] sm:$0x33 pattern:$0x75316420] }
  0xce   : > { %10520 = vmatmul.mubr.msk.bf16.gmra.mrb[4].mxu0 %vm1631_vm1, %v6920_v54  ;;  %v6961_v13 = vrot.slane %v6953_v61, %v11366_v15  ;;  %v2315_v59 = vrot.slane %v10249_v14, %v11366_v15  ;;  %v2332_v17 = vcombine.high %v12271_v46, %v12271_v46  ;;  %v2322_v12 = vrot.slane %v2308_v31, %v11366_v15 }
  0xcf   : > { %7254 = vmatprep.mubr.bf16.mxu0 %v13507_v5  ;;  %v2105_v48 = vcombine.low %v2097_v62, %v2104_v16  ;;  %v6954_v28 = vcombine.low %v6945_v20, %v6952_v10  ;;  %v2300_v8 = vcombine.high %v2298_v7, %v2298_v7  ;;  %v2663_v40 = vcombine.low %v2298_v7, %v2299_v18  ;;  %v10252_v20 = vld.sshfl [vmem:[%s11364_s25 + $0x10] sm:$0x32 pattern:$0x75316420] }
  0xd0   : > { %v2323_v63 = vcombine.high %v2315_v59, %v2315_v59  ;;  %v2346_v58 = vrot.slane %v2332_v17, %v11366_v15  ;;  %v12290_v39 = vcombine.high %v12253_v25, %v12253_v25  ;;  %v2324_v19 = vcombine.high %v2322_v12, %v2322_v12 }
  0xd1   : > { %10247 = vmatmul.mubr.msk.bf16.gmra.mrb[24].mxu1 %vm1631_vm1, %v2105_v48  ;;  %v6968_v38 = vrot.slane %v6954_v28, %v11366_v15  ;;  %v2664_v32 = vcombine.low %v2300_v8, %v2315_v59  ;;  %v6640_v57 = vcombine.high %v10504_v6, %v10504_v6  ;;  %v2673_v55 = vrot.slane %v2663_v40, %v11366_v15 }
  0xd2   : > { %3074 = vmatprep.mubr.bf16.mxu1 %v13507_v5  ;;  %v2665_v52 = vcombine.low %v2322_v12, %v2323_v63  ;;  %v12297_v37 = vrot.slane %v10504_v6, %v11366_v15  ;;  %v6970_v11 = vcombine.low %v12290_v39, %v12106_v27  ;;  %v2666_v29 = vcombine.low %v2324_v19, %v2346_v58 }
  0xd3   : > { %v6969_v49 = vcombine.low %v6961_v13, %v6968_v38  ;;  %v2680_v26 = vrot.slane %v2664_v32, %v11366_v15  ;;  %v12303_v23 = vrot.slane %v6640_v57, %v11366_v15  ;;  %v3938_v47 = vcombine.high %v12217_v36, %v12217_v36  ;;  %v10253_v38 = vld.sshfl [vmem:[%s11364_s25 + $0x14] sm:$0x33 pattern:$0x75316420] }
  0xd4   : > { %v2687_v3 = vrot.slane %v2665_v52, %v11366_v15  ;;  %v6980_v14 = vrot.slane %v6970_v11, %v11366_v15  ;;  %v2339_v62 = vrot.slane %v12271_v46, %v11366_v15  ;;  %v2694_v27 = vrot.slane %v2666_v29, %v11366_v15  ;;  %v10254_v11 = vld.sshfl [vmem:[%s11364_s25 + $0x18] sm:$0x32 pattern:$0x75316420] }
  0xd5   : > { %v2695_v56 = vcombine.low %v2673_v55, %v2680_v26  ;;  %v6972_v51 = vcombine.low %v12297_v37, %v12303_v23  ;;  %v10515_v54 = vcombine.high %v12297_v37, %v12303_v23  ;;  %10322 = vmatprep.subr.msk.bf16.mxu1 %vm1653_vm0, %v3938_v47  ;;  %v2356_v36 = vcombine.high %v10251_v43, %v10251_v43 }
  0xd6   : > { %10521 = vmatmul.mubr.msk.bf16.gmra.mrb[8].mxu0 %vm1631_vm1, %v6969_v49  ;;  %v7002_v61 = vcombine.low %v6980_v14, %v12168_v60  ;;  %v2363_v22 = vrot.slane %v10251_v43, %v11366_v15  ;;  %v7750_v46 = vshrl.u32 %v12132_v1, 16  ;;  %v2696_v16 = vcombine.low %v2687_v3, %v2694_v27  ;;  %v10508_v14 = vld.sshfl [vmem:[%s11364_s25 + $0x40] sm:$0x33 pattern:$0x75316420] }
  0xd7   : > { %7264 = vmatprep.mubr.bf16.mxu0 %v13507_v5  ;;  %v2703_v10 = vrot.slane %v2695_v56, %v11366_v15  ;;  %v6994_v7 = vrot.slane %v6972_v51, %v11366_v15  ;;  %v7001_v31 = vrot.slane %v10515_v54, %v11366_v15  ;;  %v2370_v60 = vrot.slane %v2356_v36, %v11366_v15  ;;  %v10509_v54 = vld.sshfl [vmem:[%s11364_s25 + $0x44] sm:$0x13 pattern:$0x75316420] }
  0xd8   : > { %v7010_v13 = vrot.slane %v7002_v61, %v11366_v15  ;;  %v2380_v18 = vcombine.high %v10252_v20, %v10252_v20  ;;  %v2387_v59 = vrot.slane %v10252_v20, %v11366_v15  ;;  %v2710_v17 = vrot.slane %v2696_v16, %v11366_v15 }
  0xd9   : > { %v7003_v6 = vcombine.low %v6994_v7, %v7001_v31  ;;  %v10265_v48 = vcombine.high %v2339_v62, %v2346_v58  ;;  %v7051_v28 = vcombine.low %v12176_v33, %v12230_v9  ;;  %v2713_v63 = vcombine.low %v2363_v22, %v2370_v60  ;;  %v10255_v31 = vld.sshfl [vmem:[%s11364_s25 + $0x1c] sm:$0x33 pattern:$0x75316420] }
  0xda   : > { %v2394_v8 = vrot.slane %v2380_v18, %v11366_v15  ;;  %v2395_v12 = vcombine.high %v2387_v59, %v2387_v59  ;;  %v10266_v40 = vcombine.high %v2363_v22, %v2370_v60  ;;  %v2711_v19 = vcombine.low %v2703_v10, %v2710_v17 }
  0xdb   : > { %v7017_v32 = vrot.slane %v7003_v6, %v11366_v15  ;;  %v2722_v57 = vrot.slane %v10265_v48, %v11366_v15  ;;  %v7052_v52 = vcombine.low %v12234_v44, %v12242_v4  ;;  %v2729_v58 = vrot.slane %v2713_v63, %v11366_v15 }
  0xdc   : > { %v2715_v55 = vcombine.low %v2394_v8, %v2395_v12  ;;  %v2736_v33 = vrot.slane %v10266_v40, %v11366_v15  ;;  %v7059_v9 = vrot.slane %v7051_v28, %v11366_v15  ;;  %10275 = vmatmul.mubr.msk.bf16.vlgmr.msra.gmra.mrb[0].mxu1 %vm1631_vm1, %v2711_v19  ;;  %v2396_v26 = vcombine.high %v2394_v8, %v2394_v8 }
  0xdd   : > { %v7018_v49 = vcombine.low %v7010_v13, %v7017_v32  ;;  %v7066_v29 = vrot.slane %v7052_v52, %v11366_v15  ;;  %v2404_v43 = vcombine.high %v10253_v38, %v10253_v38  ;;  %3084 = vmatprep.mubr.bf16.mxu1 %v13507_v5  ;;  %v2744_v4 = vcombine.low %v2722_v57, %v2729_v58  ;;  %v13516_v13 = vld [vmem:[#allocation3_spill] sm:$0xff] }
  0xde   : > { %v2743_v44 = vrot.slane %v2715_v55, %v11366_v15  ;;  %3967 = vmatpush1.bf16.msra.mxu1 %v12224_v42  ;;  %v12349_v3 = vrot.slane %v10253_v38, %v11366_v15  ;;  %v7755_v47 = vshll.u32 %v12140_v24, 16  ;;  %v2428_v56 = vcombine.high %v10254_v11, %v10254_v11  ;;  %v10256_v55 = vld.sshfl [vmem:[%s11364_s25 + $0x20] sm:$0x32 pattern:$0x75316420] }
  0xdf   : > { %10522 = vmatmul.mubr.msk.bf16.gmra.mrb[12].mxu0 %vm1631_vm1, %v7018_v49  ;;  %v7067_v62 = vcombine.low %v7059_v9, %v7066_v29  ;;  %v12355_v27 = vrot.slane %v2404_v43, %v11366_v15  ;;  %v2435_v51 = vrot.slane %v10254_v11, %v11366_v15  ;;  %v2752_v20 = vrot.slane %v2744_v4, %v11366_v15  ;;  %v12400_v9 = vld.sshfl [vmem:[%s11364_s25 + $0x24] sm:$0x33 pattern:$0x75316420] }
  0xe0   : > { %7274 = vmatprep.mubr.bf16.mxu0 %v13507_v5  ;;  %v2745_v42 = vcombine.low %v2736_v33, %v2743_v44  ;;  %v12363_v61 = vcombine.high %v12349_v3, %v12349_v3  ;;  %v2761_v36 = vcombine.low %v2396_v26, %v12349_v3  ;;  %v2442_v16 = vrot.slane %v2428_v56, %v11366_v15 }
  0xe1   : > { %v12368_v22 = vcombine.high %v12355_v27, %v12355_v27  ;;  %v6734_v10 = vcombine.high %v10508_v14, %v10508_v14  ;;  %v12372_v7 = vrot.slane %v10508_v14, %v11366_v15  ;;  %10720 = vmatprep.subr.msk.bf16.mxu1 %vm1653_vm0, %v13516_v13  ;;  %v6758_v17 = vcombine.high %v10509_v54, %v10509_v54 }
  0xe2   : > { %v2759_v60 = vrot.slane %v2745_v42, %v11366_v15  ;;  %v2762_v18 = vcombine.low %v12355_v27, %v12363_v61  ;;  %v2771_v59 = vrot.slane %v2761_v36, %v11366_v15  ;;  %v10267_v48 = vcombine.high %v2435_v51, %v2442_v16  ;;  %v10510_v36 = vld.sshfl [vmem:[%s11364_s25 + $0x48] sm:$0x33 pattern:$0x75316420] }
  0xe3   : > { %v2763_v6 = vcombine.low %v12368_v22, %v2442_v16  ;;  %v12383_v28 = vrot.slane %v6734_v10, %v11366_v15  ;;  %v12386_v8 = vrot.slane %v10509_v54, %v11366_v15  ;;  %v6772_v40 = vrot.slane %v6758_v17, %v11366_v15 }
  0xe4   : > { %v2760_v12 = vcombine.low %v2752_v20, %v2759_v60  ;;  %v2778_v63 = vrot.slane %v2762_v18, %v11366_v15  ;;  %v2452_v38 = vcombine.high %v10255_v31, %v10255_v31  ;;  %v2792_v32 = vrot.slane %v10267_v48, %v11366_v15  ;;  %v10511_v60 = vld.sshfl [vmem:[%s11364_s25 + $0x4c] sm:$0x13 pattern:$0x75316420] }
  0xe5   : > { %v2785_v19 = vrot.slane %v2763_v6, %v11366_v15  ;;  %v7069_v57 = vcombine.low %v12372_v7, %v12383_v28  ;;  %v10516_v52 = vcombine.high %v12372_v7, %v12383_v28  ;;  %v7071_v33 = vcombine.low %v12386_v8, %v6772_v40 }
  0xe6   : > { %10276 = vmatmul.mubr.msk.bf16.gmra.mrb[4].mxu1 %vm1631_vm1, %v2760_v12  ;;  %v2793_v58 = vcombine.low %v2771_v59, %v2778_v63  ;;  %v12403_v11 = vrot.slane %v10255_v31, %v11366_v15  ;;  %v12406_v49 = vrot.slane %v2452_v38, %v11366_v15  ;;  %v7758_v44 = vshrl.u32 %v12140_v24, 16 }
  0xe7   : > { %10523 = vmatmul.mubr.msk.bf16.gmra.mrb[16].mxu0 %vm1631_vm1, %v7067_v62  ;;  %3094 = vmatprep.mubr.bf16.mxu1 %v13507_v5  ;;  %v2794_v29 = vcombine.low %v2785_v19, %v2792_v32  ;;  %v7085_v26 = vrot.slane %v7069_v57, %v11366_v15  ;;  %v7092_v43 = vrot.slane %v10516_v52, %v11366_v15  ;;  %v12441_v57 = vld.sshfl [vmem:[%s13488_s1 + $0x20] sm:$0x33 pattern:$0x76325410] }
  0xe8   : > { %7284 = vmatprep.mubr.bf16.mxu0 %v13507_v5  ;;  %v2801_v4 = vrot.slane %v2793_v58, %v11366_v15  ;;  %v7099_v14 = vrot.slane %v7071_v33, %v11366_v15  ;;  %v2476_v56 = vcombine.high %v10256_v55, %v10256_v55  ;;  %v2483_v51 = vrot.slane %v10256_v55, %v11366_v15 }
  0xe9   : > { %v2808_v62 = vrot.slane %v2794_v29, %v11366_v15  ;;  %v7100_v54 = vcombine.low %v12248_v21, %v7085_v26  ;;  %v12421_v42 = vrot.slane %v12400_v9, %v11366_v15  ;;  %v2810_v20 = vcombine.low %v12403_v11, %v12406_v49 }
  0xea   : > { %v7101_v16 = vcombine.low %v7092_v43, %v7099_v14  ;;  %v2490_v10 = vrot.slane %v2476_v56, %v11366_v15  ;;  %v2491_v31 = vcombine.high %v2483_v51, %v2483_v51  ;;  %v10268_v13 = vcombine.high %v12403_v11, %v12406_v49 }
  0xeb   : > { %v2809_v18 = vcombine.low %v2801_v4, %v2808_v62  ;;  %v7108_v59 = vrot.slane %v7100_v54, %v11366_v15  ;;  %v2820_v21 = vrot.slane %v2810_v20, %v11366_v15  ;;  %v6773_v17 = vcombine.high %v12386_v8, %v12386_v8  ;;  %v10258_v4 = vld.sshfl [vmem:[%s11364_s25 + $0x28] sm:$0x32 pattern:$0x75316420] }
  0xec   : > { %v7115_v6 = vrot.slane %v7101_v16, %v11366_v15  ;;  %v2492_v48 = vcombine.high %v2490_v10, %v2490_v10  ;;  %v2812_v12 = vcombine.low %v2490_v10, %v2491_v31  ;;  %v2827_v63 = vrot.slane %v10268_v13, %v11366_v15  ;;  %v10259_v16 = vld.sshfl [vmem:[%s11364_s25 + $0x2c] sm:$0x33 pattern:$0x75316420] }
  0xed   : > { %v6781_v40 = vcombine.high %v10510_v36, %v10510_v36  ;;  %v6788_v38 = vrot.slane %v10510_v36, %v11366_v15  ;;  %v6805_v19 = vcombine.high %v10511_v60, %v10511_v60  ;;  %v6812_v32 = vrot.slane %v10511_v60, %v11366_v15 }
  0xee   : > { %10277 = vmatmul.mubr.msk.bf16.gmra.mrb[8].mxu1 %vm1631_vm1, %v2809_v18  ;;  %v7116_v8 = vcombine.low %v7108_v59, %v7115_v6  ;;  %v2813_v52 = vcombine.low %v2492_v48, %v12421_v42  ;;  %v2834_v55 = vrot.slane %v2812_v12, %v11366_v15  ;;  %v2842_v58 = vcombine.low %v2820_v21, %v2827_v63 }
  0xef   : > { %3104 = vmatprep.mubr.bf16.mxu1 %v13507_v5  ;;  %v6795_v33 = vrot.slane %v6781_v40, %v11366_v15  ;;  %v6796_v29 = vcombine.high %v6788_v38, %v6788_v38  ;;  %v6819_v26 = vrot.slane %v6805_v19, %v11366_v15  ;;  %v6820_v43 = vcombine.high %v6812_v32, %v6812_v32 }
  0xf0   : > { %10524 = vmatmul.mubr.msk.bf16.gmra.mrb[20].mxu0 %vm1631_vm1, %v7116_v8  ;;  %v2841_v14 = vrot.slane %v2813_v52, %v11366_v15  ;;  %v2850_v56 = vrot.slane %v2842_v58, %v11366_v15  ;;  %v7117_v51 = vcombine.low %v6773_v17, %v6788_v38  ;;  %v9486_v62 = vcombine.high %v12441_v57, %v12441_v57 }
  0xf1   : > { %7294 = vmatprep.mubr.bf16.mxu0 %v13507_v5  ;;  %v6797_v54 = vcombine.high %v6795_v33, %v6795_v33  ;;  %v7118_v20 = vcombine.low %v6795_v33, %v6796_v29  ;;  %v7120_v36 = vcombine.low %v6819_v26, %v6820_v43  ;;  %v2500_v10 = vcombine.high %v12400_v9, %v12400_v9 }
  0xf2   : > { %v2843_v31 = vcombine.low %v2834_v55, %v2841_v14  ;;  %v7127_v13 = vrot.slane %v7117_v51, %v11366_v15  ;;  %10666 = vmatprep.subr.msk.bf16.mxu0 %vm1653_vm0, %v9486_v62  ;;  %v12463_v60 = vcombine.high %v12421_v42, %v12421_v42  ;;  %v2524_v18 = vcombine.high %v10258_v4, %v10258_v4 }
  0xf3   : > { %v7119_v59 = vcombine.low %v6797_v54, %v6812_v32  ;;  %v7134_v21 = vrot.slane %v7118_v20, %v11366_v15  ;;  %v7148_v17 = vrot.slane %v7120_v36, %v11366_v15  ;;  %v12468_v6 = vrot.slane %v2500_v10, %v11366_v15 }
  0xf4   : > { %v2857_v9 = vrot.slane %v2843_v31, %v11366_v15  ;;  %v2531_v48 = vrot.slane %v10258_v4, %v11366_v15  ;;  %v2538_v12 = vrot.slane %v2524_v18, %v11366_v15  ;;  %v2548_v63 = vcombine.high %v10259_v16, %v10259_v16 }
  0xf5   : > { %v7141_v40 = vrot.slane %v7119_v59, %v11366_v15  ;;  %v7149_v38 = vcombine.low %v7127_v13, %v7134_v21  ;;  %v12476_v19 = vcombine.high %v12468_v6, %v12468_v6  ;;  %v12479_v32 = vrot.slane %v10259_v16, %v11366_v15 }
  0xf6   : > { %v2858_v8 = vcombine.low %v2850_v56, %v2857_v9  ;;  %v12482_v52 = vrot.slane %v2548_v63, %v11366_v15  ;;  %v2859_v55 = vcombine.low %v12468_v6, %v12463_v60  ;;  %v10269_v58 = vcombine.high %v2531_v48, %v2538_v12 }
  0xf7   : > { %v7150_v33 = vcombine.low %v7141_v40, %v7148_v17  ;;  %v7157_v29 = vrot.slane %v7149_v38, %v11366_v15  ;;  %v2860_v26 = vcombine.low %v12476_v19, %v2538_v12  ;;  %v7387_v43 = vcombine.high %v12132_v1, %v12132_v1 }
  0xf8   : > { %10278 = vmatmul.mubr.msk.bf16.gmra.mrb[12].mxu1 %vm1631_vm1, %v2858_v8  ;;  %v2862_v4 = vcombine.low %v12479_v32, %v12482_v52  ;;  %v2869_v14 = vrot.slane %v2859_v55, %v11366_v15  ;;  %v2883_v56 = vrot.slane %v10269_v58, %v11366_v15  ;;  %v7388_v51 = vcombine.high %v12140_v24, %v12140_v24  ;;  %v10260_v8 = vld.sshfl [vmem:[%s11364_s25 + $0x30] sm:$0x32 pattern:$0x75316420] }
  0xf9   : > { %v7164_v62 = vrot.slane %v7150_v33, %v11366_v15  ;;  %3114 = vmatprep.mubr.bf16.mxu1 %v13507_v5  ;;  %v2876_v54 = vrot.slane %v2860_v26, %v11366_v15  ;;  %v7757_v20 = vsel %vm11405_vm15, %v7750_v46, %v7755_v47  ;;  %v7763_v36 = vshll.u32 %v7387_v43, 16 }
  0xfa   : > { %v2890_v16 = vrot.slane %v2862_v4, %v11366_v15  ;;  %v7766_v10 = vshrl.u32 %v7387_v43, 16  ;;  %v7771_v31 = vshll.u32 %v7388_v51, 16  ;;  %v7774_v13 = vshrl.u32 %v7388_v51, 16 }
  0xfb   : > { %v7165_v18 = vcombine.low %v7157_v29, %v7164_v62  ;;  %v2891_v59 = vcombine.low %v2869_v14, %v2876_v54  ;;  %v7765_v21 = vsel %vm11405_vm15, %v7758_v44, %v7763_v36  ;;  %v7779_v17 = vshll.u32 %v12349_v3, 16  ;;  %v10261_v14 = vld.sshfl [vmem:[%s11364_s25 + $0x34] sm:$0x33 pattern:$0x75316420] }
  0xfc   : > { %v2892_v1 = vcombine.low %v2883_v56, %v2890_v16  ;;  %v7773_v46 = vsel %vm11405_vm15, %v7766_v10, %v7771_v31  ;;  %v7782_v47 = vshrl.u32 %v12349_v3, 16  ;;  %v7787_v9 = vshll.u32 %v12355_v27, 16 }
  0xfd   : > { %10525 = vmatmul.mubr.msk.bf16.gmra.mrb[24].mxu0 %vm1631_vm1, %v7165_v18  ;;  %v2899_v48 = vrot.slane %v2891_v59, %v11366_v15  ;;  %v7781_v24 = vsel %vm11405_vm15, %v7774_v13, %v7779_v17  ;;  %v7790_v44 = vshrl.u32 %v12355_v27, 16  ;;  %v7795_v12 = vshll.u32 %v12363_v61, 16 }
  0xfe   : > { %8618 = vmatprep.mubr.bf16.mxu0 %v13507_v5  ;;  %v2906_v63 = vrot.slane %v2892_v1, %v11366_v15  ;;  %v7789_v3 = vsel %vm11405_vm15, %v7782_v47, %v7787_v9  ;;  %v7798_v40 = vshrl.u32 %v12363_v61, 16  ;;  %v7803_v38 = vshll.u32 %v12368_v22, 16 }
  0xff   : > { %v7797_v55 = vsel %vm11405_vm15, %v7790_v44, %v7795_v12  ;;  %v7807_v27 = vshrl.u32 %v12135_v45, 16  ;;  %v7812_v58 = vshll.u32 %v12186_v35, 16  ;;  %v8207_v33 = vcombine.low %v7757_v20, %v7765_v21 }
 0x100   : > { %v2907_v29 = vcombine.low %v2899_v48, %v2906_v63  ;;  %v7805_v26 = vsel %vm11405_vm15, %v7798_v40, %v7803_v38  ;;  %v8208_v43 = vcombine.low %v7773_v46, %v7781_v24  ;;  %v8209_v4 = vcombine.low %v7789_v3, %v7797_v55 }
 0x101   : > { %v7814_v61 = vsel %vm11405_vm15, %v7807_v27, %v7812_v58  ;;  %v8217_v22 = vrot.slane %v8207_v33, %v11366_v15  ;;  %v9509_v56 = vsel %vm1653_vm0, %v12441_v57, 0  ;;  %v2572_v51 = vcombine.high %v10260_v8, %v10260_v8 }
 0x102   : > { %10279 = vmatmul.mubr.msk.bf16.gmra.mrb[16].mxu1 %vm1631_vm1, %v2907_v29  ;;  %v8210_v45 = vcombine.low %v7805_v26, %v7814_v61  ;;  %v8224_v62 = vrot.slane %v8208_v43, %v11366_v15  ;;  %v8231_v54 = vrot.slane %v8209_v4, %v11366_v15  ;;  %v2579_v20 = vrot.slane %v10260_v8, %v11366_v15 }
 0x103   : > { %3124 = vmatprep.mubr.bf16.mxu1 %v13507_v5  ;;  %v2586_v36 = vrot.slane %v2572_v51, %v11366_v15  ;;  %v2596_v16 = vcombine.high %v10261_v14, %v10261_v14  ;;  %v12548_v10 = vrot.slane %v10261_v14, %v11366_v15  ;;  %v10270_v57 = vcombine.high %v12479_v32, %v12482_v52 }
 0x104   : > { %v8238_v31 = vrot.slane %v8210_v45, %v11366_v15  ;;  %v8239_v13 = vcombine.low %v8217_v22, %v8224_v62  ;;  %v2587_v18 = vcombine.high %v2579_v20, %v2579_v20  ;;  %v7459_v59 = vcombine.high %v12403_v11, %v12403_v11 }
 0x105   : > { %v2588_v21 = vcombine.high %v2586_v36, %v2586_v36  ;;  %v12556_v17 = vrot.slane %v2596_v16, %v11366_v15  ;;  %v12560_v1 = vcombine.high %v12548_v10, %v12548_v10  ;;  %v2918_v46 = vrot.slane %v10270_v57, %v11366_v15  ;;  %v10262_v16 = vld.sshfl [vmem:[%s11364_s25 + $0x38] sm:$0x32 pattern:$0x75316420] }
 0x106   : > { %v8240_v47 = vcombine.low %v8231_v54, %v8238_v31  ;;  %v8247_v9 = vrot.slane %v8239_v13, %v11366_v15  ;;  %v2909_v48 = vcombine.low %v2586_v36, %v2587_v18  ;;  %v7460_v24 = vcombine.high %v12406_v49, %v12406_v49 }
 0x107   : > { %v2910_v44 = vcombine.low %v2588_v21, %v12548_v10  ;;  %v2911_v12 = vcombine.low %v12556_v17, %v12560_v1  ;;  %v12571_v63 = vcombine.high %v12190_v2, %v12190_v2  ;;  %v7815_v3 = vshrl.u32 %v12186_v35, 16 }
 0x108   : > { %v8254_v40 = vrot.slane %v8240_v47, %v11366_v15  ;;  %v2925_v38 = vrot.slane %v2909_v48, %v11366_v15  ;;  %v7820_v8 = vshll.u32 %v12180_v30, 16  ;;  %v7823_v55 = vshrl.u32 %v12180_v30, 16  ;;  %v10263_v47 = vld.sshfl [vmem:[%s11364_s25 + $0x3c] sm:$0x33 pattern:$0x75316420] }
 0x109   : > { %v2932_v27 = vrot.slane %v2910_v44, %v11366_v15  ;;  %v2939_v58 = vrot.slane %v2911_v12, %v11366_v15  ;;  %v7828_v33 = vshll.u32 %v12195_v0, 16  ;;  %v7831_v29 = vshrl.u32 %v12195_v0, 16 }
 0x10a   : > { %v8255_v26 = vcombine.low %v8247_v9, %v8254_v40  ;;  %v2940_v43 = vcombine.low %v2918_v46, %v2925_v38  ;;  %v7822_v35 = vsel %vm11405_vm15, %v7815_v3, %v7820_v8  ;;  %v7836_v4 = vshll.u32 %v12403_v11, 16 }
 0x10b   : > { %v2941_v14 = vcombine.low %v2932_v27, %v2939_v58  ;;  %v7830_v30 = vsel %vm11405_vm15, %v7823_v55, %v7828_v33  ;;  %v7839_v61 = vshrl.u32 %v12403_v11, 16  ;;  %v7844_v22 = vshll.u32 %v12406_v49, 16 }
 0x10c   : > { %10617 = vmatmul.mubr.msk.bf16.vlgmr.msra.gmra.mrb[0].mxu0 %vm1631_vm1, %v8255_v26  ;;  %v2948_v0 = vrot.slane %v2940_v43, %v11366_v15  ;;  %v7838_v51 = vsel %vm11405_vm15, %v7831_v29, %v7836_v4  ;;  %v7847_v45 = vshrl.u32 %v12406_v49, 16  ;;  %v7852_v62 = vshll.u32 %v7459_v59, 16 }
 0x10d   : > { %9515 = vmatpush1.bf16.msra.mxu0 %v9509_v56  ;;  %8628 = vmatprep.mubr.bf16.mxu0 %v13507_v5  ;;  %v2955_v54 = vrot.slane %v2941_v14, %v11366_v15  ;;  %v7846_v11 = vsel %vm11405_vm15, %v7839_v61, %v7844_v22  ;;  %v7855_v20 = vshrl.u32 %v7459_v59, 16  ;;  %v7860_v36 = vshll.u32 %v7460_v24, 16 }
 0x10e   : > { %v7854_v57 = vsel %vm11405_vm15, %v7847_v45, %v7852_v62  ;;  %v7864_v31 = vshrl.u32 %v12190_v2, 16  ;;  %v7869_v49 = vshll.u32 %v12198_v41, 16  ;;  %v7872_v13 = vshrl.u32 %v12198_v41, 16 }
 0x10f   : > { %v2956_v56 = vcombine.low %v2948_v0, %v2955_v54  ;;  %v7862_v18 = vsel %vm11405_vm15, %v7855_v20, %v7860_v36  ;;  %v7877_v21 = vshll.u32 %v12571_v63, 16  ;;  %v8256_v46 = vcombine.low %v7822_v35, %v7830_v30 }
 0x110   : > { %v7871_v59 = vsel %vm11405_vm15, %v7864_v31, %v7869_v49  ;;  %v8257_v9 = vcombine.low %v7838_v51, %v7846_v11  ;;  %v8258_v48 = vcombine.low %v7854_v57, %v7862_v18  ;;  %v12612_v2 = vcombine.high %v12556_v17, %v12556_v17 }
 0x111   : > { %10280 = vmatmul.mubr.msk.bf16.gmra.mrb[20].mxu1 %vm1631_vm1, %v2956_v56  ;;  %v7879_v24 = vsel %vm11405_vm15, %v7872_v13, %v7877_v21  ;;  %v8266_v44 = vrot.slane %v8256_v46, %v11366_v15  ;;  %v2620_v12 = vcombine.high %v10262_v16, %v10262_v16  ;;  %v2627_v3 = vrot.slane %v10262_v16, %v11366_v15 }
 0x112   : > { %v8259_v40 = vcombine.low %v7871_v59, %v7879_v24  ;;  %v8273_v38 = vrot.slane %v8257_v9, %v11366_v15  ;;  %v8280_v8 = vrot.slane %v8258_v48, %v11366_v15  ;;  %3134 = vmatprep.mubr.bf16.mxu1 %v13507_v5  ;;  %v2644_v55 = vcombine.high %v10263_v47, %v10263_v47 }
 0x113   : > { %v2634_v27 = vrot.slane %v2620_v12, %v11366_v15  ;;  %v12624_v58 = vrot.slane %v10263_v47, %v11366_v15  ;;  %v7484_v33 = vcombine.high %v12198_v41, %v12198_v41  ;;  %v7880_v29 = vshrl.u32 %v12571_v63, 16  ;;  %v10301_v12 = vld.sshfl [vmem:[%s11364_s25 + $0xc] sm:$0x13 pattern:$0x75316420] }
 0x114   : > { %v8287_v26 = vrot.slane %v8259_v40, %v11366_v15  ;;  %v8288_v43 = vcombine.low %v8266_v44, %v8273_v38  ;;  %v12631_v35 = vrot.slane %v2644_v55, %v11366_v15  ;;  %v7893_v4 = vshll.u32 %v12421_v42, 16 }
 0x115   : > { %v2957_v14 = vcombine.low %v12612_v2, %v2634_v27  ;;  %v10271_v30 = vcombine.high %v2627_v3, %v2634_v27  ;;  %v7885_v61 = vshll.u32 %v7484_v33, 16  ;;  %v7888_v22 = vshrl.u32 %v7484_v33, 16  ;;  %v12676_v33 = vld.sshfl [vmem:[%s11364_s25 + $0x10] sm:$0x33 pattern:$0x75316420] }
 0x116   : > { %v8289_v0 = vcombine.low %v8280_v8, %v8287_v26  ;;  %v8296_v51 = vrot.slane %v8288_v43, %v11366_v15  ;;  %v2959_v41 = vcombine.low %v12624_v58, %v12631_v35  ;;  %v10272_v63 = vcombine.high %v12624_v58, %v12631_v35 }
 0x117   : > { %v2967_v45 = vrot.slane %v2957_v14, %v11366_v15  ;;  %v2974_v62 = vrot.slane %v10271_v30, %v11366_v15  ;;  %v7887_v54 = vsel %vm11405_vm15, %v7880_v29, %v7885_v61  ;;  %v7895_v11 = vsel %vm11405_vm15, %v7888_v22, %v7893_v4 }
 0x118   : > { %v8303_v20 = vrot.slane %v8289_v0, %v11366_v15  ;;  %v2981_v36 = vrot.slane %v2959_v41, %v11366_v15  ;;  %v2988_v16 = vrot.slane %v10272_v63, %v11366_v15  ;;  %v7896_v57 = vshrl.u32 %v12421_v42, 16 }
 0x119   : > { %v2989_v31 = vcombine.low %v2967_v45, %v2974_v62  ;;  %v7901_v49 = vshll.u32 %v12468_v6, 16  ;;  %v7904_v13 = vshrl.u32 %v12468_v6, 16  ;;  %v7909_v56 = vshll.u32 %v12463_v60, 16 }
 0x11a   : > { %v8304_v18 = vcombine.low %v8296_v51, %v8303_v20  ;;  %v2990_v21 = vcombine.low %v2981_v36, %v2988_v16  ;;  %v7912_v46 = vshrl.u32 %v12463_v60, 16  ;;  %v7917_v47 = vshll.u32 %v12476_v19, 16  ;;  %v10300_v6 = vld.sshfl [vmem:[%s11364_s25 + $0x8] sm:$0x33 pattern:$0x75316420] }
 0x11b   : > { %v2997_v59 = vrot.slane %v2989_v31, %v11366_v15  ;;  %v7903_v9 = vsel %vm11405_vm15, %v7896_v57, %v7901_v49  ;;  %v7911_v42 = vsel %vm11405_vm15, %v7904_v13, %v7909_v56  ;;  %v7921_v48 = vshrl.u32 %v12237_v53, 16 }
 0x11c   : > { %10618 = vmatmul.mubr.msk.bf16.gmra.mrb[4].mxu0 %vm1631_vm1, %v8304_v18  ;;  %v3004_v24 = vrot.slane %v2990_v21, %v11366_v15  ;;  %v7919_v60 = vsel %vm11405_vm15, %v7912_v46, %v7917_v47  ;;  %v7926_v19 = vshll.u32 %v12253_v25, 16  ;;  %v7929_v44 = vshrl.u32 %v12253_v25, 16 }
 0x11d   : > { %8638 = vmatprep.mubr.bf16.mxu0 %v13507_v5  ;;  %v7934_v3 = vshll.u32 %v12257_v50, 16  ;;  %v7937_v53 = vshrl.u32 %v12257_v50, 16  ;;  %v7942_v40 = vshll.u32 %v12290_v39, 16  ;;  %v8305_v38 = vcombine.low %v7887_v54, %v7895_v11 }
 0x11e   : > { %v3005_v8 = vcombine.low %v2997_v59, %v3004_v24  ;;  %v7928_v55 = vsel %vm11405_vm15, %v7921_v48, %v7926_v19  ;;  %v8306_v27 = vcombine.low %v7903_v9, %v7911_v42  ;;  %v3216_v29 = vcombine.high %v10300_v6, %v10300_v6 }
 0x11f   : > { %v7936_v25 = vsel %vm11405_vm15, %v7929_v44, %v7934_v3  ;;  %v7944_v26 = vsel %vm11405_vm15, %v7937_v53, %v7942_v40  ;;  %v8307_v43 = vcombine.low %v7919_v60, %v7928_v55  ;;  %v8315_v50 = vrot.slane %v8305_v38, %v11366_v15 }
 0x120   : > { %10281 = vmatmul.mubr.msk.bf16.gmra.mrb[24].mxu1 %vm1631_vm1, %v3005_v8  ;;  %v8308_v4 = vcombine.low %v7936_v25, %v7944_v26  ;;  %v8322_v14 = vrot.slane %v8306_v27, %v11366_v15  ;;  %v3223_v30 = vrot.slane %v10300_v6, %v11366_v15  ;;  %v3230_v61 = vrot.slane %v3216_v29, %v11366_v15 }
 0x121   : > { %v8329_v22 = vrot.slane %v8307_v43, %v11366_v15  ;;  %3998 = vmatprep.mubr.bf16.mxu1 %v13507_v5  ;;  %v3240_v0 = vcombine.high %v10301_v12, %v10301_v12  ;;  %v3247_v51 = vrot.slane %v10301_v12, %v11366_v15  ;;  %v12692_v41 = vrot.slane %v12676_v33, %v11366_v15 }
 0x122   : > { %v8336_v63 = vrot.slane %v8308_v4, %v11366_v15  ;;  %v8337_v45 = vcombine.low %v8315_v50, %v8322_v14  ;;  %v3587_v62 = vcombine.low %v3223_v30, %v3230_v61  ;;  %v10317_v54 = vcombine.high %v3223_v30, %v3230_v61  ;;  %v10303_v14 = vld.sshfl [vmem:[%s11364_s25 + $0x14] sm:$0x13 pattern:$0x75316420] }
 0x123   : > { %v3254_v11 = vrot.slane %v3240_v0, %v11366_v15  ;;  %v3255_v20 = vcombine.high %v3247_v51, %v3247_v51  ;;  %v7555_v36 = vcombine.high %v12479_v32, %v12479_v32  ;;  %v7556_v16 = vcombine.high %v12482_v52, %v12482_v52 }
 0x124   : > { %v8338_v57 = vcombine.low %v8329_v22, %v8336_v63  ;;  %v8345_v31 = vrot.slane %v8337_v45, %v11366_v15  ;;  %v3597_v49 = vrot.slane %v3587_v62, %v11366_v15  ;;  %v3604_v13 = vrot.slane %v10317_v54, %v11366_v15  ;;  %v10304_v45 = vld.sshfl [vmem:[%s11364_s25 + $0x18] sm:$0x33 pattern:$0x75316420] }
 0x125   : > { %v3589_v56 = vcombine.low %v3247_v51, %v3254_v11  ;;  %v3590_v18 = vcombine.low %v3255_v20, %v12692_v41  ;;  %v7579_v21 = vcombine.high %v12297_v37, %v12297_v37  ;;  %v7580_v46 = vcombine.high %v12303_v23, %v12303_v23 }
 0x126   : > { %v8352_v47 = vrot.slane %v8338_v57, %v11366_v15  ;;  %v3619_v59 = vcombine.low %v3597_v49, %v3604_v13  ;;  %v7945_v9 = vshrl.u32 %v12290_v39, 16  ;;  %v7950_v42 = vshll.u32 %v12479_v32, 16  ;;  %v10552_v49 = vld.sshfl [vmem:[%s11364_s25 + $0x38] sm:$0x33 pattern:$0x75316420] }
 0x127   : > { %v3611_v48 = vrot.slane %v3589_v56, %v11366_v15  ;;  %v3618_v6 = vrot.slane %v3590_v18, %v11366_v15  ;;  %v7953_v24 = vshrl.u32 %v12479_v32, 16  ;;  %v7958_v60 = vshll.u32 %v12482_v52, 16 }
 0x128   : > { %v8353_v19 = vcombine.low %v8345_v31, %v8352_v47  ;;  %v3627_v44 = vrot.slane %v3619_v59, %v11366_v15  ;;  %v7952_v12 = vsel %vm11405_vm15, %v7945_v9, %v7950_v42  ;;  %v7961_v3 = vshrl.u32 %v12482_v52, 16 }
 0x129   : > { %v3620_v53 = vcombine.low %v3611_v48, %v3618_v6  ;;  %v7960_v39 = vsel %vm11405_vm15, %v7953_v24, %v7958_v60  ;;  %v7966_v40 = vshll.u32 %v7555_v36, 16  ;;  %v7969_v38 = vshrl.u32 %v7555_v36, 16 }
 0x12a   : > { %10619 = vmatmul.mubr.msk.bf16.gmra.mrb[8].mxu0 %vm1631_vm1, %v8353_v19  ;;  %v7974_v32 = vshll.u32 %v7556_v16, 16  ;;  %v7978_v8 = vshrl.u32 %v12297_v37, 16  ;;  %v7983_v55 = vshll.u32 %v12303_v23, 16  ;;  %v7986_v27 = vshrl.u32 %v12303_v23, 16 }
 0x12b   : > { %8648 = vmatprep.mubr.bf16.mxu0 %v13507_v5  ;;  %v3634_v52 = vrot.slane %v3620_v53, %v11366_v15  ;;  %v7968_v29 = vsel %vm11405_vm15, %v7961_v3, %v7966_v40  ;;  %v7991_v25 = vshll.u32 %v7579_v21, 16  ;;  %v7994_v26 = vshrl.u32 %v7579_v21, 16 }
 0x12c   : > { %v7976_v43 = vsel %vm11405_vm15, %v7969_v38, %v7974_v32  ;;  %v7985_v37 = vsel %vm11405_vm15, %v7978_v8, %v7983_v55  ;;  %v7999_v50 = vshll.u32 %v7580_v46, 16  ;;  %v8002_v4 = vshrl.u32 %v7580_v46, 16 }
 0x12d   : > { %v3635_v23 = vcombine.low %v3627_v44, %v3634_v52  ;;  %v7993_v30 = vsel %vm11405_vm15, %v7986_v27, %v7991_v25  ;;  %v8007_v61 = vshll.u32 %v12548_v10, 16  ;;  %v8354_v22 = vcombine.low %v7952_v12, %v7960_v39 }
 0x12e   : > { %v8001_v0 = vsel %vm11405_vm15, %v7994_v26, %v7999_v50  ;;  %v8355_v51 = vcombine.low %v7968_v29, %v7976_v43  ;;  %v8356_v63 = vcombine.low %v7985_v37, %v7993_v30  ;;  %v3263_v62 = vcombine.high %v12676_v33, %v12676_v33 }
 0x12f   : > { %10323 = vmatmul.mubr.msk.bf16.vlgmr.msra.gmra.mrb[0].mxu1 %vm1631_vm1, %v3635_v23  ;;  %v8009_v54 = vsel %vm11405_vm15, %v8002_v4, %v8007_v61  ;;  %v8364_v11 = vrot.slane %v8354_v22, %v11366_v15  ;;  %v3278_v20 = vcombine.high %v12692_v41, %v12692_v41  ;;  %v3287_v36 = vcombine.high %v10303_v14, %v10303_v14  ;;  %v13517_v41 = vld [vmem:[#allocation4_spill] sm:$0xff] }
 0x130   : > { %v8357_v16 = vcombine.low %v8001_v0, %v8009_v54  ;;  %v8371_v57 = vrot.slane %v8355_v51, %v11366_v15  ;;  %v8378_v31 = vrot.slane %v8356_v63, %v11366_v15  ;;  %4008 = vmatprep.mubr.bf16.mxu1 %v13507_v5  ;;  %v3277_v33 = vrot.slane %v3263_v62, %v11366_v15  ;;  %v10305_v63 = vld.sshfl [vmem:[%s11364_s25 + $0x1c] sm:$0x13 pattern:$0x75316420] }
 0x131   : > { %v3294_v13 = vrot.slane %v10303_v14, %v11366_v15  ;;  %v3301_v56 = vrot.slane %v3287_v36, %v11366_v15  ;;  %v3310_v18 = vcombine.high %v10304_v45, %v10304_v45  ;;  %v12756_v21 = vrot.slane %v10304_v45, %v11366_v15  ;;  %10721 = vmatpush1.bf16.msra.mxu1 %v13517_v41 }
 0x132   : > { %v8385_v46 = vrot.slane %v8357_v16, %v11366_v15  ;;  %v8386_v47 = vcombine.low %v8364_v11, %v8371_v57  ;;  %v3279_v59 = vcombine.high %v3277_v33, %v3277_v33  ;;  %v3636_v9 = vcombine.low %v3277_v33, %v3278_v20 }
 0x133   : > { %v3302_v42 = vcombine.high %v3294_v13, %v3294_v13  ;;  %v12761_v48 = vrot.slane %v3310_v18, %v11366_v15  ;;  %v7612_v6 = vcombine.high %v10552_v49, %v10552_v49  ;;  %v12764_v24 = vrot.slane %v10552_v49, %v11366_v15 }
 0x134   : > { %v8387_v60 = vcombine.low %v8378_v31, %v8385_v46  ;;  %v8394_v19 = vrot.slane %v8386_v47, %v11366_v15  ;;  %v3637_v44 = vcombine.low %v3279_v59, %v3294_v13  ;;  %v3646_v12 = vrot.slane %v3636_v9, %v11366_v15  ;;  %v10306_v31 = vld.sshfl [vmem:[%s11364_s25 + $0x20] sm:$0x33 pattern:$0x75316420] }
 0x135   : > { %v3638_v3 = vcombine.low %v3301_v56, %v3302_v42  ;;  %v3639_v53 = vcombine.low %v12756_v21, %v12761_v48  ;;  %v12771_v39 = vrot.slane %v7612_v6, %v11366_v15  ;;  %v7627_v40 = vcombine.high %v12764_v24, %v12764_v24 }
 0x136   : > { %v8401_v38 = vrot.slane %v8387_v60, %v11366_v15  ;;  %v3653_v32 = vrot.slane %v3637_v44, %v11366_v15  ;;  %v8010_v8 = vshrl.u32 %v12548_v10, 16  ;;  %v8015_v55 = vshll.u32 %v12556_v17, 16 }
 0x137   : > { %v3660_v27 = vrot.slane %v3638_v3, %v11366_v15  ;;  %v3667_v52 = vrot.slane %v3639_v53, %v11366_v15  ;;  %v12783_v29 = vcombine.high %v12771_v39, %v12771_v39  ;;  %v8018_v25 = vshrl.u32 %v12556_v17, 16 }
 0x138   : > { %v8402_v26 = vcombine.low %v8394_v19, %v8401_v38  ;;  %v3668_v43 = vcombine.low %v3646_v12, %v3653_v32  ;;  %v8017_v37 = vsel %vm11405_vm15, %v8010_v8, %v8015_v55  ;;  %v8023_v10 = vshll.u32 %v12560_v1, 16 }
 0x139   : > { %v3669_v50 = vcombine.low %v3660_v27, %v3667_v52  ;;  %v8026_v4 = vshrl.u32 %v12560_v1, 16  ;;  %v8031_v14 = vshll.u32 %v12612_v2, 16  ;;  %v8035_v23 = vshrl.u32 %v12764_v24, 16 }
 0x13a   : > { %10620 = vmatmul.mubr.msk.bf16.gmra.mrb[12].mxu0 %vm1631_vm1, %v8402_v26  ;;  %v3676_v30 = vrot.slane %v3668_v43, %v11366_v15  ;;  %v8025_v17 = vsel %vm11405_vm15, %v8018_v25, %v8023_v10  ;;  %v8040_v61 = vshll.u32 %v12771_v39, 16  ;;  %v8043_v22 = vshrl.u32 %v12771_v39, 16  ;;  %v10555_v27 = vld.sshfl [vmem:[%s11364_s25 + $0x44] sm:$0x33 pattern:$0x75316420] }
 0x13b   : > { %8658 = vmatprep.mubr.bf16.mxu0 %v13507_v5  ;;  %v3683_v1 = vrot.slane %v3669_v50, %v11366_v15  ;;  %v8033_v2 = vsel %vm11405_vm15, %v8026_v4, %v8031_v14  ;;  %v8048_v0 = vshll.u32 %v7627_v40, 16  ;;  %v8051_v51 = vshrl.u32 %v7627_v40, 16 }
 0x13c   : > { %v12805_v45 = vsel %vm11405_vm15, %v8035_v23, %v8040_v61  ;;  %v8056_v62 = vshll.u32 %v12783_v29, 16  ;;  %v8059_v54 = vshrl.u32 %v12783_v29, 16  ;;  %v8064_v11 = vshll.u32 %v12624_v58, 16 }
 0x13d   : > { %v3684_v20 = vcombine.low %v3676_v30, %v3683_v1  ;;  %v12812_v36 = vsel %vm11405_vm15, %v8043_v22, %v8048_v0  ;;  %v8067_v16 = vshrl.u32 %v12624_v58, 16  ;;  %v8072_v57 = vshll.u32 %v12631_v35, 16 }
 0x13e   : > { %v12819_v33 = vsel %vm11405_vm15, %v8051_v51, %v8056_v62  ;;  %v8066_v49 = vsel %vm11405_vm15, %v8059_v54, %v8064_v11  ;;  %v8403_v13 = vcombine.low %v8017_v37, %v8025_v17  ;;  %v8404_v56 = vcombine.low %v8033_v2, %v12805_v45 }
 0x13f   : > { %10324 = vmatmul.mubr.msk.bf16.gmra.mrb[4].mxu1 %vm1631_vm1, %v3684_v20  ;;  %v8074_v18 = vsel %vm11405_vm15, %v8067_v16, %v8072_v57  ;;  %v8405_v41 = vcombine.low %v12812_v36, %v12819_v33  ;;  %v3334_v46 = vcombine.high %v10305_v63, %v10305_v63  ;;  %v3341_v47 = vrot.slane %v10305_v63, %v11366_v15 }
 0x140   : > { %v8406_v59 = vcombine.low %v8066_v49, %v8074_v18  ;;  %v8413_v9 = vrot.slane %v8403_v13, %v11366_v15  ;;  %v8420_v42 = vrot.slane %v8404_v56, %v11366_v15  ;;  %4018 = vmatprep.mubr.bf16.mxu1 %v13507_v5  ;;  %v3357_v6 = vcombine.high %v10306_v31, %v10306_v31 }
 0x141   : > { %v8427_v60 = vrot.slane %v8405_v41, %v11366_v15  ;;  %v3348_v19 = vrot.slane %v3334_v46, %v11366_v15  ;;  %v3349_v44 = vcombine.high %v3341_v47, %v3341_v47  ;;  %v3364_v12 = vrot.slane %v10306_v31, %v11366_v15 }
 0x142   : > { %v8434_v3 = vrot.slane %v8406_v59, %v11366_v15  ;;  %v8435_v53 = vcombine.low %v8413_v9, %v8420_v42  ;;  %v12840_v40 = vrot.slane %v3357_v6, %v11366_v15  ;;  %v10318_v38 = vcombine.high %v12756_v21, %v12761_v48  ;;  %v10307_v6 = vld.sshfl [vmem:[%s11364_s25 + $0x24] sm:$0x13 pattern:$0x75316420] }
 0x143   : > { %v3372_v32 = vcombine.high %v3364_v12, %v3364_v12  ;;  %v3686_v8 = vcombine.low %v3341_v47, %v3348_v19  ;;  %v3687_v55 = vcombine.low %v3349_v44, %v3364_v12  ;;  %v7651_v52 = vcombine.high %v12624_v58, %v12624_v58 }
 0x144   : > { %v8436_v25 = vcombine.low %v8427_v60, %v8434_v3  ;;  %v8443_v26 = vrot.slane %v8435_v53, %v11366_v15  ;;  %v3695_v43 = vrot.slane %v10318_v38, %v11366_v15  ;;  %v7652_v37 = vcombine.high %v12631_v35, %v12631_v35  ;;  %v10308_v3 = vld.sshfl [vmem:[%s11364_s25 + $0x28] sm:$0x33 pattern:$0x75316420] }
 0x145   : > { %v3688_v10 = vcombine.low %v12840_v40, %v3372_v32  ;;  %v3702_v50 = vrot.slane %v3686_v8, %v11366_v15  ;;  %v3709_v21 = vrot.slane %v3687_v55, %v11366_v15  ;;  %v7675_v48 = vcombine.high %v12372_v7, %v12372_v7 }
 0x146   : > { %v8450_v4 = vrot.slane %v8436_v25, %v11366_v15  ;;  %v7676_v58 = vcombine.high %v12383_v28, %v12383_v28  ;;  %v7684_v14 = vcombine.high %v10555_v27, %v10555_v27  ;;  %v12860_v23 = vrot.slane %v10555_v27, %v11366_v15 }
 0x147   : > { %v3716_v30 = vrot.slane %v3688_v10, %v11366_v15  ;;  %v3717_v17 = vcombine.low %v3695_v43, %v3702_v50  ;;  %v8075_v61 = vshrl.u32 %v12631_v35, 16  ;;  %v8080_v22 = vshll.u32 %v7651_v52, 16  ;;  %v10556_v10 = vld.sshfl [vmem:[%s11364_s25 + $0x48] sm:$0x33 pattern:$0x75316420] }
 0x148   : > { %v8451_v1 = vcombine.low %v8443_v26, %v8450_v4  ;;  %v12865_v2 = vrot.slane %v7684_v14, %v11366_v15  ;;  %v12869_v0 = vcombine.high %v12860_v23, %v12860_v23  ;;  %v8083_v51 = vshrl.u32 %v7651_v52, 16 }
 0x149   : > { %v3718_v63 = vcombine.low %v3709_v21, %v3716_v30  ;;  %v3725_v62 = vrot.slane %v3717_v17, %v11366_v15  ;;  %v8082_v11 = vsel %vm11405_vm15, %v8075_v61, %v8080_v22  ;;  %v8088_v20 = vshll.u32 %v7652_v37, 16  ;;  %v10557_v17 = vld.sshfl [vmem:[%s11364_s25 + $0x4c] sm:$0x33 pattern:$0x75316420] }
 0x14a   : > { %10621 = vmatmul.mubr.msk.bf16.gmra.mrb[16].mxu0 %vm1631_vm1, %v8451_v1  ;;  %v8092_v35 = vshrl.u32 %v12372_v7, 16  ;;  %v8097_v16 = vshll.u32 %v12383_v28, 16  ;;  %v8100_v57 = vshrl.u32 %v12383_v28, 16  ;;  %v8105_v31 = vshll.u32 %v7675_v48, 16 }
 0x14b   : > { %8668 = vmatprep.mubr.bf16.mxu0 %v13507_v5  ;;  %v3732_v49 = vrot.slane %v3718_v63, %v11366_v15  ;;  %v8090_v13 = vsel %vm11405_vm15, %v8083_v51, %v8088_v20  ;;  %v8108_v56 = vshrl.u32 %v7675_v48, 16  ;;  %v8113_v18 = vshll.u32 %v7676_v58, 16 }
 0x14c   : > { %v8099_v41 = vsel %vm11405_vm15, %v8092_v35, %v8097_v16  ;;  %v8107_v7 = vsel %vm11405_vm15, %v8100_v57, %v8105_v31  ;;  %v8116_v46 = vshrl.u32 %v7676_v58, 16  ;;  %v8121_v28 = vshll.u32 %v12860_v23, 16 }
 0x14d   : > { %v3733_v47 = vcombine.low %v3725_v62, %v3732_v49  ;;  %v8115_v59 = vsel %vm11405_vm15, %v8108_v56, %v8113_v18  ;;  %v8124_v9 = vshrl.u32 %v12860_v23, 16  ;;  %v8129_v42 = vshll.u32 %v12865_v2, 16 }
 0x14e   : > { %v8123_v60 = vsel %vm11405_vm15, %v8116_v46, %v8121_v28  ;;  %v8132_v19 = vshrl.u32 %v12865_v2, 16  ;;  %v8137_v44 = vshll.u32 %v12869_v0, 16  ;;  %v8452_v12 = vcombine.low %v8082_v11, %v8090_v13 }
 0x14f   : > { %10325 = vmatmul.mubr.msk.bf16.gmra.mrb[8].mxu1 %vm1631_vm1, %v3733_v47  ;;  %v12902_v53 = vsel %vm11405_vm15, %v8124_v9, %v8129_v42  ;;  %v8453_v38 = vcombine.low %v8099_v41, %v8107_v7  ;;  %v8454_v32 = vcombine.low %v8115_v59, %v8123_v60  ;;  %v3373_v8 = vcombine.high %v12840_v40, %v12840_v40 }
 0x150   : > { %v12908_v55 = vsel %vm11405_vm15, %v8132_v19, %v8137_v44  ;;  %v8462_v27 = vrot.slane %v8452_v12, %v11366_v15  ;;  %4028 = vmatprep.mubr.bf16.mxu1 %v13507_v5  ;;  %v3381_v52 = vcombine.high %v10307_v6, %v10307_v6  ;;  %v3388_v25 = vrot.slane %v10307_v6, %v11366_v15 }
 0x151   : > { %v8455_v26 = vcombine.low %v12902_v53, %v12908_v55  ;;  %v8469_v43 = vrot.slane %v8453_v38, %v11366_v15  ;;  %v8476_v37 = vrot.slane %v8454_v32, %v11366_v15  ;;  %v3404_v40 = vcombine.high %v10308_v3, %v10308_v3 }
 0x152   : > { %v3395_v50 = vrot.slane %v3381_v52, %v11366_v15  ;;  %v3396_v21 = vcombine.high %v3388_v25, %v3388_v25  ;;  %v3411_v48 = vrot.slane %v10308_v3, %v11366_v15  ;;  %v3734_v4 = vcombine.low %v3373_v8, %v3388_v25 }
 0x153   : > { %v8483_v58 = vrot.slane %v8455_v26, %v11366_v15  ;;  %v8484_v14 = vcombine.low %v8462_v27, %v8469_v43  ;;  %v3418_v30 = vrot.slane %v3404_v40, %v11366_v15  ;;  %v12925_v61 = vcombine.high %v12865_v2, %v12865_v2 }
 0x154   : > { %v3735_v22 = vcombine.low %v3395_v50, %v3396_v21  ;;  %v3744_v1 = vrot.slane %v3734_v4, %v11366_v15  ;;  %v7708_v51 = vcombine.high %v10556_v10, %v10556_v10  ;;  %v7715_v63 = vrot.slane %v10556_v10, %v11366_v15  ;;  %v10309_v21 = vld.sshfl [vmem:[%s11364_s25 + $0x2c] sm:$0x13 pattern:$0x75316420] }
 0x155   : > { %v8485_v62 = vcombine.low %v8476_v37, %v8483_v58  ;;  %v8492_v11 = vrot.slane %v8484_v14, %v11366_v15  ;;  %v3736_v20 = vcombine.low %v3411_v48, %v3418_v30  ;;  %v10319_v35 = vcombine.high %v3411_v48, %v3418_v30 }
 0x156   : > { %v3751_v16 = vrot.slane %v3735_v22, %v11366_v15  ;;  %v7722_v57 = vrot.slane %v7708_v51, %v11366_v15  ;;  %v7723_v31 = vcombine.high %v7715_v63, %v7715_v63  ;;  %v7732_v49 = vcombine.high %v10557_v17, %v10557_v17  ;;  %v10310_v51 = vld.sshfl [vmem:[%s11364_s25 + $0x30] sm:$0x33 pattern:$0x75316420] }
 0x157   : > { %v8499_v13 = vrot.slane %v8485_v62, %v11366_v15  ;;  %v3758_v56 = vrot.slane %v3736_v20, %v11366_v15  ;;  %v3765_v18 = vrot.slane %v10319_v35, %v11366_v15  ;;  %v12936_v41 = vrot.slane %v10557_v17, %v11366_v15  ;;  %v12977_v20 = vld.sshfl [vmem:[%s11364_s25 + $0x34] sm:$0x13 pattern:$0x75316420] }
 0x158   : > { %v3766_v7 = vcombine.low %v3744_v1, %v3751_v16  ;;  %v7724_v46 = vcombine.high %v7722_v57, %v7722_v57  ;;  %v12939_v47 = vrot.slane %v7732_v49, %v11366_v15  ;;  %v8140_v59 = vshrl.u32 %v12869_v0, 16 }
 0x159   : > { %v8500_v9 = vcombine.low %v8492_v11, %v8499_v13  ;;  %v3767_v42 = vcombine.low %v3758_v56, %v3765_v18  ;;  %v7747_v6 = vcombine.high %v12936_v41, %v12936_v41  ;;  %v8145_v60 = vshll.u32 %v12925_v61, 16 }
 0x15a   : > { %v3774_v19 = vrot.slane %v3766_v7, %v11366_v15  ;;  %v7748_v44 = vcombine.high %v12939_v47, %v12939_v47  ;;  %v8149_v12 = vshrl.u32 %v7715_v63, 16  ;;  %v8154_v3 = vshll.u32 %v7722_v57, 16 }
 0x15b   : > { %10622 = vmatmul.mubr.msk.bf16.gmra.mrb[20].mxu0 %vm1631_vm1, %v8500_v9  ;;  %v3781_v38 = vrot.slane %v3767_v42, %v11366_v15  ;;  %v12952_v32 = vsel %vm11405_vm15, %v8140_v59, %v8145_v60  ;;  %v8157_v8 = vshrl.u32 %v7722_v57, 16  ;;  %v8162_v27 = vshll.u32 %v7723_v31, 16 }
 0x15c   : > { %8678 = vmatprep.mubr.bf16.mxu0 %v13507_v5  ;;  %v8156_v52 = vsel %vm11405_vm15, %v8149_v12, %v8154_v3  ;;  %v8165_v25 = vshrl.u32 %v7723_v31, 16  ;;  %v8170_v26 = vshll.u32 %v7724_v46, 16  ;;  %v8173_v43 = vshrl.u32 %v7724_v46, 16 }
 0x15d   : > { %v3782_v37 = vcombine.low %v3774_v19, %v3781_v38  ;;  %v8164_v40 = vsel %vm11405_vm15, %v8157_v8, %v8162_v27  ;;  %v8178_v10 = vshll.u32 %v12936_v41, 16  ;;  %v8181_v50 = vshrl.u32 %v12936_v41, 16  ;;  %v10640_v46 = vld.sshfl [vmem:[%s11364_s25 + $0x10] sm:$0x32 pattern:$0x75316420] }
 0x15e   : > { %v8172_v48 = vsel %vm11405_vm15, %v8165_v25, %v8170_v26  ;;  %v8186_v4 = vshll.u32 %v12939_v47, 16  ;;  %v8189_v58 = vshrl.u32 %v12939_v47, 16  ;;  %v8194_v14 = vshll.u32 %v7747_v6, 16 }
 0x15f   : > { %10326 = vmatmul.mubr.msk.bf16.gmra.mrb[12].mxu1 %vm1631_vm1, %v3782_v37  ;;  %v8180_v30 = vsel %vm11405_vm15, %v8173_v43, %v8178_v10  ;;  %v8197_v17 = vshrl.u32 %v7747_v6, 16  ;;  %v8202_v22 = vshll.u32 %v7748_v44, 16  ;;  %v8501_v1 = vcombine.low %v12952_v32, %v8156_v52  ;;  %v10641_v8 = vld.sshfl [vmem:[%s11364_s25 + $0x14] sm:$0x33 pattern:$0x75316420] }
 0x160   : > { %v8188_v63 = vsel %vm11405_vm15, %v8181_v50, %v8186_v4  ;;  %v8196_v62 = vsel %vm11405_vm15, %v8189_v58, %v8194_v14  ;;  %v8502_v11 = vcombine.low %v8164_v40, %v8172_v48  ;;  %4038 = vmatprep.mubr.bf16.mxu1 %v13507_v5  ;;  %v3428_v35 = vcombine.high %v10309_v21, %v10309_v21  ;;  %v13010_v40 = vld.sshfl [vmem:[%s11364_s25 + $0x18] sm:$0x32 pattern:$0x75316420] }
 0x161   : > { %v8204_v16 = vsel %vm11405_vm15, %v8197_v17, %v8202_v22  ;;  %v8503_v57 = vcombine.low %v8180_v30, %v8188_v63  ;;  %v8511_v31 = vrot.slane %v8501_v1, %v11366_v15  ;;  %v3435_v49 = vrot.slane %v10309_v21, %v11366_v15 }
 0x162   : > { %v8504_v13 = vcombine.low %v8196_v62, %v8204_v16  ;;  %v8518_v56 = vrot.slane %v8502_v11, %v11366_v15  ;;  %v3442_v18 = vrot.slane %v3428_v35, %v11366_v15  ;;  %v3451_v7 = vcombine.high %v10310_v51, %v10310_v51  ;;  %v10313_v16 = vld.sshfl [vmem:[%s11364_s25 + $0x3c] sm:$0x13 pattern:$0x75316420] }
 0x163   : > { %v8525_v59 = vrot.slane %v8503_v57, %v11366_v15  ;;  %v3443_v9 = vcombine.high %v3435_v49, %v3435_v49  ;;  %v12988_v42 = vrot.slane %v10310_v51, %v11366_v15  ;;  %v3482_v6 = vrot.slane %v12977_v20, %v11366_v15 }
 0x164   : > { %v8532_v60 = vrot.slane %v8504_v13, %v11366_v15  ;;  %v8533_v19 = vcombine.low %v8511_v31, %v8518_v56  ;;  %v12994_v44 = vrot.slane %v3451_v7, %v11366_v15  ;;  %v3783_v12 = vcombine.low %v3435_v49, %v3442_v18 }
 0x165   : > { %v12998_v3 = vcombine.high %v12988_v42, %v12988_v42  ;;  %v3784_v38 = vcombine.low %v3443_v9, %v12988_v42  ;;  %v8756_v27 = vcombine.high %v10640_v46, %v10640_v46  ;;  %v8763_v52 = vrot.slane %v10640_v46, %v11366_v15 }
 0x166   : > { %v8534_v25 = vcombine.low %v8525_v59, %v8532_v60  ;;  %v8541_v26 = vrot.slane %v8533_v19, %v11366_v15  ;;  %v13006_v43 = vcombine.high %v12994_v44, %v12994_v44  ;;  %v3793_v37 = vrot.slane %v3783_v12, %v11366_v15 }
 0x167   : > { %v3785_v10 = vcombine.low %v12994_v44, %v12998_v3  ;;  %v3800_v50 = vrot.slane %v3784_v38, %v11366_v15  ;;  %v8770_v21 = vrot.slane %v8756_v27, %v11366_v15  ;;  %v8771_v48 = vcombine.high %v8763_v52, %v8763_v52 }
 0x168   : > { %v8548_v4 = vrot.slane %v8534_v25, %v11366_v15  ;;  %v3786_v58 = vcombine.low %v13006_v43, %v3482_v6  ;;  %v8780_v14 = vcombine.high %v10641_v8, %v10641_v8  ;;  %v8787_v30 = vrot.slane %v10641_v8, %v11366_v15 }
 0x169   : > { %v3807_v17 = vrot.slane %v3785_v10, %v11366_v15  ;;  %v3815_v22 = vcombine.low %v3793_v37, %v3800_v50  ;;  %v8772_v1 = vcombine.high %v8770_v21, %v8770_v21  ;;  %v8804_v51 = vcombine.high %v13010_v40, %v13010_v40  ;;  %v10643_v37 = vld.sshfl [vmem:[%s11364_s25 + $0x1c] sm:$0x33 pattern:$0x75316420] }
 0x16a   : > { %v8549_v63 = vcombine.low %v8541_v26, %v8548_v4  ;;  %v3814_v62 = vrot.slane %v3786_v58, %v11366_v15  ;;  %v8794_v11 = vrot.slane %v8780_v14, %v11366_v15  ;;  %v8795_v35 = vcombine.high %v8787_v30, %v8787_v30 }
 0x16b   : > { %v3823_v57 = vrot.slane %v3815_v22, %v11366_v15  ;;  %v8818_v31 = vrot.slane %v8804_v51, %v11366_v15  ;;  %v9135_v49 = vcombine.low %v8770_v21, %v8771_v48  ;;  %v9136_v13 = vcombine.low %v8772_v1, %v8787_v30  ;;  %v10644_v48 = vld.sshfl [vmem:[%s11364_s25 + $0x20] sm:$0x32 pattern:$0x75316420] }
 0x16c   : > { %10623 = vmatmul.mubr.msk.bf16.gmra.mrb[24].mxu0 %vm1631_vm1, %v8549_v63  ;;  %v3816_v56 = vcombine.low %v3807_v17, %v3814_v62  ;;  %v8796_v18 = vcombine.high %v8794_v11, %v8794_v11  ;;  %v9137_v7 = vcombine.low %v8794_v11, %v8795_v35  ;;  %v3475_v46 = vcombine.high %v12977_v20, %v12977_v20 }
 0x16d   : > { %9546 = vmatprep.mubr.bf16.mxu0 %v13507_v5  ;;  %v9145_v59 = vrot.slane %v9135_v49, %v11366_v15  ;;  %v9152_v9 = vrot.slane %v9136_v13, %v11366_v15  ;;  %v3490_v60 = vcombine.high %v3482_v6, %v3482_v6  ;;  %v3522_v19 = vcombine.high %v10313_v16, %v10313_v16 }
 0x16e   : > { %v3830_v12 = vrot.slane %v3816_v56, %v11366_v15  ;;  %v9138_v38 = vcombine.low %v8796_v18, %v8818_v31  ;;  %v9159_v8 = vrot.slane %v9137_v7, %v11366_v15  ;;  %v3489_v27 = vrot.slane %v3475_v46, %v11366_v15  ;;  %v10315_v18 = vld.sshfl [vmem:[%s11364_s25 + $0x44] sm:$0x13 pattern:$0x75316420] }
 0x16f   : > { %v9167_v52 = vcombine.low %v9145_v59, %v9152_v9  ;;  %v3529_v25 = vrot.slane %v10313_v16, %v11366_v15  ;;  %v3536_v20 = vrot.slane %v3522_v19, %v11366_v15  ;;  %v3833_v26 = vcombine.low %v12764_v24, %v12771_v39 }
 0x170   : > { %v3831_v10 = vcombine.low %v3823_v57, %v3830_v12  ;;  %v9166_v6 = vrot.slane %v9138_v38, %v11366_v15  ;;  %v3832_v50 = vcombine.low %v3489_v27, %v3490_v60  ;;  %v10320_v21 = vcombine.high %v12764_v24, %v12771_v39  ;;  %v10314_v57 = vld.sshfl [vmem:[%s11364_s25 + $0x40] sm:$0x33 pattern:$0x75316420] }
 0x171   : > { %v9175_v4 = vrot.slane %v9167_v52, %v11366_v15  ;;  %v3835_v58 = vcombine.low %v3529_v25, %v3536_v20  ;;  %v3849_v14 = vrot.slane %v3833_v26, %v11366_v15  ;;  %v8811_v30 = vrot.slane %v13010_v40, %v11366_v15 }
 0x172   : > { %10327 = vmatmul.mubr.msk.bf16.gmra.mrb[16].mxu1 %vm1631_vm1, %v3831_v10  ;;  %v9168_v17 = vcombine.low %v9159_v8, %v9166_v6  ;;  %v3842_v22 = vrot.slane %v3832_v50, %v11366_v15  ;;  %v3856_v1 = vrot.slane %v10320_v21, %v11366_v15  ;;  %v8828_v51 = vcombine.high %v10643_v37, %v10643_v37  ;;  %v10645_v6 = vld.sshfl [vmem:[%s11364_s25 + $0x24] sm:$0x33 pattern:$0x75316420] }
 0x173   : > { %4048 = vmatprep.mubr.bf16.mxu1 %v13507_v5  ;;  %v3863_v24 = vrot.slane %v3835_v58, %v11366_v15  ;;  %v8835_v39 = vrot.slane %v10643_v37, %v11366_v15  ;;  %v8852_v63 = vcombine.high %v10644_v48, %v10644_v48  ;;  %v8859_v62 = vrot.slane %v10644_v48, %v11366_v15 }
 0x174   : > { %v9182_v40 = vrot.slane %v9168_v17, %v11366_v15  ;;  %v3864_v11 = vcombine.low %v3842_v22, %v3849_v14  ;;  %v8842_v35 = vrot.slane %v8828_v51, %v11366_v15  ;;  %v10657_v16 = vcombine.high %v8811_v30, %v8818_v31  ;;  %v10646_v17 = vld.sshfl [vmem:[%s11364_s25 + $0x28] sm:$0x32 pattern:$0x75316420] }
 0x175   : > { %v3865_v49 = vcombine.low %v3856_v1, %v3863_v24  ;;  %v8866_v13 = vrot.slane %v8852_v63, %v11366_v15  ;;  %v8867_v56 = vcombine.high %v8859_v62, %v8859_v62  ;;  %v3537_v7 = vcombine.high %v3529_v25, %v3529_v25 }
 0x176   : > { %v9183_v46 = vcombine.low %v9175_v4, %v9182_v40  ;;  %v3872_v59 = vrot.slane %v3864_v11, %v11366_v15  ;;  %v9185_v9 = vcombine.low %v8835_v39, %v8842_v35  ;;  %v10658_v60 = vcombine.high %v8835_v39, %v8842_v35 }
 0x177   : > { %v3879_v19 = vrot.slane %v3865_v49, %v11366_v15  ;;  %v9187_v12 = vcombine.low %v8866_v13, %v8867_v56  ;;  %v9194_v38 = vrot.slane %v10657_v16, %v11366_v15  ;;  %v3545_v8 = vcombine.high %v10314_v57, %v10314_v57 }
 0x178   : > { %10667 = vmatmul.mubr.msk.bf16.vlgmr.msra.gmra.mrb[0].mxu0 %vm1631_vm1, %v9183_v46  ;;  %v9201_v31 = vrot.slane %v9185_v9, %v11366_v15  ;;  %v9208_v27 = vrot.slane %v10658_v60, %v11366_v15  ;;  %v13068_v52 = vrot.slane %v10314_v57, %v11366_v15  ;;  %v3569_v25 = vcombine.high %v10315_v18, %v10315_v18 }
 0x179   : > { %9556 = vmatprep.mubr.bf16.mxu0 %v13507_v5  ;;  %v3880_v20 = vcombine.low %v3872_v59, %v3879_v19  ;;  %v9215_v26 = vrot.slane %v9187_v12, %v11366_v15  ;;  %v13073_v37 = vrot.slane %v3545_v8, %v11366_v15  ;;  %v3576_v10 = vrot.slane %v10315_v18, %v11366_v15 }
 0x17a   : > { %v9216_v50 = vcombine.low %v9194_v38, %v9201_v31  ;;  %v13079_v21 = vcombine.high %v13068_v52, %v13068_v52  ;;  %v3583_v48 = vrot.slane %v3569_v25, %v11366_v15  ;;  %v3881_v4 = vcombine.low %v3537_v7, %v13068_v52 }
 0x17b   : > { %10328 = vmatmul.mubr.msk.bf16.gmra.mrb[20].mxu1 %vm1631_vm1, %v3880_v20  ;;  %v9217_v58 = vcombine.low %v9208_v27, %v9215_v26  ;;  %v13086_v14 = vcombine.high %v13073_v37, %v13073_v37  ;;  %v3584_v30 = vcombine.high %v3576_v10, %v3576_v10  ;;  %v8868_v22 = vcombine.high %v8866_v13, %v8866_v13  ;;  %v10357_v13 = vld.sshfl [vmem:[%s11364_s25 + $0x34] sm:$0x33 pattern:$0x75316420] }
 0x17c   : > { %v9224_v1 = vrot.slane %v9216_v50, %v11366_v15  ;;  %4058 = vmatprep.mubr.bf16.mxu1 %v13507_v5  ;;  %v3882_v51 = vcombine.low %v13073_v37, %v13079_v21  ;;  %v3891_v24 = vrot.slane %v3881_v4, %v11366_v15  ;;  %v8876_v39 = vcombine.high %v10645_v6, %v10645_v6 }
 0x17d   : > { %v9231_v63 = vrot.slane %v9217_v58, %v11366_v15  ;;  %v3883_v62 = vcombine.low %v13086_v14, %v3576_v10  ;;  %v3884_v40 = vcombine.low %v3583_v48, %v3584_v30  ;;  %v8883_v11 = vrot.slane %v10645_v6, %v11366_v15 }
 0x17e   : > { %v3898_v35 = vrot.slane %v3882_v51, %v11366_v15  ;;  %v8890_v16 = vrot.slane %v8876_v39, %v11366_v15  ;;  %v8900_v57 = vcombine.high %v10646_v17, %v10646_v17  ;;  %v8907_v49 = vrot.slane %v10646_v17, %v11366_v15 }
 0x17f   : > { %v9232_v56 = vcombine.low %v9224_v1, %v9231_v63  ;;  %v3905_v18 = vrot.slane %v3883_v62, %v11366_v15  ;;  %v3912_v7 = vrot.slane %v3884_v40, %v11366_v15  ;;  %v8891_v46 = vcombine.high %v8883_v11, %v8883_v11  ;;  %v10647_v40 = vld.sshfl [vmem:[%s11364_s25 + $0x2c] sm:$0x33 pattern:$0x75316420] }
 0x180   : > { %v3913_v59 = vcombine.low %v3891_v24, %v3898_v35  ;;  %v8892_v9 = vcombine.high %v8890_v16, %v8890_v16  ;;  %v8914_v60 = vrot.slane %v8900_v57, %v11366_v15  ;;  %v9233_v19 = vcombine.low %v8868_v22, %v8883_v11 }
 0x181   : > { %10668 = vmatmul.mubr.msk.bf16.gmra.mrb[4].mxu0 %vm1631_vm1, %v9232_v56  ;;  %v3914_v12 = vcombine.low %v3905_v18, %v3912_v7  ;;  %v9234_v38 = vcombine.low %v8890_v16, %v8891_v46  ;;  %v4400_v8 = vcombine.high %v10357_v13, %v10357_v13  ;;  %v4407_v6 = vrot.slane %v10357_v13, %v11366_v15  ;;  %v10648_v56 = vld.sshfl [vmem:[%s11364_s25 + $0x30] sm:$0x32 pattern:$0x75316420]  ;;  %v13518_v7 = vld [vmem:[#allocation6_spill] sm:$0xff]  ;;  %v13519_v46 = vld [vmem:[#allocation5_spill] sm:$0xff] }
 0x182   : > { %9566 = vmatprep.mubr.bf16.mxu0 %v13507_v5  ;;  %v3921_v31 = vrot.slane %v3913_v59, %v11366_v15  ;;  %v9235_v27 = vcombine.low %v8892_v9, %v8914_v60  ;;  %v10659_v25 = vcombine.high %v8907_v49, %v8914_v60  ;;  %v9243_v20 = vrot.slane %v9233_v19, %v11366_v15 }
 0x183   : > { %v3928_v26 = vrot.slane %v3914_v12, %v11366_v15  ;;  %v9250_v10 = vrot.slane %v9234_v38, %v11366_v15  ;;  %v13112_v50 = vrot.slane %v4400_v8, %v11366_v15  ;;  %v4799_v22 = vshrl.u32 %v12988_v42, 16 }
 0x184   : > { %v9257_v48 = vrot.slane %v9235_v27, %v11366_v15  ;;  %v9264_v4 = vrot.slane %v10659_v25, %v11366_v15  ;;  %v4804_v51 = vshll.u32 %v12994_v44, 16  ;;  %v4807_v24 = vshrl.u32 %v12994_v44, 16 }
 0x185   : > { %v3929_v58 = vcombine.low %v3921_v31, %v3928_v26  ;;  %v9265_v30 = vcombine.low %v9243_v20, %v9250_v10  ;;  %v4812_v63 = vshll.u32 %v12998_v3, 16  ;;  %v4815_v62 = vshrl.u32 %v12998_v3, 16  ;;  %v10359_v20 = vld.sshfl [vmem:[%s11364_s25 + $0x3c] sm:$0x33 pattern:$0x75316420] }
 0x186   : > { %v9266_v17 = vcombine.low %v9257_v48, %v9264_v4  ;;  %v4806_v42 = vsel %vm11405_vm15, %v4799_v22, %v4804_v51  ;;  %v4820_v11 = vshll.u32 %v13006_v43, 16  ;;  %v4823_v35 = vshrl.u32 %v13006_v43, 16  ;;  %v13520_v43 = vld [vmem:[#allocation7_spill] sm:$0xff] }
 0x187   : > { %10329 = vmatmul.mubr.msk.bf16.gmra.mrb[24].mxu1 %vm1631_vm1, %v3929_v58  ;;  %v9273_v1 = vrot.slane %v9265_v30, %v11366_v15  ;;  %v4828_v16 = vshll.u32 %v4407_v6, 16  ;;  %v4814_v44 = vsel %vm11405_vm15, %v4807_v24, %v4812_v63  ;;  %v4831_v49 = vshrl.u32 %v4407_v6, 16 }
 0x188   : > { %v9280_v39 = vrot.slane %v9266_v17, %v11366_v15  ;;  %5422 = vmatprep.mubr.bf16.mxu1 %v13507_v5  ;;  %v4836_v13 = vshll.u32 %v13112_v50, 16  ;;  %v4822_v3 = vsel %vm11405_vm15, %v4815_v62, %v4820_v11  ;;  %v5167_v59 = vcombine.low %v13519_v46, %v13518_v7 }
 0x189   : > { %v4830_v18 = vsel %vm11405_vm15, %v4823_v35, %v4828_v16  ;;  %v5168_v9 = vcombine.low %v13520_v43, %v4806_v42  ;;  %v5169_v19 = vcombine.low %v4814_v44, %v4822_v3  ;;  %v8924_v12 = vcombine.high %v10647_v40, %v10647_v40 }
 0x18a   : > { %v9281_v57 = vcombine.low %v9273_v1, %v9280_v39  ;;  %v4838_v60 = vsel %vm11405_vm15, %v4831_v49, %v4836_v13  ;;  %v8931_v38 = vrot.slane %v10647_v40, %v11366_v15  ;;  %v5177_v31 = vrot.slane %v5167_v59, %v11366_v15 }
 0x18b   : > { %v5170_v8 = vcombine.low %v4830_v18, %v4838_v60  ;;  %v5184_v27 = vrot.slane %v5168_v9, %v11366_v15  ;;  %v8948_v25 = vcombine.high %v10648_v56, %v10648_v56  ;;  %v5191_v26 = vrot.slane %v5169_v19, %v11366_v15 }
 0x18c   : > { %10669 = vmatmul.mubr.msk.bf16.gmra.mrb[8].mxu0 %vm1631_vm1, %v9281_v57  ;;  %v8938_v10 = vrot.slane %v8924_v12, %v11366_v15  ;;  %v8955_v48 = vrot.slane %v10648_v56, %v11366_v15  ;;  %v4415_v4 = vcombine.high %v4407_v6, %v4407_v6  ;;  %v13156_v22 = vcombine.high %v13112_v50, %v13112_v50 }
 0x18d   : > { %9576 = vmatprep.mubr.bf16.mxu0 %v13507_v5  ;;  %v5198_v58 = vrot.slane %v5170_v8, %v11366_v15  ;;  %v5199_v30 = vcombine.low %v5177_v31, %v5184_v27  ;;  %v8962_v17 = vrot.slane %v8948_v25, %v11366_v15  ;;  %v4448_v39 = vcombine.high %v10359_v20, %v10359_v20  ;;  %v10650_v8 = vld.sshfl [vmem:[%s11364_s25 + $0x38] sm:$0x32 pattern:$0x75316420] }
 0x18e   : > { %v8963_v1 = vcombine.high %v8955_v48, %v8955_v48  ;;  %v9282_v51 = vcombine.low %v8931_v38, %v8938_v10  ;;  %v10660_v24 = vcombine.high %v8931_v38, %v8938_v10  ;;  %v13160_v42 = vrot.slane %v10359_v20, %v11366_v15 }
 0x18f   : > { %v5200_v63 = vcombine.low %v5191_v26, %v5198_v58  ;;  %v5207_v62 = vrot.slane %v5199_v30, %v11366_v15  ;;  %v8964_v40 = vcombine.high %v8962_v17, %v8962_v17  ;;  %v13165_v57 = vrot.slane %v4448_v39, %v11366_v15 }
 0x190   : > { %v9284_v11 = vcombine.low %v8962_v17, %v8963_v1  ;;  %v9292_v35 = vrot.slane %v9282_v51, %v11366_v15  ;;  %v9299_v16 = vrot.slane %v10660_v24, %v11366_v15  ;;  %v4463_v13 = vcombine.high %v13160_v42, %v13160_v42 }
 0x191   : > { %v5214_v44 = vrot.slane %v5200_v63, %v11366_v15  ;;  %v9285_v49 = vcombine.low %v8964_v40, %v4407_v6  ;;  %v4839_v56 = vshrl.u32 %v13112_v50, 16  ;;  %v4844_v7 = vshll.u32 %v4415_v4, 16 }
 0x192   : > { %v9306_v3 = vrot.slane %v9284_v11, %v11366_v15  ;;  %v9314_v18 = vcombine.low %v9292_v35, %v9299_v16  ;;  %v4847_v46 = vshrl.u32 %v4415_v4, 16  ;;  %v4852_v9 = vshll.u32 %v13156_v22, 16 }
 0x193   : > { %v5215_v59 = vcombine.low %v5207_v62, %v5214_v44  ;;  %v9313_v43 = vrot.slane %v9285_v49, %v11366_v15  ;;  %v4885_v60 = vshll.u32 %v13160_v42, 16  ;;  %v4846_v6 = vsel %vm11405_vm15, %v4839_v56, %v4844_v7 }
 0x194   : > { %v9322_v19 = vrot.slane %v9314_v18, %v11366_v15  ;;  %v4888_v12 = vshrl.u32 %v13160_v42, 16  ;;  %v4893_v38 = vshll.u32 %v13165_v57, 16  ;;  %v4854_v27 = vsel %vm11405_vm15, %v4847_v46, %v4852_v9 }
 0x195   : > { %10425 = vmatmul.mubr.msk.bf16.vlgmr.msra.gmra.mrb[16].mxu1 %vm1631_vm1, %v5215_v59  ;;  %v9315_v31 = vcombine.low %v9306_v3, %v9313_v43  ;;  %v4887_v25 = vsel %vm11405_vm15, %v8059_v54, %v4885_v60  ;;  %v4896_v20 = vshrl.u32 %v13165_v57, 16  ;;  %v4901_v10 = vshll.u32 %v4463_v13, 16 }
 0x196   : > { %5432 = vmatprep.mubr.bf16.mxu1 %v13507_v5  ;;  %v4895_v26 = vsel %vm11405_vm15, %v4888_v12, %v4893_v38  ;;  %v5216_v48 = vcombine.low %v4846_v6, %v4854_v27  ;;  %v5217_v58 = vcombine.low %v12805_v45, %v12812_v36  ;;  %v5218_v17 = vcombine.low %v12819_v33, %v4887_v25  ;;  %v10652_v38 = vld.sshfl [vmem:[%s11364_s25 + $0x40] sm:$0x32 pattern:$0x75316420] }
 0x197   : > { %v9329_v30 = vrot.slane %v9315_v31, %v11366_v15  ;;  %v8996_v29 = vcombine.high %v10650_v8, %v10650_v8  ;;  %v9003_v1 = vrot.slane %v10650_v8, %v11366_v15  ;;  %v4903_v54 = vsel %vm11405_vm15, %v4896_v20, %v4901_v10 }
 0x198   : > { %v5226_v51 = vrot.slane %v5216_v48, %v11366_v15  ;;  %v5233_v24 = vrot.slane %v5217_v58, %v11366_v15  ;;  %v9331_v39 = vcombine.low %v13112_v50, %v4415_v4  ;;  %v5219_v62 = vcombine.low %v4895_v26, %v4903_v54 }
 0x199   : > { %v9330_v63 = vcombine.low %v9322_v19, %v9329_v30  ;;  %v5240_v45 = vrot.slane %v5218_v17, %v11366_v15  ;;  %v9010_v36 = vrot.slane %v8996_v29, %v11366_v15  ;;  %v9334_v33 = vcombine.low %v13160_v42, %v13165_v57  ;;  %v10654_v30 = vld.sshfl [vmem:[%s11364_s25 + $0x48] sm:$0x32 pattern:$0x75316420]  ;;  %s10946_s25 = smul.u32 56, %s171_s21 }
 0x19a   : > { %v5248_v40 = vcombine.low %v5226_v51, %v5233_v24  ;;  %v9341_v11 = vrot.slane %v9331_v39, %v11366_v15  ;;  %v4464_v35 = vcombine.high %v13165_v57, %v13165_v57  ;;  %v5247_v16 = vrot.slane %v5219_v62, %v11366_v15 }
 0x19b   : > { %10670 = vmatmul.mubr.msk.bf16.gmra.mrb[12].mxu0 %vm1631_vm1, %v9330_v63  ;;  %v9332_v50 = vcombine.low %v13156_v22, %v9010_v36  ;;  %v10661_v4 = vcombine.high %v9003_v1, %v9010_v36  ;;  %v4904_v44 = vshrl.u32 %v4463_v13, 16  ;;  %v9362_v56 = vrot.slane %v9334_v33, %v11366_v15  ;;  %s13322_s12 = scalar_lea.vmem [#allocation2], %s10946_s25  }
 0x19c   : > { %9586 = vmatprep.mubr.bf16.mxu0 %v13507_v5  ;;  %v5256_v49 = vrot.slane %v5248_v40, %v11366_v15  ;;  %v4909_v3 = vshll.u32 %v4464_v35, 16  ;;  %v4913_v18 = vshrl.u32 %v13068_v52, 16  ;;  %v5249_v7 = vcombine.low %v5240_v45, %v5247_v16 }
 0x19d   : > { %v9348_v46 = vrot.slane %v9332_v50, %v11366_v15  ;;  %v9355_v59 = vrot.slane %v10661_v4, %v11366_v15  ;;  %v4918_v43 = vshll.u32 %v13073_v37, 16  ;;  %v4921_v13 = vshrl.u32 %v13073_v37, 16 }
 0x19e   : > { %v4911_v22 = vsel %vm11405_vm15, %v4904_v44, %v4909_v3  ;;  %v4926_v9 = vshll.u32 %v13079_v21, 16  ;;  %v4929_v60 = vshrl.u32 %v13079_v21, 16  ;;  %v5263_v19 = vrot.slane %v5249_v7, %v11366_v15 }
 0x19f   : > { %v9363_v6 = vcombine.low %v9341_v11, %v9348_v46  ;;  %v9364_v52 = vcombine.low %v9355_v59, %v9362_v56  ;;  %v4920_v12 = vsel %vm11405_vm15, %v4913_v18, %v4918_v43  ;;  %v4934_v31 = vshll.u32 %v13086_v14, 16 }
 0x1a0   : > { %v4928_v8 = vsel %vm11405_vm15, %v4921_v13, %v4926_v9  ;;  %v4937_v37 = vshrl.u32 %v13086_v14, 16  ;;  %v5265_v27 = vcombine.low %v4911_v22, %v4920_v12  ;;  %v5264_v25 = vcombine.low %v5256_v49, %v5263_v19 }
 0x1a1   : > { %v9371_v21 = vrot.slane %v9363_v6, %v11366_v15  ;;  %v9378_v20 = vrot.slane %v9364_v52, %v11366_v15  ;;  %v5268_v26 = vcombine.low %v12908_v55, %v12952_v32  ;;  %v4936_v10 = vsel %vm11405_vm15, %v4929_v60, %v4934_v31 }
 0x1a2   : > { %v4944_v48 = vsel %vm11405_vm15, %v4937_v37, %v8121_v28  ;;  %v5275_v58 = vrot.slane %v5265_v27, %v11366_v15  ;;  %v9044_v14 = vcombine.high %v10652_v38, %v10652_v38  ;;  %10426 = vmatmul.mubr.msk.bf16.gmra.mrb[20].mxu1 %vm1631_vm1, %v5264_v25  ;;  %v5266_v29 = vcombine.low %v4928_v8, %v4936_v10 }
 0x1a3   : > { %v9379_v17 = vcombine.low %v9371_v21, %v9378_v20  ;;  %v5267_v1 = vcombine.low %v4944_v48, %v12902_v53  ;;  %v5296_v55 = vrot.slane %v5268_v26, %v11366_v15  ;;  %5442 = vmatprep.mubr.bf16.mxu1 %v13507_v5  ;;  %v9051_v32 = vrot.slane %v10652_v38, %v11366_v15 }
 0x1a4   : > { %v9058_v54 = vrot.slane %v9044_v14, %v11366_v15  ;;  %v10662_v34 = vcombine.high %v13160_v42, %v13165_v57  ;;  %v9383_v28 = vcombine.low %v12865_v2, %v12869_v0  ;;  %v5282_v51 = vrot.slane %v5266_v29, %v11366_v15 }
 0x1a5   : > { %10671 = vmatmul.mubr.msk.bf16.gmra.mrb[16].mxu0 %vm1631_vm1, %v9379_v17  ;;  %v5289_v53 = vrot.slane %v5267_v1, %v11366_v15  ;;  %v9092_v24 = vcombine.high %v10654_v30, %v10654_v30  ;;  %v9099_v39 = vrot.slane %v10654_v30, %v11366_v15  ;;  %v9059_v63 = vcombine.high %v9051_v32, %v9051_v32  ;;  %v13295_v30 = vld [vmem:[%s13489_s2 + $0x1] ss:$0 sm:$0xff] }
 0x1a6   : > { %9596 = vmatprep.mubr.bf16.mxu0 %v13507_v5  ;;  %v9060_v62 = vcombine.high %v9058_v54, %v9058_v54  ;;  %v9390_v45 = vrot.slane %v10662_v34, %v11366_v15  ;;  %v5297_v36 = vcombine.low %v5275_v58, %v5282_v51  ;;  %v9431_v2 = vcombine.low %v12936_v41, %v12939_v47 }
 0x1a7   : > { %v5298_v42 = vcombine.low %v5289_v53, %v5296_v55  ;;  %v9106_v57 = vrot.slane %v9092_v24, %v11366_v15  ;;  %v9381_v0 = vcombine.low %v9058_v54, %v9059_v63  ;;  %v9411_v33 = vrot.slane %v9383_v28, %v11366_v15 }
 0x1a8   : > { %v9382_v40 = vcombine.low %v9060_v62, %v12860_v23  ;;  %v10664_v11 = vcombine.high %v12936_v41, %v12939_v47  ;;  %v5305_v35 = vrot.slane %v5297_v36, %v11366_v15  ;;  %v9453_v56 = vrot.slane %v9431_v2, %v11366_v15 }
 0x1a9   : > { %v5312_v16 = vrot.slane %v5298_v42, %v11366_v15  ;;  %v9429_v50 = vcombine.low %v12925_v61, %v9106_v57  ;;  %v10663_v4 = vcombine.high %v9099_v39, %v9106_v57  ;;  %v9397_v44 = vrot.slane %v9381_v0, %v11366_v15 }
 0x1aa   : > { %v9404_v49 = vrot.slane %v9382_v40, %v11366_v15  ;;  %v9460_v23 = vrot.slane %v10664_v11, %v11366_v15  ;;  %vm9827_vm0 = vcmask 60416  }
 0x1ab   : > { %v5313_v3 = vcombine.low %v5305_v35, %v5312_v16  ;;  %v9439_v18 = vrot.slane %v9429_v50, %v11366_v15  ;;  %v9446_v41 = vrot.slane %v10663_v4, %v11366_v15  ;;  %v9412_v47 = vcombine.low %v9390_v45, %v9397_v44 }
 0x1ac   : > { %v9413_v7 = vcombine.low %v9404_v49, %v9411_v33  ;;  %v9462_v43 = vcombine.low %v9453_v56, %v9460_v23 }
 0x1ad   : > { %10427 = vmatmul.mubr.msk.bf16.gmra.mrb[24].mxu1 %vm1631_vm1, %v5313_v3  ;;  %v9420_v61 = vrot.slane %v9412_v47, %v11366_v15  ;;  %v9461_v59 = vcombine.low %v9439_v18, %v9446_v41 }
 0x1ae   : > { %v9427_v46 = vrot.slane %v9413_v7, %v11366_v15  ;;  %v9476_v9 = vrot.slane %v9462_v43, %v11366_v15 }
 0x1af   : > { %v9469_v13 = vrot.slane %v9461_v59, %v11366_v15 }
 0x1b0   : > { %v9428_v22 = vcombine.low %v9420_v61, %v9427_v46 }
 0x1b1   : > { %v9477_v60 = vcombine.low %v9469_v13, %v9476_v9 }
 0x1b2   : > { %10672 = vmatmul.mubr.msk.bf16.gmra.mrb[20].mxu0 %vm1631_vm1, %v9428_v22 }
 0x1b3   : > { %9606 = vmatprep.mubr.bf16.mxu0 %v13507_v5 }
 0x1ba   : > { %10673 = vmatmul.mubr.msk.bf16.gmra.mrb[24].mxu0 %vm1631_vm1, %v9477_v60  ;;  %v13317_v60 = vld [vmem:[%s13489_s2] ss:$0 sm:$0xff] }
 0x202   : > { %v4000_v19 = vpop.f32.mrb[0].mxu1 }
 0x203   : > { %v4002_v6 = vpop.f32.mrb[1].mxu1 }
 0x204   : > { %v4004_v52 = vpop.f32.mrb[2].mxu1 }
 0x205   : > { %v4006_v12 = vpop.f32.mrb[3].mxu1 }
 0x212   : > { %v4010_v38 = vpop.f32.mrb[4].mxu1 }
 0x213   : > { %v4012_v8 = vpop.f32.mrb[5].mxu1 }
 0x214   : > { %v4014_v31 = vpop.f32.mrb[6].mxu1 }
 0x215   : > { %v4016_v37 = vpop.f32.mrb[7].mxu1 }
 0x222   : > { %v4020_v27 = vpop.f32.mrb[8].mxu1 }
 0x223   : > { %v4022_v25 = vpop.f32.mrb[9].mxu1 }
 0x224   : > { %v4024_v21 = vpop.f32.mrb[10].mxu1 }
 0x225   : > { %v4026_v20 = vpop.f32.mrb[11].mxu1 }
 0x232   : > { %v13284_v26 = vpop.f32.mrb[12].mxu1 }
 0x233   : > { %v13286_v15 = vpop.f32.mrb[13].mxu1 }
 0x234   : > { %v13288_v5 = vpop.f32.mrb[14].mxu1 }
 0x235   : > { %v13290_v10 = vpop.f32.mrb[15].mxu1 }
 0x24b   : > { %v9548_v48 = vpop.f32.mrb[0].mxu0 }
 0x24c   : > { %v10722_v58 = vadd.f32 %v9548_v48, %v4000_v19  ;;  %v9550_v14 = vpop.f32.mrb[1].mxu0 }
 0x24d   : > { %v10723_v17 = vadd.f32 %v9550_v14, %v4002_v6  ;;  %v9552_v29 = vpop.f32.mrb[2].mxu0 }
 0x24e   : > { %v13297_v1 = vadd.f32 %v9552_v29, %v4004_v52  ;;  %v9554_v55 = vpop.f32.mrb[3].mxu0 }
 0x24f   : > { %v9673_v32 = vadd.f32 %v10723_v17, %v13295_v30  ;;  %v10725_v54 = vadd.f32 %v9554_v55, %v4006_v12 }
 0x251   : > { %v9687_v34 = vsub.f32 0.0, %v9673_v32  ;;  %v9674_v28 = vadd.f32 %v10725_v54, %v13295_v30 }
 0x253   : > { %v9701_v51 = vmul.f32 1.442695, %v9687_v34  ;;  %v9688_v53 = vsub.f32 0.0, %v9674_v28 }
 0x254   : > { %v9558_v24 = vpop.f32.mrb[4].mxu0 }
 0x255   : > { %11072 = vpow2.f32 %v9701_v51  ;;  %v9703_v39 = vmul.f32 1.442695, %v9688_v53  ;;  %v13301_v63 = vadd.f32 %v9558_v24, %v4010_v38  ;;  %v9560_v62 = vpop.f32.mrb[5].mxu0  ;;  %v9652_v38 = vadd.f32 %v10722_v58, %v13317_v60 }
 0x256   : > { %v10727_v45 = vadd.f32 %v9560_v62, %v4012_v8  ;;  %v9562_v36 = vpop.f32.mrb[6].mxu0 }
 0x257   : > { %11074 = vpow2.f32 %v9703_v39  ;;  %v13303_v42 = vadd.f32 %v9562_v36, %v4014_v31  ;;  %v9564_v57 = vpop.f32.mrb[7].mxu0  ;;  %v9654_v53 = vadd.f32 %v13301_v63, %v13317_v60 }
 0x258   : > { %v9675_v2 = vadd.f32 %v10727_v45, %v13295_v30  ;;  %v10729_v0 = vadd.f32 %v9564_v57, %v4016_v37 }
 0x25a   : > { %v9689_v40 = vsub.f32 0.0, %v9675_v2  ;;  %v9676_v33 = vadd.f32 %v10729_v0, %v13295_v30 }
 0x25c   : > { %v9705_v11 = vmul.f32 1.442695, %v9689_v40  ;;  %v9690_v35 = vsub.f32 0.0, %v9676_v33 }
 0x25e   : > { %11076 = vpow2.f32 %v9705_v11  ;;  %v9707_v16 = vmul.f32 1.442695, %v9690_v35 }
 0x25f   : > { %v11073_v50 = vpop.eup %11072  ;;  %v9568_v4 = vpop.f32.mrb[8].mxu0 }
 0x260   : > { %v9729_v44 = vadd.f32 1.0, %v11073_v50  ;;  %11078 = vpow2.f32 %v9707_v16  ;;  %v13307_v49 = vadd.f32 %v9568_v4, %v4020_v27  ;;  %v9570_v56 = vpop.f32.mrb[9].mxu0 }
 0x261   : > { %v11075_v23 = vpop.eup %11074  ;;  %v10731_v3 = vadd.f32 %v9570_v56, %v4022_v25  ;;  %v9572_v18 = vpop.f32.mrb[10].mxu0 }
 0x262   : > { %11080 = vrcp.f32 %v9729_v44  ;;  %v9730_v41 = vadd.f32 1.0, %v11075_v23  ;;  %v13309_v47 = vadd.f32 %v9572_v18, %v4024_v21  ;;  %v9574_v7 = vpop.f32.mrb[11].mxu0  ;;  %v9653_v21 = vadd.f32 %v13297_v1, %v13317_v60 }
 0x263   : > { %v9677_v61 = vadd.f32 %v10731_v3, %v13295_v30  ;;  %v10733_v46 = vadd.f32 %v9574_v7, %v4026_v20 }
 0x264   : > { %11082 = vrcp.f32 %v9730_v41 }
 0x265   : > { %v9691_v59 = vsub.f32 0.0, %v9677_v61  ;;  %v9678_v43 = vadd.f32 %v10733_v46, %v13295_v30 }
 0x267   : > { %v9709_v22 = vmul.f32 1.442695, %v9691_v59  ;;  %v9692_v13 = vsub.f32 0.0, %v9678_v43  ;;  %v9656_v59 = vadd.f32 %v13307_v49, %v13317_v60 }
 0x268   : > { %v11077_v9 = vpop.eup %11076  ;;  %v5424_v12 = vpop.f32.mrb[16].mxu1 }
 0x269   : > { %v9731_v19 = vadd.f32 1.0, %v11077_v9  ;;  %11084 = vpow2.f32 %v9709_v22  ;;  %v9711_v6 = vmul.f32 1.442695, %v9692_v13  ;;  %v5426_v31 = vpop.f32.mrb[17].mxu1 }
 0x26a   : > { %v11079_v52 = vpop.eup %11078  ;;  %v5428_v27 = vpop.f32.mrb[18].mxu1 }
 0x26b   : > { %11086 = vrcp.f32 %v9731_v19  ;;  %v9732_v8 = vadd.f32 1.0, %v11079_v52  ;;  %v5430_v20 = vpop.f32.mrb[19].mxu1  ;;  %v9657_v19 = vadd.f32 %v13309_v47, %v13317_v60 }
 0x26c   : > { %v11081_v37 = vpop.eup %11080  ;;  %11088 = vpow2.f32 %v9711_v6 }
 0x26d   : > { %v9757_v25 = vmul.f32 %v11081_v37, %v9652_v38  ;;  %11090 = vrcp.f32 %v9732_v8 }
 0x26e   : > { %v11083_v48 = vpop.eup %11082  ;;  %v9578_v29 = vpop.f32.mrb[12].mxu0 }
 0x26f   : > { %v10706_v14 = vpack.c.bf16 %v9757_v25, %v9757_v25  ;;  %v9758_v17 = vmul.f32 %v11083_v48, %v9653_v21  ;;  %v13327_v55 = vadd.f32 %v9578_v29, %v13284_v26  ;;  %v9580_v32 = vpop.f32.mrb[13].mxu0 }
 0x270   : > { %v10735_v1 = vadd.f32 %v9580_v32, %v13286_v15  ;;  %v9582_v54 = vpop.f32.mrb[14].mxu0  ;;  %v9655_v15 = vadd.f32 %v13303_v42, %v13317_v60 }
 0x271   : > { %9828 = vst.msk [vmem:[%s13322_s12] sm:$0xf] %vm9827_vm0, %v10706_v14  ;;  %v10707_v58 = vpack.c.bf16 %v9758_v17, %v9758_v17  ;;  %v13333_v28 = vadd.f32 %v9582_v54, %v13288_v5  ;;  %v9584_v51 = vpop.f32.mrb[15].mxu0 }
 0x272   : > { %v9679_v39 = vadd.f32 %v10735_v1, %v13295_v30  ;;  %v10737_v26 = vadd.f32 %v9584_v51, %v13290_v10 }
 0x273   : > { %v11085_v34 = vpop.eup %11084  ;;  %9829 = vst.msk [vmem:[%s13322_s12 + $0x4] sm:$0xf] %vm9827_vm0, %v10707_v58 }
 0x274   : > { %v9733_v24 = vadd.f32 1.0, %v11085_v34  ;;  %v9693_v57 = vsub.f32 0.0, %v9679_v39  ;;  %v9680_v5 = vadd.f32 %v10737_v26, %v13295_v30 }
 0x275   : > { %v11087_v62 = vpop.eup %11086  ;;  %v5434_v35 = vpop.f32.mrb[20].mxu1 }
 0x276   : > { %v11089_v45 = vpop.eup %11088  ;;  %v9759_v36 = vmul.f32 %v11087_v62, %v9654_v53  ;;  %11092 = vrcp.f32 %v9733_v24  ;;  %v9713_v33 = vmul.f32 1.442695, %v9693_v57  ;;  %v9694_v11 = vsub.f32 0.0, %v9680_v5  ;;  %v5436_v10 = vpop.f32.mrb[21].mxu1 }
 0x277   : > { %v11091_v2 = vpop.eup %11090  ;;  %v9734_v0 = vadd.f32 1.0, %v11089_v45  ;;  %v5438_v4 = vpop.f32.mrb[22].mxu1  ;;  %v9658_v5 = vadd.f32 %v13327_v55, %v13317_v60 }
 0x278   : > { %v10708_v40 = vpack.c.bf16 %v9759_v36, %v9759_v36  ;;  %v9760_v63 = vmul.f32 %v11091_v2, %v9655_v15  ;;  %v9715_v42 = vmul.f32 1.442695, %v9694_v11  ;;  %v9588_v50 = vpop.f32.mrb[16].mxu0  ;;  %v5440_v23 = vpop.f32.mrb[23].mxu1 }
 0x279   : > { %11094 = vrcp.f32 %v9734_v0  ;;  %v13344_v44 = vadd.f32 %v9588_v50, %v5424_v12  ;;  %v9590_v56 = vpop.f32.mrb[17].mxu0 }
 0x27a   : > { %9830 = vst.msk [vmem:[%s13322_s12 + $0x8] sm:$0xf] %vm9827_vm0, %v10708_v40  ;;  %v10709_v16 = vpack.c.bf16 %v9760_v63, %v9760_v63  ;;  %11096 = vpow2.f32 %v9713_v33  ;;  %v10739_v3 = vadd.f32 %v9590_v56, %v5426_v31  ;;  %v9592_v18 = vpop.f32.mrb[18].mxu0 }
 0x27b   : > { %11098 = vpow2.f32 %v9715_v42  ;;  %v13348_v41 = vadd.f32 %v9592_v18, %v5428_v27  ;;  %v9594_v7 = vpop.f32.mrb[19].mxu0 }
 0x27c   : > { %9831 = vst.msk [vmem:[%s13322_s12 + $0xc] sm:$0xf] %vm9827_vm0, %v10709_v16  ;;  %v9681_v61 = vadd.f32 %v10739_v3, %v13295_v30  ;;  %v10741_v46 = vadd.f32 %v9594_v7, %v5430_v20  ;;  %v9659_v16 = vadd.f32 %v13333_v28, %v13317_v60 }
 0x27e   : > { %v9695_v22 = vsub.f32 0.0, %v9681_v61  ;;  %v9682_v13 = vadd.f32 %v10741_v46, %v13295_v30 }
 0x280   : > { %v11093_v43 = vpop.eup %11092  ;;  %v9717_v6 = vmul.f32 1.442695, %v9695_v22  ;;  %v9696_v52 = vsub.f32 0.0, %v9682_v13  ;;  %v5444_v12 = vpop.f32.mrb[24].mxu1 }
 0x281   : > { %v9761_v9 = vmul.f32 %v11093_v43, %v9656_v59  ;;  %v5446_v31 = vpop.f32.mrb[25].mxu1  ;;  %v9660_v43 = vadd.f32 %v13344_v44, %v13317_v60 }
 0x282   : > { %11100 = vpow2.f32 %v9717_v6  ;;  %v9719_v49 = vmul.f32 1.442695, %v9696_v52  ;;  %v5448_v25 = vpop.f32.mrb[26].mxu1 }
 0x283   : > { %v11095_v38 = vpop.eup %11094  ;;  %v10710_v8 = vpack.c.bf16 %v9761_v9, %v9761_v9  ;;  %v5450_v20 = vpop.f32.mrb[27].mxu1 }
 0x284   : > { %v11097_v37 = vpop.eup %11096  ;;  %v9762_v27 = vmul.f32 %v11095_v38, %v9657_v19  ;;  %11102 = vpow2.f32 %v9719_v49 }
 0x285   : > { %9832 = vst.msk [vmem:[%s13322_s12 + $0x10] sm:$0xf] %vm9827_vm0, %v10710_v8  ;;  %v9735_v21 = vadd.f32 1.0, %v11097_v37  ;;  %v11099_v48 = vpop.eup %11098  ;;  %v9598_v17 = vpop.f32.mrb[20].mxu0 }
 0x286   : > { %v10711_v14 = vpack.c.bf16 %v9762_v27, %v9762_v27  ;;  %v9736_v47 = vadd.f32 1.0, %v11099_v48  ;;  %v13360_v29 = vadd.f32 %v9598_v17, %v5434_v35  ;;  %v9600_v58 = vpop.f32.mrb[21].mxu0 }
 0x287   : > { %11104 = vrcp.f32 %v9735_v21  ;;  %v10743_v32 = vadd.f32 %v9600_v58, %v5436_v10  ;;  %v9602_v1 = vpop.f32.mrb[22].mxu0 }
 0x288   : > { %9833 = vst.msk [vmem:[%s13322_s12 + $0x14] sm:$0xf] %vm9827_vm0, %v10711_v14  ;;  %11106 = vrcp.f32 %v9736_v47  ;;  %v13362_v54 = vadd.f32 %v9602_v1, %v5438_v4  ;;  %v9604_v34 = vpop.f32.mrb[23].mxu0  ;;  %v9662_v49 = vadd.f32 %v13360_v29, %v13317_v60 }
 0x289   : > { %v9683_v51 = vadd.f32 %v10743_v32, %v13295_v30  ;;  %v10745_v53 = vadd.f32 %v9604_v34, %v5440_v23 }
 0x28b   : > { %v9697_v24 = vsub.f32 0.0, %v9683_v51  ;;  %v9684_v39 = vadd.f32 %v10745_v53, %v13295_v30 }
 0x28c   : > { %v11101_v26 = vpop.eup %11100 }
 0x28d   : > { %v9737_v62 = vadd.f32 1.0, %v11101_v26  ;;  %v9721_v15 = vmul.f32 1.442695, %v9697_v24  ;;  %v9698_v45 = vsub.f32 0.0, %v9684_v39  ;;  %v9608_v36 = vpop.f32.mrb[24].mxu0 }
 0x28e   : > { %v11103_v57 = vpop.eup %11102  ;;  %v10746_v2 = vadd.f32 %v9608_v36, %v5444_v12  ;;  %v9610_v0 = vpop.f32.mrb[25].mxu0 }
 0x28f   : > { %11108 = vrcp.f32 %v9737_v62  ;;  %v9738_v63 = vadd.f32 1.0, %v11103_v57  ;;  %v9723_v33 = vmul.f32 1.442695, %v9698_v45  ;;  %v10747_v11 = vadd.f32 %v9610_v0, %v5446_v31  ;;  %v9612_v35 = vpop.f32.mrb[26].mxu0 }
 0x290   : > { %11110 = vpow2.f32 %v9721_v15  ;;  %v10748_v42 = vadd.f32 %v9612_v35, %v5448_v25  ;;  %v9614_v50 = vpop.f32.mrb[27].mxu0  ;;  %v9664_v58 = vadd.f32 %v10746_v2, %v13317_v60 }
 0x291   : > { %v11105_v40 = vpop.eup %11104  ;;  %11112 = vrcp.f32 %v9738_v63  ;;  %v9685_v55 = vadd.f32 %v10747_v11, %v13295_v30  ;;  %v10749_v56 = vadd.f32 %v9614_v50, %v5450_v20  ;;  %v9663_v20 = vadd.f32 %v13362_v54, %v13317_v60 }
 0x292   : > { %v9763_v10 = vmul.f32 %v11105_v40, %v9658_v5  ;;  %v11107_v4 = vpop.eup %11106  ;;  %11114 = vpow2.f32 %v9723_v33  ;;  %v9665_v1 = vadd.f32 %v10748_v42, %v13317_v60 }
 0x293   : > { %v9764_v3 = vmul.f32 %v11107_v4, %v9659_v16  ;;  %v9699_v18 = vsub.f32 0.0, %v9685_v55  ;;  %v9686_v7 = vadd.f32 %v10749_v56, %v13295_v30  ;;  %v9661_v30 = vadd.f32 %v13348_v41, %v13317_v60 }
 0x294   : > { %v10712_v23 = vpack.c.bf16 %v9763_v10, %v9763_v10 }
 0x295   : > { %v10713_v61 = vpack.c.bf16 %v9764_v3, %v9764_v3  ;;  %v9725_v46 = vmul.f32 1.442695, %v9699_v18  ;;  %v9700_v28 = vsub.f32 0.0, %v9686_v7 }
 0x296   : > { %9834 = vst.msk [vmem:[%s13322_s12 + $0x18] sm:$0xf] %vm9827_vm0, %v10712_v23 }
 0x297   : > { %9835 = vst.msk [vmem:[%s13322_s12 + $0x1c] sm:$0xf] %vm9827_vm0, %v10713_v61  ;;  %11116 = vpow2.f32 %v9725_v46  ;;  %v9727_v59 = vmul.f32 1.442695, %v9700_v28 }
 0x299   : > { %v11109_v22 = vpop.eup %11108  ;;  %11118 = vpow2.f32 %v9727_v59 }
 0x29a   : > { %v11111_v13 = vpop.eup %11110  ;;  %v9765_v9 = vmul.f32 %v11109_v22, %v9660_v43 }
 0x29b   : > { %v11113_v19 = vpop.eup %11112  ;;  %v9739_v6 = vadd.f32 1.0, %v11111_v13 }
 0x29c   : > { %v11115_v52 = vpop.eup %11114  ;;  %v10714_v12 = vpack.c.bf16 %v9765_v9, %v9765_v9  ;;  %v9766_v38 = vmul.f32 %v11113_v19, %v9661_v30 }
 0x29d   : > { %11120 = vrcp.f32 %v9739_v6  ;;  %v9740_v8 = vadd.f32 1.0, %v11115_v52 }
 0x29e   : > { %9836 = vst.msk [vmem:[%s13322_s12 + $0x20] sm:$0xf] %vm9827_vm0, %v10714_v12  ;;  %v10715_v31 = vpack.c.bf16 %v9766_v38, %v9766_v38 }
 0x29f   : > { %11122 = vrcp.f32 %v9740_v8 }
 0x2a0   : > { %9837 = vst.msk [vmem:[%s13322_s12 + $0x24] sm:$0xf] %vm9827_vm0, %v10715_v31 }
 0x2a1   : > { %v11117_v44 = vpop.eup %11116 }
 0x2a2   : > { %v9741_v37 = vadd.f32 1.0, %v11117_v44 }
 0x2a3   : > { %v11119_v27 = vpop.eup %11118 }
 0x2a4   : > { %11124 = vrcp.f32 %v9741_v37  ;;  %v9742_v41 = vadd.f32 1.0, %v11119_v27 }
 0x2a6   : > { %11126 = vrcp.f32 %v9742_v41 }
 0x2a7   : > { %v11121_v25 = vpop.eup %11120 }
 0x2a8   : > { %v9767_v21 = vmul.f32 %v11121_v25, %v9662_v49 }
 0x2a9   : > { %v11123_v48 = vpop.eup %11122 }
 0x2aa   : > { %v10716_v14 = vpack.c.bf16 %v9767_v21, %v9767_v21  ;;  %v9768_v47 = vmul.f32 %v11123_v48, %v9663_v20 }
 0x2ac   : > { %9838 = vst.msk [vmem:[%s13322_s12 + $0x28] sm:$0xf] %vm9827_vm0, %v10716_v14  ;;  %v10717_v17 = vpack.c.bf16 %v9768_v47, %v9768_v47 }
 0x2ae   : > { %v11125_v32 = vpop.eup %11124  ;;  %9839 = vst.msk [vmem:[%s13322_s12 + $0x2c] sm:$0xf] %vm9827_vm0, %v10717_v17 }
 0x2af   : > { %v9769_v29 = vmul.f32 %v11125_v32, %v9664_v58  ;;  %9848 = sbr.rel (!%p11320_p5) target bundleno = 765 (0x2fd), region = 36 }
 0x2b0   : > { %v11127_v34 = vpop.eup %11126 }
 0x2b1   : > { %v10718_v51 = vpack.c.bf16 %v9769_v29, %v9769_v29  ;;  %v9770_v53 = vmul.f32 %v11127_v34, %v9665_v1 }
 0x2b3   : > { %9840 = vst.msk [vmem:[%s13322_s12 + $0x30] sm:$0xf] %vm9827_vm0, %v10718_v51  ;;  %v10719_v54 = vpack.c.bf16 %v9770_v53, %v9770_v53 }
 0x2b5   : > { %9841 = vst.msk [vmem:[%s13322_s12 + $0x34] sm:$0xf] %vm9827_vm0, %v10719_v54 }
 0x2b6   : > { %s13537_s29 = smov (!%p9851_p10, %s9850_s29), 14 }
 0x2b7   : > { %s10690_s8 = sshll.u32 %s13537_s29, 6 }
 0x2b8   : > { %p10693_p11 = scmp.eq.s32.totalorder %s10690_s8, 0 }
 0x2b9   : > { %11128 = sdivrem.u32 (!%p10693_p11), %s13537_s29, 14 }
 0x2ba   : > { %9861 = sbr.rel (%p10693_p11) target bundleno = 765 (0x2fd), region = 40 }
 0x2c2   : > { %s13411_s23 = spop.drf %11128 }
 0x2c3   : > { %p10694_p12 = scmp.le.s32.totalorder %s13411_s23, 0 }
 0x2c4   : > { %s13521_s14 = smov (!%p10694_p12), %s13407_s7  ;;  %s13522_s15 = smov (!%p10694_p12), %s13322_s12 }
 0x2c5   : > { %10081 = sbr.rel (%p10694_p12) target bundleno = 736 (0x2e0), region = 123  ;;  %s13420_s9 = smov (!%p10694_p12), 0  }
 0x2c6   : > { %s13422_s10 = smov (!%p10694_p12), 0  }
 0x2cc LB: >> { %v9878_v60 = vld [vmem:[%s11226_s15] sm:$0xf]  ;;  %v9880_v24 = vld [vmem:[%s11226_s15 + $0x4] sm:$0xf]  ;;  %v9882_v39 = vld [vmem:[%s11226_s15 + $0x8] sm:$0xf]  ;;  %s11234_s10 = sphi %s13422_s10, %s9872_s10   ;;  %s11230_s9 = sphi %s13420_s9, %s13523_s9   ;;  %s11226_s15 = sphi %s13522_s15, %s9911_s15   ;;  %s11222_s14 = sphi %s13521_s14, %s9912_s14  }
 0x2cd   : >> { %9879 = vst [vmem:[%s11222_s14] sm:$0xf] %v9878_v60  ;;  %9881 = vst [vmem:[%s11222_s14 + $0x4] sm:$0xf] %v9880_v24  ;;  %v9884_v26 = vld [vmem:[%s11226_s15 + $0xc] sm:$0xf]  ;;  %s9906_s11 = sadd.s32 1, %s11230_s9 }
 0x2ce   : >> { %9883 = vst [vmem:[%s11222_s14 + $0x8] sm:$0xf] %v9882_v39  ;;  %v9886_v62 = vld [vmem:[%s11226_s15 + $0x10] sm:$0xf]  ;;  %v9888_v15 = vld [vmem:[%s11226_s15 + $0x14] sm:$0xf]  ;;  %p9907_p13 = scmp.ge.s32.totalorder %s9906_s11, %s13411_s23 }
 0x2cf   : >> { %9885 = vst [vmem:[%s11222_s14 + $0xc] sm:$0xf] %v9884_v26  ;;  %9887 = vst [vmem:[%s11222_s14 + $0x10] sm:$0xf] %v9886_v62  ;;  %v9890_v45 = vld [vmem:[%s11226_s15 + $0x18] sm:$0xf] }
 0x2d0   : >> { %9889 = vst [vmem:[%s11222_s14 + $0x14] sm:$0xf] %v9888_v15  ;;  %v9892_v36 = vld [vmem:[%s11226_s15 + $0x1c] sm:$0xf]  ;;  %v9894_v57 = vld [vmem:[%s11226_s15 + $0x20] sm:$0xf] }
 0x2d1   : >> { %9891 = vst [vmem:[%s11222_s14 + $0x18] sm:$0xf] %v9890_v45  ;;  %9893 = vst [vmem:[%s11222_s14 + $0x1c] sm:$0xf] %v9892_v36  ;;  %v9896_v5 = vld [vmem:[%s11226_s15 + $0x24] sm:$0xf] }
 0x2d2   : >> { %9895 = vst [vmem:[%s11222_s14 + $0x20] sm:$0xf] %v9894_v57  ;;  %v9898_v2 = vld [vmem:[%s11226_s15 + $0x28] sm:$0xf]  ;;  %v9900_v0 = vld [vmem:[%s11226_s15 + $0x2c] sm:$0xf] }
 0x2d3   : >> { %9897 = vst [vmem:[%s11222_s14 + $0x24] sm:$0xf] %v9896_v5  ;;  %9899 = vst [vmem:[%s11222_s14 + $0x28] sm:$0xf] %v9898_v2  ;;  %v9902_v40 = vld [vmem:[%s11226_s15 + $0x30] sm:$0xf] }
 0x2d4   : >> { %9901 = vst [vmem:[%s11222_s14 + $0x2c] sm:$0xf] %v9900_v0  ;;  %v9904_v63 = vld [vmem:[%s11226_s15 + $0x34] sm:$0xf]  ;;  %9903 = vst [vmem:[%s11222_s14 + $0x30] sm:$0xf] %v9902_v40 }
 0x2d5   : >> { %9905 = vst [vmem:[%s11222_s14 + $0x34] sm:$0xf] %v9904_v63  ;;  %s13539_s11 = smov (%p9907_p13, %s9906_s11), 0  ;;  %s9872_s10 = sadd.s32 1, %s11234_s10  }
 0x2d6   : >> { %s9909_s21 = smul.u32 56, %s13539_s11  ;;  %p9871_p0 = scmp.ge.s32.totalorder %s9872_s10, %s13411_s23 }
 0x2d7   : >> { %s13523_s9 = smov %s13539_s11 }
 0x2d8   : >> { %s9911_s15 = scalar_lea.vmem %s13322_s12, %s9909_s21 [#allocation2]   ;;  %s9912_s14 = scalar_lea.vmem %s13407_s7, %s9909_s21  }
 0x2d9   : > { %9874 = sbr.rel (!%p9871_p0) target bundleno = 716 (0x2cc), region = 129 }
 0x2e0 PF: > { %11130 = sdivrem.u32 %s13537_s29, 14 }
 0x2e1   : > { %s10695_s22 = smul.u32 56, %s13411_s23 }
 0x2e3   : > { %s9917_s24 = scalar_lea.vmem %s13322_s12, %s10695_s22 [#allocation2]   ;;  %s9919_s25 = scalar_lea.vmem %s13407_s7, %s10695_s22  }
 0x2e9   : > { %s11131_s26 = spop.drf %11130 }
 0x2ea   : > { %p10697_p1 = scmp.le.s32.totalorder %s11131_s26, 0 }
 0x2eb   : > { %s11236_s28 = smov (!%p10697_p1), %s9919_s25   ;;  %s11240_s30 = smov (!%p10697_p1), %s9917_s24  }
 0x2ec   : > { %10095 = sbr.rel (%p10697_p1) target bundleno = 765 (0x2fd), region = 134  ;;  %s11244_s4 = smov (!%p10697_p1), 0  }
 0x2ed   : > { %s11248_s5 = smov (!%p10697_p1), 0  }
 0x2f3 LB: >> { %v9929_v33 = vld [vmem:[%s11242_s30] sm:$0xf]  ;;  %s9931_s6 = sadd.s32 1, %s11246_s4  ;;  %s9923_s5 = sadd.s32 1, %s11250_s5   ;;  %s11250_s5 = sphi %s11248_s5, %s9923_s5   ;;  %s11246_s4 = sphi %s11244_s4, %s11245_s4   ;;  %s11242_s30 = sphi %s11240_s30, %s9936_s30   ;;  %s11238_s28 = sphi %s11236_s28, %s9937_s28  }
 0x2f4   : >> { %9930 = vst [vmem:[%s11238_s28] sm:$0xf] %v9929_v33  ;;  %p9932_p2 = scmp.ge.s32.totalorder %s9931_s6, %s11131_s26  ;;  %p9922_p3 = scmp.ge.s32.totalorder %s9923_s5, %s11131_s26 }
 0x2f6   : >> { %s13541_s6 = smov (%p9932_p2, %s9931_s6), 0  ;;  %9925 = sbr.rel (!%p9922_p3) target bundleno = 755 (0x2f3), region = 140 }
 0x2f7   : >> { %s10698_s12 = sshll.u32 %s13541_s6, 2  ;;  %s11245_s4 = smov %s13541_s6  }
 0x2f8   : >> { %s9936_s30 = scalar_lea.vmem %s9917_s24, %s10698_s12 [#allocation2]   ;;  %s9937_s28 = scalar_lea.vmem %s9919_s25, %s10698_s12  }
 0x2fd PF: > { %s13_s18 = sadd.s32 1, %s11218_s18   ;;  %s13524_s12 = smov %s11198_s13 }
 0x2fe   : > { %p10_p4 = scmp.ge.s32.totalorder %s13_s18, 6   ;;  %s13525_s13 = smov %s11331_s27 }
 0x2ff   : > { %s13526_s14 = smov %s11210_s16  ;;  %s13527_s15 = smov %s11214_s17 }
 0x300   : > { %s13528_s16 = smov %s13531_s19  ;;  %s13529_s17 = smov %s13535_s20 }
 0x301   :  { %12 = sbr.rel (!%p10_p4) target bundleno = 4 (0x4), region = 151 }

</bundles_post_ra>
